<compile_context>
chip_gen: v5e
topology: v5e:2x2
jax: 0.10.0
libtpu: 0.0.40
codegen_flags: <defaults>
</compile_context>

<pallas_src>
import functools
import math

import jax
import jax.numpy as jnp
from jax.experimental import pallas as pl
from jax.experimental.pallas import tpu as pltpu

NEG_SLOPE = 0.01   # nn.LeakyReLU default
LN_EPS = 1e-5      # nn.LayerNorm default
MASK_BIG = 1e30    # additive key-padding / block-diagonal bias magnitude


# ---------------------------------------------------------------------------
# In-kernel helpers (operate on traced values)
# ---------------------------------------------------------------------------
def _leaky(x):
    return jnp.where(x >= 0.0, x, NEG_SLOPE * x)


def _ln(x, g, b):
    mu = jnp.mean(x, axis=-1, keepdims=True)
    xc = x - mu
    var = jnp.mean(xc * xc, axis=-1, keepdims=True)
    return xc * jax.lax.rsqrt(var + LN_EPS) * g + b


def _softmax_last(s):
    s = s - jnp.max(s, axis=-1, keepdims=True)
    p = jnp.exp(s)
    return p * pl.reciprocal(jnp.sum(p, axis=-1, keepdims=True), approx=True)


def _dot(a, b):
    return jnp.dot(a, b, preferred_element_type=jnp.float32)


def _dot_nt(a, b):
    # a @ b.T without an explicit transpose (contract last dims of both).
    return jax.lax.dot_general(a, b, (((1,), (1,)), ((), ())),
                               preferred_element_type=jnp.float32)


def _w(ref):
    # per-layer bf16 weight block (1, m, n) -> f32 (m, n) in VMEM
    return ref[0].astype(jnp.float32)


# ---------------------------------------------------------------------------
# Fused kernel: embeddings + 6 encoder layers + cross-attn + trunk + head
# ---------------------------------------------------------------------------
def _deeponet_kernel(
    # data (constant across grid)
    y_ref, t_ref, ts_ref, smask_ref, cmask_ref,
    # Linear(1, d) embeddings
    wey_ref, bey_ref, wet_ref, bet_ref,
    # per-layer encoder weights (streamed, big matrices bf16)
    wq_ref, bq_ref, wk_ref, bk_ref, wv_ref, bv_ref,
    wo_ref, bo_ref, w1_ref, b1_ref, w2_ref, b2_ref,
    g1_ref, be1_ref, g2_ref, be2_ref,
    # branch cross-attention (constant)
    lq_ref, aqw_ref, aqb_ref, akw_ref, akb_ref, avw_ref, avb_ref,
    aow_ref, aob_ref,
    # trunk MLP (constant)
    tw1_ref, tb1_ref, tg1_ref, tbe1_ref, tw2_ref, tb2_ref,
    tw3_ref, tb3_ref, tg2_ref, tbe2_ref, tw4_ref, tb4_ref,
    # final projection (constant, first layer split into branch/trunk halves)
    fw1b_ref, fw1t_ref, fb1_ref, fg1_ref, fbe1_ref,
    fw2_ref, fb2_ref, fw3_ref, fb3_ref, fg2_ref, fbe2_ref,
    fw4t_ref, fb4_ref,
    # output
    out_ref,
    # scratch
    x_vmem,
    *, bsz, seq, tn, d, e):

    layer = pl.program_id(0)

    # ---- layer-0 prologue: Linear(1,d) embeddings written directly into the
    #      two lane-halves of the resident activation (no concat copy). ----
    @pl.when(layer == 0)
    def _():
        x_vmem[:, 0:d] = y_ref[...] * wey_ref[...] + bey_ref[...]   # (BS, d)
        x_vmem[:, d:e] = t_ref[...] * wet_ref[...] + bet_ref[...]   # (BS, d)

    # ---- one post-LN TransformerEncoderLayer (nhead=1, ReLU FFN), computed
    #      as flat (B*S, .) matmuls; block-diag + padding mask is additive ----
    x = x_vmem[...]                                                 # (BS, e)
    q = _dot(x, _w(wq_ref)) + bq_ref[0]        # 1/sqrt(e) pre-folded into wq/bq
    k = _dot(x, _w(wk_ref)) + bk_ref[0]
    v = _dot(x, _w(wv_ref)) + bv_ref[0]
    s = _dot_nt(q, k) + smask_ref[...]                              # (BS, BS)
    p = _softmax_last(s)
    a = _dot(p, v)                                                  # (BS, e)
    o = _dot(a, _w(wo_ref)) + bo_ref[0]
    x = _ln(x + o, g1_ref[0], be1_ref[0])                           # norm1
    h = jnp.maximum(_dot(x, _w(w1_ref)) + b1_ref[0], 0.0)           # (BS, ff)
    h = _dot(h, _w(w2_ref)) + b2_ref[0]
    x = _ln(x + h, g2_ref[0], be2_ref[0])                           # norm2
    x_vmem[...] = x

    # ---- epilogue (last layer only): cross-attention with the learnable
    #      query + trunk embedding/MLP + final head, all fused. ----
    @pl.when(layer == pl.num_programs(0) - 1)
    def _():
        # cross-attention: the query row is identical for every batch, so the
        # score row is computed once and only the mask differs per batch.
        qc = _dot(lq_ref[...], aqw_ref[...]) + aqb_ref[...]          # (1, e)
        kc = _dot(x, akw_ref[...]) + akb_ref[...]                    # (BS, e)
        vc = _dot(x, avw_ref[...]) + avb_ref[...]                    # (BS, e)
        sc = _dot_nt(qc, kc) + cmask_ref[...]                        # (B, BS)
        pc = _softmax_last(sc)
        br = _dot(_dot(pc, vc), aow_ref[...]) + aob_ref[...]         # (B, e)

        # trunk: Linear(1,d) embedding + MLP over all B*T rows at once.
        ht = ts_ref[...] * wet_ref[...] + bet_ref[...]               # (B*T, d)
        ht = _leaky(_dot(ht, tw1_ref[...]) + tb1_ref[...])
        ht = _ln(ht, tg1_ref[...], tbe1_ref[...])
        ht = _leaky(_dot(ht, tw2_ref[...]) + tb2_ref[...])
        ht = _leaky(_dot(ht, tw3_ref[...]) + tb3_ref[...])
        ht = _ln(ht, tg2_ref[...], tbe2_ref[...])
        trunk = _leaky(_dot(ht, tw4_ref[...]) + tb4_ref[...])        # (B*T, d)

        # final_proj layer 1 with split weight: branch half computed once per
        # batch, broadcast over its T trunk rows (no (T, 3d) concat).
        brc = _dot(br, fw1b_ref[...]) + fb1_ref[...]                 # (B, d)
        brc = jnp.broadcast_to(brc[:, None, :], (bsz, tn, d)).reshape(bsz * tn, d)
        hf = _leaky(brc + _dot(trunk, fw1t_ref[...]))
        hf = _ln(hf, fg1_ref[...], fbe1_ref[...])
        hf = _leaky(_dot(hf, fw2_ref[...]) + fb2_ref[...])
        hf = _leaky(_dot(hf, fw3_ref[...]) + fb3_ref[...])
        hf = _ln(hf, fg2_ref[...], fbe2_ref[...])                    # (B*T, d)
        # last Linear(d,1) as (1,d)@(d,B*T): lane-dense output slab.
        out_ref[...] = _dot(fw4t_ref[...], hf.T) + fb4_ref[...]      # (1, B*T)


# ---------------------------------------------------------------------------
# Wrapper: builds masks, operand list and BlockSpecs, one pallas_call.
# ---------------------------------------------------------------------------
def deeponet_forward(params, y, t, t_sample, y_mask):
    bsz, seq = y.shape
    tn = t_sample.shape[1]
    d = params["wey"].shape[1]
    e = 2 * d
    enc = params["enc"]
    num_layers = enc["wq"].shape[0]

    ym = y_mask.astype(jnp.float32)
    y_in = (y * ym).reshape(bsz * seq, 1)            # y.unsqueeze(-1) * mask
    t_in = (t * ym).reshape(bsz * seq, 1)
    ts_in = t_sample.reshape(bsz * tn, 1)

    # Combined block-diagonal + key-padding additive masks (flat attention).
    valid = ym.reshape(bsz * seq) > 0.5
    bidx = jnp.arange(bsz * seq, dtype=jnp.int32) // seq
    keep_s = (bidx[:, None] == bidx[None, :]) & valid[None, :]
    smask = jnp.where(keep_s, 0.0, -MASK_BIG).astype(jnp.float32)      # (BS, BS)
    keep_c = (bidx[None, :] == jnp.arange(bsz, dtype=jnp.int32)[:, None]) \
        & valid[None, :]
    cmask = jnp.where(keep_c, 0.0, -MASK_BIG).astype(jnp.float32)      # (B, BS)

    ap, tp, fp = params["attn"], params["trunk"], params["final"]

    operands, in_specs = [], []

    def add_const(arr):
        idx = (0,) * arr.ndim
        operands.append(arr)
        in_specs.append(pl.BlockSpec(arr.shape, lambda l, idx=idx: idx))

    def add_layer(arr):
        operands.append(arr)
        in_specs.append(pl.BlockSpec((1,) + arr.shape[1:], lambda l: (l, 0, 0)))

    for arr in (y_in, t_in, ts_in, smask, cmask,
                params["wey"], params["bey"], params["wet"], params["bet"]):
        add_const(arr)
    for name in ("wq", "bq", "wk", "bk", "wv", "bv", "wo", "bo",
                 "w1", "b1", "w2", "b2", "g1", "be1", "g2", "be2"):
        add_layer(enc[name])
    for arr in (params["lq"],
                ap["aqw"], ap["aqb"], ap["akw"], ap["akb"],
                ap["avw"], ap["avb"], ap["aow"], ap["aob"],
                tp["w1"], tp["b1"], tp["g1"], tp["be1"], tp["w2"], tp["b2"],
                tp["w3"], tp["b3"], tp["g2"], tp["be2"], tp["w4"], tp["b4"],
                fp["w1b"], fp["w1t"], fp["b1"], fp["g1"], fp["be1"],
                fp["w2"], fp["b2"], fp["w3"], fp["b3"], fp["g2"], fp["be2"],
                fp["w4t"], fp["b4"]):
        add_const(arr)

    kernel = functools.partial(_deeponet_kernel, bsz=bsz, seq=seq, tn=tn, d=d, e=e)
    out = pl.pallas_call(
        kernel,
        out_shape=jax.ShapeDtypeStruct((1, bsz * tn), jnp.float32),
        grid=(num_layers,),
        in_specs=in_specs,
        out_specs=pl.BlockSpec((1, bsz * tn), lambda l: (0, 0)),
        scratch_shapes=[pltpu.VMEM((bsz * seq, e), jnp.float32)],
        compiler_params=pltpu.CompilerParams(
            dimension_semantics=("arbitrary",),
            vmem_limit_bytes=32 * 1024 * 1024),
    )(*operands)
    return out.reshape(bsz, tn)


# ---------------------------------------------------------------------------
# Parameter initialization (deterministic, synthetic)
# ---------------------------------------------------------------------------
class KeyGen:
    def __init__(self, key):
        self._key = key

    def __call__(self):
        self._key, sub = jax.random.split(self._key)
        return sub


def init_params(key, d_model, num_layers=6, dim_ff=2048):
    # TODO(synk): embedding_t_trunk / embedding_act are unused by forward(); omitted.
    e = 2 * d_model
    scale = 1.0 / math.sqrt(e)          # nhead=1 -> head_dim = 2*d_model
    kg = KeyGen(key)

    def lin(din, dout):
        lim = 1.0 / math.sqrt(din)
        w = jax.random.uniform(kg(), (din, dout), jnp.float32, -lim, lim)
        b = jax.random.uniform(kg(), (1, dout), jnp.float32, -lim, lim)
        return w, b

    def lnp(dd):
        return jnp.ones((1, dd), jnp.float32), jnp.zeros((1, dd), jnp.float32)

    names = ("wq", "bq", "wk", "bk", "wv", "bv", "wo", "bo",
             "w1", "b1", "w2", "b2", "g1", "be1", "g2", "be2")
    acc = {n: [] for n in names}
    for _ in range(num_layers):
        wq, bq = lin(e, e); wk, bk = lin(e, e); wv, bv = lin(e, e)
        wo, bo = lin(e, e)
        w1, b1 = lin(e, dim_ff); w2, b2 = lin(dim_ff, e)
        g1, be1 = lnp(e); g2, be2 = lnp(e)
        vals = dict(wq=wq * scale, bq=bq * scale,     # fold attention scale
                    wk=wk, bk=bk, wv=wv, bv=bv, wo=wo, bo=bo,
                    w1=w1, b1=b1, w2=w2, b2=b2,
                    g1=g1, be1=be1, g2=g2, be2=be2)
        for n in names:
            acc[n].append(vals[n])
    enc = {n: jnp.stack(acc[n]) for n in names}
    # Stream the per-layer weight matrices as bf16 (halves the dominant HBM
    # traffic); biases and LayerNorm params stay f32.
    for n in ("wq", "wk", "wv", "wo", "w1", "w2"):
        enc[n] = enc[n].astype(jnp.bfloat16)

    aqw, aqb = lin(e, e)
    akw, akb = lin(e, e)
    avw, avb = lin(e, e)
    aow, aob = lin(e, e)
    attn = dict(aqw=aqw * scale, aqb=aqb * scale,     # fold attention scale
                akw=akw, akb=akb, avw=avw, avb=avb, aow=aow, aob=aob)

    tw1, tb1 = lin(d_model, d_model); tg1, tbe1 = lnp(d_model)
    tw2, tb2 = lin(d_model, d_model); tw3, tb3 = lin(d_model, d_model)
    tg2, tbe2 = lnp(d_model); tw4, tb4 = lin(d_model, d_model)
    trunk = dict(w1=tw1, b1=tb1, g1=tg1, be1=tbe1, w2=tw2, b2=tb2,
                 w3=tw3, b3=tb3, g2=tg2, be2=tbe2, w4=tw4, b4=tb4)

    fw1, fb1 = lin(3 * d_model, d_model); fg1, fbe1 = lnp(d_model)
    fw2, fb2 = lin(d_model, d_model); fw3, fb3 = lin(d_model, d_model)
    fg2, fbe2 = lnp(d_model); fw4, fb4 = lin(d_model, 1)
    final = dict(w1b=fw1[:e], w1t=fw1[e:],            # split: branch / trunk rows
                 b1=fb1, g1=fg1, be1=fbe1, w2=fw2, b2=fb2, w3=fw3, b3=fb3,
                 g2=fg2, be2=fbe2,
                 w4t=fw4.T,                           # (1, d) row, lane-dense head
                 b4=fb4.reshape(1, 1))

    wey, bey = lin(1, d_model)
    wet, bet = lin(1, d_model)

    return dict(wey=wey, bey=bey, wet=wet, bet=bet, enc=enc,
                lq=jax.random.normal(kg(), (1, e), jnp.float32),
                attn=attn, trunk=trunk, final=final)


if __name__ == "__main__":
    d_model = 32
    B, S, T = 2, 8, 8

    key = jax.random.PRNGKey(0)
    kp, ky, kt, kts = jax.random.split(key, 4)
    params = init_params(kp, d_model)

    y = jax.random.normal(ky, (B, S), jnp.float32)
    t = jax.random.uniform(kt, (B, S), jnp.float32)
    t_sample = jax.random.uniform(kts, (B, T), jnp.float32)
    y_mask = jnp.array([[1, 1, 1, 1, 1, 1, 0, 0],
                        [1, 1, 1, 1, 1, 0, 0, 0]], jnp.float32)

    out = jax.jit(deeponet_forward)(params, y, t, t_sample, y_mask)
    out = jax.block_until_ready(out)
    assert out.shape == (B, T), out.shape
    assert bool(jnp.all(jnp.isfinite(out)))
    print("KERNEL_OK")
</pallas_src>

<mosaic_0001>
module attributes {stable_mosaic.version = 11 : i64} {
  func.func @_deeponet_kernel(%arg0: i32, %arg1: memref<16x1xf32, #tpu.memory_space<vmem>>, %arg2: memref<16x1xf32, #tpu.memory_space<vmem>>, %arg3: memref<16x1xf32, #tpu.memory_space<vmem>>, %arg4: memref<16x16xf32, #tpu.memory_space<vmem>>, %arg5: memref<2x16xf32, #tpu.memory_space<vmem>>, %arg6: memref<1x32xf32, #tpu.memory_space<vmem>>, %arg7: memref<1x32xf32, #tpu.memory_space<vmem>>, %arg8: memref<1x32xf32, #tpu.memory_space<vmem>>, %arg9: memref<1x32xf32, #tpu.memory_space<vmem>>, %arg10: memref<1x64x64xbf16, #tpu.memory_space<vmem>>, %arg11: memref<1x1x64xf32, #tpu.memory_space<vmem>>, %arg12: memref<1x64x64xbf16, #tpu.memory_space<vmem>>, %arg13: memref<1x1x64xf32, #tpu.memory_space<vmem>>, %arg14: memref<1x64x64xbf16, #tpu.memory_space<vmem>>, %arg15: memref<1x1x64xf32, #tpu.memory_space<vmem>>, %arg16: memref<1x64x64xbf16, #tpu.memory_space<vmem>>, %arg17: memref<1x1x64xf32, #tpu.memory_space<vmem>>, %arg18: memref<1x64x2048xbf16, #tpu.memory_space<vmem>>, %arg19: memref<1x1x2048xf32, #tpu.memory_space<vmem>>, %arg20: memref<1x2048x64xbf16, #tpu.memory_space<vmem>>, %arg21: memref<1x1x64xf32, #tpu.memory_space<vmem>>, %arg22: memref<1x1x64xf32, #tpu.memory_space<vmem>>, %arg23: memref<1x1x64xf32, #tpu.memory_space<vmem>>, %arg24: memref<1x1x64xf32, #tpu.memory_space<vmem>>, %arg25: memref<1x1x64xf32, #tpu.memory_space<vmem>>, %arg26: memref<1x64xf32, #tpu.memory_space<vmem>>, %arg27: memref<64x64xf32, #tpu.memory_space<vmem>>, %arg28: memref<1x64xf32, #tpu.memory_space<vmem>>, %arg29: memref<64x64xf32, #tpu.memory_space<vmem>>, %arg30: memref<1x64xf32, #tpu.memory_space<vmem>>, %arg31: memref<64x64xf32, #tpu.memory_space<vmem>>, %arg32: memref<1x64xf32, #tpu.memory_space<vmem>>, %arg33: memref<64x64xf32, #tpu.memory_space<vmem>>, %arg34: memref<1x64xf32, #tpu.memory_space<vmem>>, %arg35: memref<32x32xf32, #tpu.memory_space<vmem>>, %arg36: memref<1x32xf32, #tpu.memory_space<vmem>>, %arg37: memref<1x32xf32, #tpu.memory_space<vmem>>, %arg38: memref<1x32xf32, #tpu.memory_space<vmem>>, %arg39: memref<32x32xf32, #tpu.memory_space<vmem>>, %arg40: memref<1x32xf32, #tpu.memory_space<vmem>>, %arg41: memref<32x32xf32, #tpu.memory_space<vmem>>, %arg42: memref<1x32xf32, #tpu.memory_space<vmem>>, %arg43: memref<1x32xf32, #tpu.memory_space<vmem>>, %arg44: memref<1x32xf32, #tpu.memory_space<vmem>>, %arg45: memref<32x32xf32, #tpu.memory_space<vmem>>, %arg46: memref<1x32xf32, #tpu.memory_space<vmem>>, %arg47: memref<64x32xf32, #tpu.memory_space<vmem>>, %arg48: memref<32x32xf32, #tpu.memory_space<vmem>>, %arg49: memref<1x32xf32, #tpu.memory_space<vmem>>, %arg50: memref<1x32xf32, #tpu.memory_space<vmem>>, %arg51: memref<1x32xf32, #tpu.memory_space<vmem>>, %arg52: memref<32x32xf32, #tpu.memory_space<vmem>>, %arg53: memref<1x32xf32, #tpu.memory_space<vmem>>, %arg54: memref<32x32xf32, #tpu.memory_space<vmem>>, %arg55: memref<1x32xf32, #tpu.memory_space<vmem>>, %arg56: memref<1x32xf32, #tpu.memory_space<vmem>>, %arg57: memref<1x32xf32, #tpu.memory_space<vmem>>, %arg58: memref<1x32xf32, #tpu.memory_space<vmem>>, %arg59: memref<1x1xf32, #tpu.memory_space<vmem>>, %arg60: memref<1x16xf32, #tpu.memory_space<vmem>>, %arg61: memref<16x64xf32, #tpu.memory_space<vmem>>) attributes {dimension_semantics = [#tpu.dimension_semantics<arbitrary>], iteration_bounds = array<i64: 6>, scalar_prefetch = 0 : i64, scratch_operands = 1 : i64, tpu.core_type = #tpu.core_type<tc>, window_params = [{pipeline_mode = #tpu.pipeline_mode<synchronous>, transform_indices = @transform_0, window_bounds = array<i64: 16, 1>}, {pipeline_mode = #tpu.pipeline_mode<synchronous>, transform_indices = @transform_1, window_bounds = array<i64: 16, 1>}, {pipeline_mode = #tpu.pipeline_mode<synchronous>, transform_indices = @transform_2, window_bounds = array<i64: 16, 1>}, {pipeline_mode = #tpu.pipeline_mode<synchronous>, transform_indices = @transform_3, window_bounds = array<i64: 16, 16>}, {pipeline_mode = #tpu.pipeline_mode<synchronous>, transform_indices = @transform_4, window_bounds = array<i64: 2, 16>}, {pipeline_mode = #tpu.pipeline_mode<synchronous>, transform_indices = @transform_5, window_bounds = array<i64: 1, 32>}, {pipeline_mode = #tpu.pipeline_mode<synchronous>, transform_indices = @transform_6, window_bounds = array<i64: 1, 32>}, {pipeline_mode = #tpu.pipeline_mode<synchronous>, transform_indices = @transform_7, window_bounds = array<i64: 1, 32>}, {pipeline_mode = #tpu.pipeline_mode<synchronous>, transform_indices = @transform_8, window_bounds = array<i64: 1, 32>}, {transform_indices = @transform_9, window_bounds = array<i64: 1, 64, 64>}, {transform_indices = @transform_10, window_bounds = array<i64: 1, 1, 64>}, {transform_indices = @transform_11, window_bounds = array<i64: 1, 64, 64>}, {transform_indices = @transform_12, window_bounds = array<i64: 1, 1, 64>}, {transform_indices = @transform_13, window_bounds = array<i64: 1, 64, 64>}, {transform_indices = @transform_14, window_bounds = array<i64: 1, 1, 64>}, {transform_indices = @transform_15, window_bounds = array<i64: 1, 64, 64>}, {transform_indices = @transform_16, window_bounds = array<i64: 1, 1, 64>}, {transform_indices = @transform_17, window_bounds = array<i64: 1, 64, 2048>}, {transform_indices = @transform_18, window_bounds = array<i64: 1, 1, 2048>}, {transform_indices = @transform_19, window_bounds = array<i64: 1, 2048, 64>}, {transform_indices = @transform_20, window_bounds = array<i64: 1, 1, 64>}, {transform_indices = @transform_21, window_bounds = array<i64: 1, 1, 64>}, {transform_indices = @transform_22, window_bounds = array<i64: 1, 1, 64>}, {transform_indices = @transform_23, window_bounds = array<i64: 1, 1, 64>}, {transform_indices = @transform_24, window_bounds = array<i64: 1, 1, 64>}, {pipeline_mode = #tpu.pipeline_mode<synchronous>, transform_indices = @transform_25, window_bounds = array<i64: 1, 64>}, {pipeline_mode = #tpu.pipeline_mode<synchronous>, transform_indices = @transform_26, window_bounds = array<i64: 64, 64>}, {pipeline_mode = #tpu.pipeline_mode<synchronous>, transform_indices = @transform_27, window_bounds = array<i64: 1, 64>}, {pipeline_mode = #tpu.pipeline_mode<synchronous>, transform_indices = @transform_28, window_bounds = array<i64: 64, 64>}, {pipeline_mode = #tpu.pipeline_mode<synchronous>, transform_indices = @transform_29, window_bounds = array<i64: 1, 64>}, {pipeline_mode = #tpu.pipeline_mode<synchronous>, transform_indices = @transform_30, window_bounds = array<i64: 64, 64>}, {pipeline_mode = #tpu.pipeline_mode<synchronous>, transform_indices = @transform_31, window_bounds = array<i64: 1, 64>}, {pipeline_mode = #tpu.pipeline_mode<synchronous>, transform_indices = @transform_32, window_bounds = array<i64: 64, 64>}, {pipeline_mode = #tpu.pipeline_mode<synchronous>, transform_indices = @transform_33, window_bounds = array<i64: 1, 64>}, {pipeline_mode = #tpu.pipeline_mode<synchronous>, transform_indices = @transform_34, window_bounds = array<i64: 32, 32>}, {pipeline_mode = #tpu.pipeline_mode<synchronous>, transform_indices = @transform_35, window_bounds = array<i64: 1, 32>}, {pipeline_mode = #tpu.pipeline_mode<synchronous>, transform_indices = @transform_36, window_bounds = array<i64: 1, 32>}, {pipeline_mode = #tpu.pipeline_mode<synchronous>, transform_indices = @transform_37, window_bounds = array<i64: 1, 32>}, {pipeline_mode = #tpu.pipeline_mode<synchronous>, transform_indices = @transform_38, window_bounds = array<i64: 32, 32>}, {pipeline_mode = #tpu.pipeline_mode<synchronous>, transform_indices = @transform_39, window_bounds = array<i64: 1, 32>}, {pipeline_mode = #tpu.pipeline_mode<synchronous>, transform_indices = @transform_40, window_bounds = array<i64: 32, 32>}, {pipeline_mode = #tpu.pipeline_mode<synchronous>, transform_indices = @transform_41, window_bounds = array<i64: 1, 32>}, {pipeline_mode = #tpu.pipeline_mode<synchronous>, transform_indices = @transform_42, window_bounds = array<i64: 1, 32>}, {pipeline_mode = #tpu.pipeline_mode<synchronous>, transform_indices = @transform_43, window_bounds = array<i64: 1, 32>}, {pipeline_mode = #tpu.pipeline_mode<synchronous>, transform_indices = @transform_44, window_bounds = array<i64: 32, 32>}, {pipeline_mode = #tpu.pipeline_mode<synchronous>, transform_indices = @transform_45, window_bounds = array<i64: 1, 32>}, {pipeline_mode = #tpu.pipeline_mode<synchronous>, transform_indices = @transform_46, window_bounds = array<i64: 64, 32>}, {pipeline_mode = #tpu.pipeline_mode<synchronous>, transform_indices = @transform_47, window_bounds = array<i64: 32, 32>}, {pipeline_mode = #tpu.pipeline_mode<synchronous>, transform_indices = @transform_48, window_bounds = array<i64: 1, 32>}, {pipeline_mode = #tpu.pipeline_mode<synchronous>, transform_indices = @transform_49, window_bounds = array<i64: 1, 32>}, {pipeline_mode = #tpu.pipeline_mode<synchronous>, transform_indices = @transform_50, window_bounds = array<i64: 1, 32>}, {pipeline_mode = #tpu.pipeline_mode<synchronous>, transform_indices = @transform_51, window_bounds = array<i64: 32, 32>}, {pipeline_mode = #tpu.pipeline_mode<synchronous>, transform_indices = @transform_52, window_bounds = array<i64: 1, 32>}, {pipeline_mode = #tpu.pipeline_mode<synchronous>, transform_indices = @transform_53, window_bounds = array<i64: 32, 32>}, {pipeline_mode = #tpu.pipeline_mode<synchronous>, transform_indices = @transform_54, window_bounds = array<i64: 1, 32>}, {pipeline_mode = #tpu.pipeline_mode<synchronous>, transform_indices = @transform_55, window_bounds = array<i64: 1, 32>}, {pipeline_mode = #tpu.pipeline_mode<synchronous>, transform_indices = @transform_56, window_bounds = array<i64: 1, 32>}, {pipeline_mode = #tpu.pipeline_mode<synchronous>, transform_indices = @transform_57, window_bounds = array<i64: 1, 32>}, {pipeline_mode = #tpu.pipeline_mode<synchronous>, transform_indices = @transform_58, window_bounds = array<i64: 1, 1>}, {pipeline_mode = #tpu.pipeline_mode<synchronous>, transform_indices = @transform_59, window_bounds = array<i64: 1, 16>}]} {
    %c0_i32 = arith.constant 0 : i32
    %0 = arith.cmpi eq, %arg0, %c0_i32 : i32
    %1 = arith.extui %0 : i1 to i32
    %c0_i32_0 = arith.constant 0 : i32
    %2 = arith.cmpi ne, %1, %c0_i32_0 : i32
    scf.if %2 {
      %c0_75 = arith.constant 0 : index
      %c0_76 = arith.constant 0 : index
      %122 = vector.load %arg1[%c0_75, %c0_76] : memref<16x1xf32, #tpu.memory_space<vmem>>, vector<16x1xf32>
      %c0_77 = arith.constant 0 : index
      %c0_78 = arith.constant 0 : index
      %123 = vector.load %arg6[%c0_77, %c0_78] : memref<1x32xf32, #tpu.memory_space<vmem>>, vector<1x32xf32>
      %124 = vector.broadcast %122 : vector<16x1xf32> to vector<16x32xf32>
      %125 = vector.broadcast %123 : vector<1x32xf32> to vector<16x32xf32>
      %126 = arith.mulf %124, %125 : vector<16x32xf32>
      %c0_79 = arith.constant 0 : index
      %c0_80 = arith.constant 0 : index
      %127 = vector.load %arg7[%c0_79, %c0_80] : memref<1x32xf32, #tpu.memory_space<vmem>>, vector<1x32xf32>
      %128 = vector.broadcast %127 : vector<1x32xf32> to vector<16x32xf32>
      %129 = arith.addf %126, %128 : vector<16x32xf32>
      %c0_81 = arith.constant 0 : index
      %c0_82 = arith.constant 0 : index
      %130 = vector.load %arg61[%c0_81, %c0_82] : memref<16x64xf32, #tpu.memory_space<vmem>>, vector<16x32xf32>
      tpu.vector_store %arg61[%c0_81, %c0_82], %129 {strides = array<i32>} : memref<16x64xf32, #tpu.memory_space<vmem>>, vector<16x32xf32>,
      %c0_83 = arith.constant 0 : index
      %c0_84 = arith.constant 0 : index
      %131 = vector.load %arg2[%c0_83, %c0_84] : memref<16x1xf32, #tpu.memory_space<vmem>>, vector<16x1xf32>
      %c0_85 = arith.constant 0 : index
      %c0_86 = arith.constant 0 : index
      %132 = vector.load %arg8[%c0_85, %c0_86] : memref<1x32xf32, #tpu.memory_space<vmem>>, vector<1x32xf32>
      %133 = vector.broadcast %131 : vector<16x1xf32> to vector<16x32xf32>
      %134 = vector.broadcast %132 : vector<1x32xf32> to vector<16x32xf32>
      %135 = arith.mulf %133, %134 : vector<16x32xf32>
      %c0_87 = arith.constant 0 : index
      %c0_88 = arith.constant 0 : index
      %136 = vector.load %arg9[%c0_87, %c0_88] : memref<1x32xf32, #tpu.memory_space<vmem>>, vector<1x32xf32>
      %137 = vector.broadcast %136 : vector<1x32xf32> to vector<16x32xf32>
      %138 = arith.addf %135, %137 : vector<16x32xf32>
      %c0_89 = arith.constant 0 : index
      %c32 = arith.constant 32 : index
      %139 = vector.load %arg61[%c0_89, %c32] : memref<16x64xf32, #tpu.memory_space<vmem>>, vector<16x32xf32>
      tpu.vector_store %arg61[%c0_89, %c32], %138 {strides = array<i32>} : memref<16x64xf32, #tpu.memory_space<vmem>>, vector<16x32xf32>,
    } else {
    }
    %c0 = arith.constant 0 : index
    %c0_1 = arith.constant 0 : index
    %3 = vector.load %arg61[%c0, %c0_1] : memref<16x64xf32, #tpu.memory_space<vmem>>, vector<16x64xf32>
    %c0_2 = arith.constant 0 : index
    %c0_3 = arith.constant 0 : index
    %c0_4 = arith.constant 0 : index
    %4 = vector.load %arg10[%c0_2, %c0_3, %c0_4] : memref<1x64x64xbf16, #tpu.memory_space<vmem>>, vector<1x64x64xbf16>
    %5 = vector.shape_cast %4 : vector<1x64x64xbf16> to vector<64x64xbf16>
    %6 = arith.extf %5 : vector<64x64xbf16> to vector<64x64xf32>
    %cst = arith.constant dense<0.000000e+00> : vector<16x64xf32>
    %7 = tpu.matmul %3, %6, %cst {dimension_numbers = #tpu.dot_dimension_numbers<[1], [0], [0], [1], [0, 0, 1, 1], [], []>} : vector<16x64xf32>, vector<64x64xf32>, vector<16x64xf32> -> vector<16x64xf32>
    %c0_5 = arith.constant 0 : index
    %c0_6 = arith.constant 0 : index
    %c0_7 = arith.constant 0 : index
    %8 = vector.load %arg11[%c0_5, %c0_6, %c0_7] : memref<1x1x64xf32, #tpu.memory_space<vmem>>, vector<1x1x64xf32>
    %9 = vector.shape_cast %8 : vector<1x1x64xf32> to vector<1x64xf32>
    %10 = vector.broadcast %9 : vector<1x64xf32> to vector<16x64xf32>
    %11 = arith.addf %7, %10 : vector<16x64xf32>
    %c0_8 = arith.constant 0 : index
    %c0_9 = arith.constant 0 : index
    %c0_10 = arith.constant 0 : index
    %12 = vector.load %arg12[%c0_8, %c0_9, %c0_10] : memref<1x64x64xbf16, #tpu.memory_space<vmem>>, vector<1x64x64xbf16>
    %13 = vector.shape_cast %12 : vector<1x64x64xbf16> to vector<64x64xbf16>
    %14 = arith.extf %13 : vector<64x64xbf16> to vector<64x64xf32>
    %cst_11 = arith.constant dense<0.000000e+00> : vector<16x64xf32>
    %15 = tpu.matmul %3, %14, %cst_11 {dimension_numbers = #tpu.dot_dimension_numbers<[1], [0], [0], [1], [0, 0, 1, 1], [], []>} : vector<16x64xf32>, vector<64x64xf32>, vector<16x64xf32> -> vector<16x64xf32>
    %c0_12 = arith.constant 0 : index
    %c0_13 = arith.constant 0 : index
    %c0_14 = arith.constant 0 : index
    %16 = vector.load %arg13[%c0_12, %c0_13, %c0_14] : memref<1x1x64xf32, #tpu.memory_space<vmem>>, vector<1x1x64xf32>
    %17 = vector.shape_cast %16 : vector<1x1x64xf32> to vector<1x64xf32>
    %18 = vector.broadcast %17 : vector<1x64xf32> to vector<16x64xf32>
    %19 = arith.addf %15, %18 : vector<16x64xf32>
    %c0_15 = arith.constant 0 : index
    %c0_16 = arith.constant 0 : index
    %c0_17 = arith.constant 0 : index
    %20 = vector.load %arg14[%c0_15, %c0_16, %c0_17] : memref<1x64x64xbf16, #tpu.memory_space<vmem>>, vector<1x64x64xbf16>
    %21 = vector.shape_cast %20 : vector<1x64x64xbf16> to vector<64x64xbf16>
    %22 = arith.extf %21 : vector<64x64xbf16> to vector<64x64xf32>
    %cst_18 = arith.constant dense<0.000000e+00> : vector<16x64xf32>
    %23 = tpu.matmul %3, %22, %cst_18 {dimension_numbers = #tpu.dot_dimension_numbers<[1], [0], [0], [1], [0, 0, 1, 1], [], []>} : vector<16x64xf32>, vector<64x64xf32>, vector<16x64xf32> -> vector<16x64xf32>
    %c0_19 = arith.constant 0 : index
    %c0_20 = arith.constant 0 : index
    %c0_21 = arith.constant 0 : index
    %24 = vector.load %arg15[%c0_19, %c0_20, %c0_21] : memref<1x1x64xf32, #tpu.memory_space<vmem>>, vector<1x1x64xf32>
    %25 = vector.shape_cast %24 : vector<1x1x64xf32> to vector<1x64xf32>
    %26 = vector.broadcast %25 : vector<1x64xf32> to vector<16x64xf32>
    %27 = arith.addf %23, %26 : vector<16x64xf32>
    %cst_22 = arith.constant dense<0.000000e+00> : vector<16x16xf32>
    %28 = tpu.matmul %11, %19, %cst_22 {dimension_numbers = #tpu.dot_dimension_numbers<[1], [1], [0], [0], [0, 0, 1, 0], [], []>} : vector<16x64xf32>, vector<16x64xf32>, vector<16x16xf32> -> vector<16x16xf32>
    %c0_23 = arith.constant 0 : index
    %c0_24 = arith.constant 0 : index
    %29 = vector.load %arg4[%c0_23, %c0_24] : memref<16x16xf32, #tpu.memory_space<vmem>>, vector<16x16xf32>
    %30 = arith.addf %28, %29 : vector<16x16xf32>
    %cst_25 = arith.constant dense<0xFF800000> : vector<16xf32>
    %31 = vector.multi_reduction <maximumf>, %30, %cst_25 [1] : vector<16x16xf32> to vector<16xf32>
    %32 = vector.shape_cast %31 : vector<16xf32> to vector<16x1xf32>
    %33 = vector.broadcast %32 : vector<16x1xf32> to vector<16x16xf32>
    %34 = arith.subf %30, %33 : vector<16x16xf32>
    %35 = math.exp %34 : vector<16x16xf32>
    %cst_26 = arith.constant dense<0.000000e+00> : vector<16xf32>
    %36 = vector.multi_reduction <add>, %35, %cst_26 [1] : vector<16x16xf32> to vector<16xf32>
    %37 = vector.shape_cast %36 : vector<16xf32> to vector<16x1xf32>
    %38 = tpu.reciprocal %37 {approx = true} : vector<16x1xf32> -> vector<16x1xf32>
    %39 = vector.broadcast %38 : vector<16x1xf32> to vector<16x16xf32>
    %40 = arith.mulf %35, %39 : vector<16x16xf32>
    %cst_27 = arith.constant dense<0.000000e+00> : vector<16x64xf32>
    %41 = tpu.matmul %40, %27, %cst_27 {dimension_numbers = #tpu.dot_dimension_numbers<[1], [0], [0], [1], [0, 0, 1, 1], [], []>} : vector<16x16xf32>, vector<16x64xf32>, vector<16x64xf32> -> vector<16x64xf32>
    %c0_28 = arith.constant 0 : index
    %c0_29 = arith.constant 0 : index
    %c0_30 = arith.constant 0 : index
    %42 = vector.load %arg16[%c0_28, %c0_29, %c0_30] : memref<1x64x64xbf16, #tpu.memory_space<vmem>>, vector<1x64x64xbf16>
    %43 = vector.shape_cast %42 : vector<1x64x64xbf16> to vector<64x64xbf16>
    %44 = arith.extf %43 : vector<64x64xbf16> to vector<64x64xf32>
    %cst_31 = arith.constant dense<0.000000e+00> : vector<16x64xf32>
    %45 = tpu.matmul %41, %44, %cst_31 {dimension_numbers = #tpu.dot_dimension_numbers<[1], [0], [0], [1], [0, 0, 1, 1], [], []>} : vector<16x64xf32>, vector<64x64xf32>, vector<16x64xf32> -> vector<16x64xf32>
    %c0_32 = arith.constant 0 : index
    %c0_33 = arith.constant 0 : index
    %c0_34 = arith.constant 0 : index
    %46 = vector.load %arg17[%c0_32, %c0_33, %c0_34] : memref<1x1x64xf32, #tpu.memory_space<vmem>>, vector<1x1x64xf32>
    %47 = vector.shape_cast %46 : vector<1x1x64xf32> to vector<1x64xf32>
    %48 = vector.broadcast %47 : vector<1x64xf32> to vector<16x64xf32>
    %49 = arith.addf %45, %48 : vector<16x64xf32>
    %50 = arith.addf %3, %49 : vector<16x64xf32>
    %c0_35 = arith.constant 0 : index
    %c0_36 = arith.constant 0 : index
    %c0_37 = arith.constant 0 : index
    %51 = vector.load %arg22[%c0_35, %c0_36, %c0_37] : memref<1x1x64xf32, #tpu.memory_space<vmem>>, vector<1x1x64xf32>
    %52 = vector.shape_cast %51 : vector<1x1x64xf32> to vector<1x64xf32>
    %c0_38 = arith.constant 0 : index
    %c0_39 = arith.constant 0 : index
    %c0_40 = arith.constant 0 : index
    %53 = vector.load %arg23[%c0_38, %c0_39, %c0_40] : memref<1x1x64xf32, #tpu.memory_space<vmem>>, vector<1x1x64xf32>
    %54 = vector.shape_cast %53 : vector<1x1x64xf32> to vector<1x64xf32>
    %cst_41 = arith.constant dense<0.000000e+00> : vector<16xf32>
    %55 = vector.multi_reduction <add>, %50, %cst_41 [1] : vector<16x64xf32> to vector<16xf32>
    %56 = vector.shape_cast %55 : vector<16xf32> to vector<16x1xf32>
    %cst_42 = arith.constant 6.400000e+01 : f32
    %57 = vector.broadcast %cst_42 : f32 to vector<16x1xf32>
    %58 = arith.divf %56, %57 : vector<16x1xf32>
    %59 = vector.broadcast %58 : vector<16x1xf32> to vector<16x64xf32>
    %60 = arith.subf %50, %59 : vector<16x64xf32>
    %61 = arith.mulf %60, %60 : vector<16x64xf32>
    %cst_43 = arith.constant dense<0.000000e+00> : vector<16xf32>
    %62 = vector.multi_reduction <add>, %61, %cst_43 [1] : vector<16x64xf32> to vector<16xf32>
    %63 = vector.shape_cast %62 : vector<16xf32> to vector<16x1xf32>
    %cst_44 = arith.constant 6.400000e+01 : f32
    %64 = vector.broadcast %cst_44 : f32 to vector<16x1xf32>
    %65 = arith.divf %63, %64 : vector<16x1xf32>
    %cst_45 = arith.constant 9.99999974E-6 : f32
    %66 = vector.broadcast %cst_45 : f32 to vector<16x1xf32>
    %67 = arith.addf %65, %66 : vector<16x1xf32>
    %68 = math.rsqrt %67 : vector<16x1xf32>
    %69 = vector.broadcast %68 : vector<16x1xf32> to vector<16x64xf32>
    %70 = arith.mulf %60, %69 : vector<16x64xf32>
    %71 = vector.broadcast %52 : vector<1x64xf32> to vector<16x64xf32>
    %72 = arith.mulf %70, %71 : vector<16x64xf32>
    %73 = vector.broadcast %54 : vector<1x64xf32> to vector<16x64xf32>
    %74 = arith.addf %72, %73 : vector<16x64xf32>
    %c0_46 = arith.constant 0 : index
    %c0_47 = arith.constant 0 : index
    %c0_48 = arith.constant 0 : index
    %75 = vector.load %arg18[%c0_46, %c0_47, %c0_48] : memref<1x64x2048xbf16, #tpu.memory_space<vmem>>, vector<1x64x2048xbf16>
    %76 = vector.shape_cast %75 : vector<1x64x2048xbf16> to vector<64x2048xbf16>
    %77 = arith.extf %76 : vector<64x2048xbf16> to vector<64x2048xf32>
    %cst_49 = arith.constant dense<0.000000e+00> : vector<16x2048xf32>
    %78 = tpu.matmul %74, %77, %cst_49 {dimension_numbers = #tpu.dot_dimension_numbers<[1], [0], [0], [1], [0, 0, 1, 1], [], []>} : vector<16x64xf32>, vector<64x2048xf32>, vector<16x2048xf32> -> vector<16x2048xf32>
    %c0_50 = arith.constant 0 : index
    %c0_51 = arith.constant 0 : index
    %c0_52 = arith.constant 0 : index
    %79 = vector.load %arg19[%c0_50, %c0_51, %c0_52] : memref<1x1x2048xf32, #tpu.memory_space<vmem>>, vector<1x1x2048xf32>
    %80 = vector.shape_cast %79 : vector<1x1x2048xf32> to vector<1x2048xf32>
    %81 = vector.broadcast %80 : vector<1x2048xf32> to vector<16x2048xf32>
    %82 = arith.addf %78, %81 : vector<16x2048xf32>
    %cst_53 = arith.constant 0.000000e+00 : f32
    %83 = vector.broadcast %cst_53 : f32 to vector<16x2048xf32>
    %84 = arith.maximumf %82, %83 : vector<16x2048xf32>
    %c0_54 = arith.constant 0 : index
    %c0_55 = arith.constant 0 : index
    %c0_56 = arith.constant 0 : index
    %85 = vector.load %arg20[%c0_54, %c0_55, %c0_56] : memref<1x2048x64xbf16, #tpu.memory_space<vmem>>, vector<1x2048x64xbf16>
    %86 = vector.shape_cast %85 : vector<1x2048x64xbf16> to vector<2048x64xbf16>
    %87 = arith.extf %86 : vector<2048x64xbf16> to vector<2048x64xf32>
    %cst_57 = arith.constant dense<0.000000e+00> : vector<16x64xf32>
    %88 = tpu.matmul %84, %87, %cst_57 {dimension_numbers = #tpu.dot_dimension_numbers<[1], [0], [0], [1], [0, 0, 1, 1], [], []>} : vector<16x2048xf32>, vector<2048x64xf32>, vector<16x64xf32> -> vector<16x64xf32>
    %c0_58 = arith.constant 0 : index
    %c0_59 = arith.constant 0 : index
    %c0_60 = arith.constant 0 : index
    %89 = vector.load %arg21[%c0_58, %c0_59, %c0_60] : memref<1x1x64xf32, #tpu.memory_space<vmem>>, vector<1x1x64xf32>
    %90 = vector.shape_cast %89 : vector<1x1x64xf32> to vector<1x64xf32>
    %91 = vector.broadcast %90 : vector<1x64xf32> to vector<16x64xf32>
    %92 = arith.addf %88, %91 : vector<16x64xf32>
    %93 = arith.addf %74, %92 : vector<16x64xf32>
    %c0_61 = arith.constant 0 : index
    %c0_62 = arith.constant 0 : index
    %c0_63 = arith.constant 0 : index
    %94 = vector.load %arg24[%c0_61, %c0_62, %c0_63] : memref<1x1x64xf32, #tpu.memory_space<vmem>>, vector<1x1x64xf32>
    %95 = vector.shape_cast %94 : vector<1x1x64xf32> to vector<1x64xf32>
    %c0_64 = arith.constant 0 : index
    %c0_65 = arith.constant 0 : index
    %c0_66 = arith.constant 0 : index
    %96 = vector.load %arg25[%c0_64, %c0_65, %c0_66] : memref<1x1x64xf32, #tpu.memory_space<vmem>>, vector<1x1x64xf32>
    %97 = vector.shape_cast %96 : vector<1x1x64xf32> to vector<1x64xf32>
    %cst_67 = arith.constant dense<0.000000e+00> : vector<16xf32>
    %98 = vector.multi_reduction <add>, %93, %cst_67 [1] : vector<16x64xf32> to vector<16xf32>
    %99 = vector.shape_cast %98 : vector<16xf32> to vector<16x1xf32>
    %cst_68 = arith.constant 6.400000e+01 : f32
    %100 = vector.broadcast %cst_68 : f32 to vector<16x1xf32>
    %101 = arith.divf %99, %100 : vector<16x1xf32>
    %102 = vector.broadcast %101 : vector<16x1xf32> to vector<16x64xf32>
    %103 = arith.subf %93, %102 : vector<16x64xf32>
    %104 = arith.mulf %103, %103 : vector<16x64xf32>
    %cst_69 = arith.constant dense<0.000000e+00> : vector<16xf32>
    %105 = vector.multi_reduction <add>, %104, %cst_69 [1] : vector<16x64xf32> to vector<16xf32>
    %106 = vector.shape_cast %105 : vector<16xf32> to vector<16x1xf32>
    %cst_70 = arith.constant 6.400000e+01 : f32
    %107 = vector.broadcast %cst_70 : f32 to vector<16x1xf32>
    %108 = arith.divf %106, %107 : vector<16x1xf32>
    %cst_71 = arith.constant 9.99999974E-6 : f32
    %109 = vector.broadcast %cst_71 : f32 to vector<16x1xf32>
    %110 = arith.addf %108, %109 : vector<16x1xf32>
    %111 = math.rsqrt %110 : vector<16x1xf32>
    %112 = vector.broadcast %111 : vector<16x1xf32> to vector<16x64xf32>
    %113 = arith.mulf %103, %112 : vector<16x64xf32>
    %114 = vector.broadcast %95 : vector<1x64xf32> to vector<16x64xf32>
    %115 = arith.mulf %113, %114 : vector<16x64xf32>
    %116 = vector.broadcast %97 : vector<1x64xf32> to vector<16x64xf32>
    %117 = arith.addf %115, %116 : vector<16x64xf32>
    %c0_72 = arith.constant 0 : index
    %c0_73 = arith.constant 0 : index
    %118 = vector.load %arg61[%c0_72, %c0_73] : memref<16x64xf32, #tpu.memory_space<vmem>>, vector<16x64xf32>
    tpu.vector_store %arg61[%c0_72, %c0_73], %117 {strides = array<i32>} : memref<16x64xf32, #tpu.memory_space<vmem>>, vector<16x64xf32>,
    %c5_i32 = arith.constant 5 : i32
    %119 = arith.cmpi eq, %arg0, %c5_i32 : i32
    %120 = arith.extui %119 : i1 to i32
    %c0_i32_74 = arith.constant 0 : i32
    %121 = arith.cmpi ne, %120, %c0_i32_74 : i32
    scf.if %121 {
      %c0_75 = arith.constant 0 : index
      %c0_76 = arith.constant 0 : index
      %122 = vector.load %arg26[%c0_75, %c0_76] : memref<1x64xf32, #tpu.memory_space<vmem>>, vector<1x64xf32>
      %c0_77 = arith.constant 0 : index
      %c0_78 = arith.constant 0 : index
      %123 = vector.load %arg27[%c0_77, %c0_78] : memref<64x64xf32, #tpu.memory_space<vmem>>, vector<64x64xf32>
      %cst_79 = arith.constant dense<0.000000e+00> : vector<1x64xf32>
      %124 = tpu.matmul %122, %123, %cst_79 {dimension_numbers = #tpu.dot_dimension_numbers<[1], [0], [0], [1], [0, 0, 1, 1], [], []>} : vector<1x64xf32>, vector<64x64xf32>, vector<1x64xf32> -> vector<1x64xf32>
      %c0_80 = arith.constant 0 : index
      %c0_81 = arith.constant 0 : index
      %125 = vector.load %arg28[%c0_80, %c0_81] : memref<1x64xf32, #tpu.memory_space<vmem>>, vector<1x64xf32>
      %126 = arith.addf %124, %125 : vector<1x64xf32>
      %c0_82 = arith.constant 0 : index
      %c0_83 = arith.constant 0 : index
      %127 = vector.load %arg29[%c0_82, %c0_83] : memref<64x64xf32, #tpu.memory_space<vmem>>, vector<64x64xf32>
      %cst_84 = arith.constant dense<0.000000e+00> : vector<16x64xf32>
      %128 = tpu.matmul %117, %127, %cst_84 {dimension_numbers = #tpu.dot_dimension_numbers<[1], [0], [0], [1], [0, 0, 1, 1], [], []>} : vector<16x64xf32>, vector<64x64xf32>, vector<16x64xf32> -> vector<16x64xf32>
      %c0_85 = arith.constant 0 : index
      %c0_86 = arith.constant 0 : index
      %129 = vector.load %arg30[%c0_85, %c0_86] : memref<1x64xf32, #tpu.memory_space<vmem>>, vector<1x64xf32>
      %130 = vector.broadcast %129 : vector<1x64xf32> to vector<16x64xf32>
      %131 = arith.addf %128, %130 : vector<16x64xf32>
      %c0_87 = arith.constant 0 : index
      %c0_88 = arith.constant 0 : index
      %132 = vector.load %arg31[%c0_87, %c0_88] : memref<64x64xf32, #tpu.memory_space<vmem>>, vector<64x64xf32>
      %cst_89 = arith.constant dense<0.000000e+00> : vector<16x64xf32>
      %133 = tpu.matmul %117, %132, %cst_89 {dimension_numbers = #tpu.dot_dimension_numbers<[1], [0], [0], [1], [0, 0, 1, 1], [], []>} : vector<16x64xf32>, vector<64x64xf32>, vector<16x64xf32> -> vector<16x64xf32>
      %c0_90 = arith.constant 0 : index
      %c0_91 = arith.constant 0 : index
      %134 = vector.load %arg32[%c0_90, %c0_91] : memref<1x64xf32, #tpu.memory_space<vmem>>, vector<1x64xf32>
      %135 = vector.broadcast %134 : vector<1x64xf32> to vector<16x64xf32>
      %136 = arith.addf %133, %135 : vector<16x64xf32>
      %cst_92 = arith.constant dense<0.000000e+00> : vector<1x16xf32>
      %137 = tpu.matmul %126, %131, %cst_92 {dimension_numbers = #tpu.dot_dimension_numbers<[1], [1], [0], [0], [0, 0, 1, 0], [], []>} : vector<1x64xf32>, vector<16x64xf32>, vector<1x16xf32> -> vector<1x16xf32>
      %c0_93 = arith.constant 0 : index
      %c0_94 = arith.constant 0 : index
      %138 = vector.load %arg5[%c0_93, %c0_94] : memref<2x16xf32, #tpu.memory_space<vmem>>, vector<2x16xf32>
      %139 = vector.broadcast %137 : vector<1x16xf32> to vector<2x16xf32>
      %140 = arith.addf %139, %138 : vector<2x16xf32>
      %cst_95 = arith.constant dense<0xFF800000> : vector<2xf32>
      %141 = vector.multi_reduction <maximumf>, %140, %cst_95 [1] : vector<2x16xf32> to vector<2xf32>
      %142 = vector.shape_cast %141 : vector<2xf32> to vector<2x1xf32>
      %143 = vector.broadcast %142 : vector<2x1xf32> to vector<2x16xf32>
      %144 = arith.subf %140, %143 : vector<2x16xf32>
      %145 = math.exp %144 : vector<2x16xf32>
      %cst_96 = arith.constant dense<0.000000e+00> : vector<2xf32>
      %146 = vector.multi_reduction <add>, %145, %cst_96 [1] : vector<2x16xf32> to vector<2xf32>
      %147 = vector.shape_cast %146 : vector<2xf32> to vector<2x1xf32>
      %148 = tpu.reciprocal %147 {approx = true} : vector<2x1xf32> -> vector<2x1xf32>
      %149 = vector.broadcast %148 : vector<2x1xf32> to vector<2x16xf32>
      %150 = arith.mulf %145, %149 : vector<2x16xf32>
      %cst_97 = arith.constant dense<0.000000e+00> : vector<2x64xf32>
      %151 = tpu.matmul %150, %136, %cst_97 {dimension_numbers = #tpu.dot_dimension_numbers<[1], [0], [0], [1], [0, 0, 1, 1], [], []>} : vector<2x16xf32>, vector<16x64xf32>, vector<2x64xf32> -> vector<2x64xf32>
      %c0_98 = arith.constant 0 : index
      %c0_99 = arith.constant 0 : index
      %152 = vector.load %arg33[%c0_98, %c0_99] : memref<64x64xf32, #tpu.memory_space<vmem>>, vector<64x64xf32>
      %cst_100 = arith.constant dense<0.000000e+00> : vector<2x64xf32>
      %153 = tpu.matmul %151, %152, %cst_100 {dimension_numbers = #tpu.dot_dimension_numbers<[1], [0], [0], [1], [0, 0, 1, 1], [], []>} : vector<2x64xf32>, vector<64x64xf32>, vector<2x64xf32> -> vector<2x64xf32>
      %c0_101 = arith.constant 0 : index
      %c0_102 = arith.constant 0 : index
      %154 = vector.load %arg34[%c0_101, %c0_102] : memref<1x64xf32, #tpu.memory_space<vmem>>, vector<1x64xf32>
      %155 = vector.broadcast %154 : vector<1x64xf32> to vector<2x64xf32>
      %156 = arith.addf %153, %155 : vector<2x64xf32>
      %c0_103 = arith.constant 0 : index
      %c0_104 = arith.constant 0 : index
      %157 = vector.load %arg3[%c0_103, %c0_104] : memref<16x1xf32, #tpu.memory_space<vmem>>, vector<16x1xf32>
      %c0_105 = arith.constant 0 : index
      %c0_106 = arith.constant 0 : index
      %158 = vector.load %arg8[%c0_105, %c0_106] : memref<1x32xf32, #tpu.memory_space<vmem>>, vector<1x32xf32>
      %159 = vector.broadcast %157 : vector<16x1xf32> to vector<16x32xf32>
      %160 = vector.broadcast %158 : vector<1x32xf32> to vector<16x32xf32>
      %161 = arith.mulf %159, %160 : vector<16x32xf32>
      %c0_107 = arith.constant 0 : index
      %c0_108 = arith.constant 0 : index
      %162 = vector.load %arg9[%c0_107, %c0_108] : memref<1x32xf32, #tpu.memory_space<vmem>>, vector<1x32xf32>
      %163 = vector.broadcast %162 : vector<1x32xf32> to vector<16x32xf32>
      %164 = arith.addf %161, %163 : vector<16x32xf32>
      %c0_109 = arith.constant 0 : index
      %c0_110 = arith.constant 0 : index
      %165 = vector.load %arg35[%c0_109, %c0_110] : memref<32x32xf32, #tpu.memory_space<vmem>>, vector<32x32xf32>
      %cst_111 = arith.constant dense<0.000000e+00> : vector<16x32xf32>
      %166 = tpu.matmul %164, %165, %cst_111 {dimension_numbers = #tpu.dot_dimension_numbers<[1], [0], [0], [1], [0, 0, 1, 1], [], []>} : vector<16x32xf32>, vector<32x32xf32>, vector<16x32xf32> -> vector<16x32xf32>
      %c0_112 = arith.constant 0 : index
      %c0_113 = arith.constant 0 : index
      %167 = vector.load %arg36[%c0_112, %c0_113] : memref<1x32xf32, #tpu.memory_space<vmem>>, vector<1x32xf32>
      %168 = vector.broadcast %167 : vector<1x32xf32> to vector<16x32xf32>
      %169 = arith.addf %166, %168 : vector<16x32xf32>
      %cst_114 = arith.constant 0.000000e+00 : f32
      %170 = vector.broadcast %cst_114 : f32 to vector<16x32xf32>
      %171 = arith.cmpf oge, %169, %170 : vector<16x32xf32>
      %cst_115 = arith.constant 0.00999999977 : f32
      %172 = vector.broadcast %cst_115 : f32 to vector<16x32xf32>
      %173 = arith.mulf %172, %169 : vector<16x32xf32>
      %174 = arith.select %171, %169, %173 : vector<16x32xi1>, vector<16x32xf32>
      %c0_116 = arith.constant 0 : index
      %c0_117 = arith.constant 0 : index
      %175 = vector.load %arg37[%c0_116, %c0_117] : memref<1x32xf32, #tpu.memory_space<vmem>>, vector<1x32xf32>
      %c0_118 = arith.constant 0 : index
      %c0_119 = arith.constant 0 : index
      %176 = vector.load %arg38[%c0_118, %c0_119] : memref<1x32xf32, #tpu.memory_space<vmem>>, vector<1x32xf32>
      %cst_120 = arith.constant dense<0.000000e+00> : vector<16xf32>
      %177 = vector.multi_reduction <add>, %174, %cst_120 [1] : vector<16x32xf32> to vector<16xf32>
      %178 = vector.shape_cast %177 : vector<16xf32> to vector<16x1xf32>
      %cst_121 = arith.constant 3.200000e+01 : f32
      %179 = vector.broadcast %cst_121 : f32 to vector<16x1xf32>
      %180 = arith.divf %178, %179 : vector<16x1xf32>
      %181 = vector.broadcast %180 : vector<16x1xf32> to vector<16x32xf32>
      %182 = arith.subf %174, %181 : vector<16x32xf32>
      %183 = arith.mulf %182, %182 : vector<16x32xf32>
      %cst_122 = arith.constant dense<0.000000e+00> : vector<16xf32>
      %184 = vector.multi_reduction <add>, %183, %cst_122 [1] : vector<16x32xf32> to vector<16xf32>
      %185 = vector.shape_cast %184 : vector<16xf32> to vector<16x1xf32>
      %cst_123 = arith.constant 3.200000e+01 : f32
      %186 = vector.broadcast %cst_123 : f32 to vector<16x1xf32>
      %187 = arith.divf %185, %186 : vector<16x1xf32>
      %cst_124 = arith.constant 9.99999974E-6 : f32
      %188 = vector.broadcast %cst_124 : f32 to vector<16x1xf32>
      %189 = arith.addf %187, %188 : vector<16x1xf32>
      %190 = math.rsqrt %189 : vector<16x1xf32>
      %191 = vector.broadcast %190 : vector<16x1xf32> to vector<16x32xf32>
      %192 = arith.mulf %182, %191 : vector<16x32xf32>
      %193 = vector.broadcast %175 : vector<1x32xf32> to vector<16x32xf32>
      %194 = arith.mulf %192, %193 : vector<16x32xf32>
      %195 = vector.broadcast %176 : vector<1x32xf32> to vector<16x32xf32>
      %196 = arith.addf %194, %195 : vector<16x32xf32>
      %c0_125 = arith.constant 0 : index
      %c0_126 = arith.constant 0 : index
      %197 = vector.load %arg39[%c0_125, %c0_126] : memref<32x32xf32, #tpu.memory_space<vmem>>, vector<32x32xf32>
      %cst_127 = arith.constant dense<0.000000e+00> : vector<16x32xf32>
      %198 = tpu.matmul %196, %197, %cst_127 {dimension_numbers = #tpu.dot_dimension_numbers<[1], [0], [0], [1], [0, 0, 1, 1], [], []>} : vector<16x32xf32>, vector<32x32xf32>, vector<16x32xf32> -> vector<16x32xf32>
      %c0_128 = arith.constant 0 : index
      %c0_129 = arith.constant 0 : index
      %199 = vector.load %arg40[%c0_128, %c0_129] : memref<1x32xf32, #tpu.memory_space<vmem>>, vector<1x32xf32>
      %200 = vector.broadcast %199 : vector<1x32xf32> to vector<16x32xf32>
      %201 = arith.addf %198, %200 : vector<16x32xf32>
      %cst_130 = arith.constant 0.000000e+00 : f32
      %202 = vector.broadcast %cst_130 : f32 to vector<16x32xf32>
      %203 = arith.cmpf oge, %201, %202 : vector<16x32xf32>
      %cst_131 = arith.constant 0.00999999977 : f32
      %204 = vector.broadcast %cst_131 : f32 to vector<16x32xf32>
      %205 = arith.mulf %204, %201 : vector<16x32xf32>
      %206 = arith.select %203, %201, %205 : vector<16x32xi1>, vector<16x32xf32>
      %c0_132 = arith.constant 0 : index
      %c0_133 = arith.constant 0 : index
      %207 = vector.load %arg41[%c0_132, %c0_133] : memref<32x32xf32, #tpu.memory_space<vmem>>, vector<32x32xf32>
      %cst_134 = arith.constant dense<0.000000e+00> : vector<16x32xf32>
      %208 = tpu.matmul %206, %207, %cst_134 {dimension_numbers = #tpu.dot_dimension_numbers<[1], [0], [0], [1], [0, 0, 1, 1], [], []>} : vector<16x32xf32>, vector<32x32xf32>, vector<16x32xf32> -> vector<16x32xf32>
      %c0_135 = arith.constant 0 : index
      %c0_136 = arith.constant 0 : index
      %209 = vector.load %arg42[%c0_135, %c0_136] : memref<1x32xf32, #tpu.memory_space<vmem>>, vector<1x32xf32>
      %210 = vector.broadcast %209 : vector<1x32xf32> to vector<16x32xf32>
      %211 = arith.addf %208, %210 : vector<16x32xf32>
      %cst_137 = arith.constant 0.000000e+00 : f32
      %212 = vector.broadcast %cst_137 : f32 to vector<16x32xf32>
      %213 = arith.cmpf oge, %211, %212 : vector<16x32xf32>
      %cst_138 = arith.constant 0.00999999977 : f32
      %214 = vector.broadcast %cst_138 : f32 to vector<16x32xf32>
      %215 = arith.mulf %214, %211 : vector<16x32xf32>
      %216 = arith.select %213, %211, %215 : vector<16x32xi1>, vector<16x32xf32>
      %c0_139 = arith.constant 0 : index
      %c0_140 = arith.constant 0 : index
      %217 = vector.load %arg43[%c0_139, %c0_140] : memref<1x32xf32, #tpu.memory_space<vmem>>, vector<1x32xf32>
      %c0_141 = arith.constant 0 : index
      %c0_142 = arith.constant 0 : index
      %218 = vector.load %arg44[%c0_141, %c0_142] : memref<1x32xf32, #tpu.memory_space<vmem>>, vector<1x32xf32>
      %cst_143 = arith.constant dense<0.000000e+00> : vector<16xf32>
      %219 = vector.multi_reduction <add>, %216, %cst_143 [1] : vector<16x32xf32> to vector<16xf32>
      %220 = vector.shape_cast %219 : vector<16xf32> to vector<16x1xf32>
      %cst_144 = arith.constant 3.200000e+01 : f32
      %221 = vector.broadcast %cst_144 : f32 to vector<16x1xf32>
      %222 = arith.divf %220, %221 : vector<16x1xf32>
      %223 = vector.broadcast %222 : vector<16x1xf32> to vector<16x32xf32>
      %224 = arith.subf %216, %223 : vector<16x32xf32>
      %225 = arith.mulf %224, %224 : vector<16x32xf32>
      %cst_145 = arith.constant dense<0.000000e+00> : vector<16xf32>
      %226 = vector.multi_reduction <add>, %225, %cst_145 [1] : vector<16x32xf32> to vector<16xf32>
      %227 = vector.shape_cast %226 : vector<16xf32> to vector<16x1xf32>
      %cst_146 = arith.constant 3.200000e+01 : f32
      %228 = vector.broadcast %cst_146 : f32 to vector<16x1xf32>
      %229 = arith.divf %227, %228 : vector<16x1xf32>
      %cst_147 = arith.constant 9.99999974E-6 : f32
      %230 = vector.broadcast %cst_147 : f32 to vector<16x1xf32>
      %231 = arith.addf %229, %230 : vector<16x1xf32>
      %232 = math.rsqrt %231 : vector<16x1xf32>
      %233 = vector.broadcast %232 : vector<16x1xf32> to vector<16x32xf32>
      %234 = arith.mulf %224, %233 : vector<16x32xf32>
      %235 = vector.broadcast %217 : vector<1x32xf32> to vector<16x32xf32>
      %236 = arith.mulf %234, %235 : vector<16x32xf32>
      %237 = vector.broadcast %218 : vector<1x32xf32> to vector<16x32xf32>
      %238 = arith.addf %236, %237 : vector<16x32xf32>
      %c0_148 = arith.constant 0 : index
      %c0_149 = arith.constant 0 : index
      %239 = vector.load %arg45[%c0_148, %c0_149] : memref<32x32xf32, #tpu.memory_space<vmem>>, vector<32x32xf32>
      %cst_150 = arith.constant dense<0.000000e+00> : vector<16x32xf32>
      %240 = tpu.matmul %238, %239, %cst_150 {dimension_numbers = #tpu.dot_dimension_numbers<[1], [0], [0], [1], [0, 0, 1, 1], [], []>} : vector<16x32xf32>, vector<32x32xf32>, vector<16x32xf32> -> vector<16x32xf32>
      %c0_151 = arith.constant 0 : index
      %c0_152 = arith.constant 0 : index
      %241 = vector.load %arg46[%c0_151, %c0_152] : memref<1x32xf32, #tpu.memory_space<vmem>>, vector<1x32xf32>
      %242 = vector.broadcast %241 : vector<1x32xf32> to vector<16x32xf32>
      %243 = arith.addf %240, %242 : vector<16x32xf32>
      %cst_153 = arith.constant 0.000000e+00 : f32
      %244 = vector.broadcast %cst_153 : f32 to vector<16x32xf32>
      %245 = arith.cmpf oge, %243, %244 : vector<16x32xf32>
      %cst_154 = arith.constant 0.00999999977 : f32
      %246 = vector.broadcast %cst_154 : f32 to vector<16x32xf32>
      %247 = arith.mulf %246, %243 : vector<16x32xf32>
      %248 = arith.select %245, %243, %247 : vector<16x32xi1>, vector<16x32xf32>
      %c0_155 = arith.constant 0 : index
      %c0_156 = arith.constant 0 : index
      %249 = vector.load %arg47[%c0_155, %c0_156] : memref<64x32xf32, #tpu.memory_space<vmem>>, vector<64x32xf32>
      %cst_157 = arith.constant dense<0.000000e+00> : vector<2x32xf32>
      %250 = tpu.matmul %156, %249, %cst_157 {dimension_numbers = #tpu.dot_dimension_numbers<[1], [0], [0], [1], [0, 0, 1, 1], [], []>} : vector<2x64xf32>, vector<64x32xf32>, vector<2x32xf32> -> vector<2x32xf32>
      %c0_158 = arith.constant 0 : index
      %c0_159 = arith.constant 0 : index
      %251 = vector.load %arg49[%c0_158, %c0_159] : memref<1x32xf32, #tpu.memory_space<vmem>>, vector<1x32xf32>
      %252 = vector.broadcast %251 : vector<1x32xf32> to vector<2x32xf32>
      %253 = arith.addf %250, %252 : vector<2x32xf32>
      %254 = vector.shape_cast %253 : vector<2x32xf32> to vector<2x1x32xf32>
      %255 = vector.shape_cast %254 : vector<2x1x32xf32> to vector<2x1x32xf32>
      %256 = vector.broadcast %255 : vector<2x1x32xf32> to vector<2x8x32xf32>
      %257 = vector.shape_cast %256 : vector<2x8x32xf32> to vector<16x32xf32>
      %c0_160 = arith.constant 0 : index
      %c0_161 = arith.constant 0 : index
      %258 = vector.load %arg48[%c0_160, %c0_161] : memref<32x32xf32, #tpu.memory_space<vmem>>, vector<32x32xf32>
      %cst_162 = arith.constant dense<0.000000e+00> : vector<16x32xf32>
      %259 = tpu.matmul %248, %258, %cst_162 {dimension_numbers = #tpu.dot_dimension_numbers<[1], [0], [0], [1], [0, 0, 1, 1], [], []>} : vector<16x32xf32>, vector<32x32xf32>, vector<16x32xf32> -> vector<16x32xf32>
      %260 = arith.addf %257, %259 : vector<16x32xf32>
      %cst_163 = arith.constant 0.000000e+00 : f32
      %261 = vector.broadcast %cst_163 : f32 to vector<16x32xf32>
      %262 = arith.cmpf oge, %260, %261 : vector<16x32xf32>
      %cst_164 = arith.constant 0.00999999977 : f32
      %263 = vector.broadcast %cst_164 : f32 to vector<16x32xf32>
      %264 = arith.mulf %263, %260 : vector<16x32xf32>
      %265 = arith.select %262, %260, %264 : vector<16x32xi1>, vector<16x32xf32>
      %c0_165 = arith.constant 0 : index
      %c0_166 = arith.constant 0 : index
      %266 = vector.load %arg50[%c0_165, %c0_166] : memref<1x32xf32, #tpu.memory_space<vmem>>, vector<1x32xf32>
      %c0_167 = arith.constant 0 : index
      %c0_168 = arith.constant 0 : index
      %267 = vector.load %arg51[%c0_167, %c0_168] : memref<1x32xf32, #tpu.memory_space<vmem>>, vector<1x32xf32>
      %cst_169 = arith.constant dense<0.000000e+00> : vector<16xf32>
      %268 = vector.multi_reduction <add>, %265, %cst_169 [1] : vector<16x32xf32> to vector<16xf32>
      %269 = vector.shape_cast %268 : vector<16xf32> to vector<16x1xf32>
      %cst_170 = arith.constant 3.200000e+01 : f32
      %270 = vector.broadcast %cst_170 : f32 to vector<16x1xf32>
      %271 = arith.divf %269, %270 : vector<16x1xf32>
      %272 = vector.broadcast %271 : vector<16x1xf32> to vector<16x32xf32>
      %273 = arith.subf %265, %272 : vector<16x32xf32>
      %274 = arith.mulf %273, %273 : vector<16x32xf32>
      %cst_171 = arith.constant dense<0.000000e+00> : vector<16xf32>
      %275 = vector.multi_reduction <add>, %274, %cst_171 [1] : vector<16x32xf32> to vector<16xf32>
      %276 = vector.shape_cast %275 : vector<16xf32> to vector<16x1xf32>
      %cst_172 = arith.constant 3.200000e+01 : f32
      %277 = vector.broadcast %cst_172 : f32 to vector<16x1xf32>
      %278 = arith.divf %276, %277 : vector<16x1xf32>
      %cst_173 = arith.constant 9.99999974E-6 : f32
      %279 = vector.broadcast %cst_173 : f32 to vector<16x1xf32>
      %280 = arith.addf %278, %279 : vector<16x1xf32>
      %281 = math.rsqrt %280 : vector<16x1xf32>
      %282 = vector.broadcast %281 : vector<16x1xf32> to vector<16x32xf32>
      %283 = arith.mulf %273, %282 : vector<16x32xf32>
      %284 = vector.broadcast %266 : vector<1x32xf32> to vector<16x32xf32>
      %285 = arith.mulf %283, %284 : vector<16x32xf32>
      %286 = vector.broadcast %267 : vector<1x32xf32> to vector<16x32xf32>
      %287 = arith.addf %285, %286 : vector<16x32xf32>
      %c0_174 = arith.constant 0 : index
      %c0_175 = arith.constant 0 : index
      %288 = vector.load %arg52[%c0_174, %c0_175] : memref<32x32xf32, #tpu.memory_space<vmem>>, vector<32x32xf32>
      %cst_176 = arith.constant dense<0.000000e+00> : vector<16x32xf32>
      %289 = tpu.matmul %287, %288, %cst_176 {dimension_numbers = #tpu.dot_dimension_numbers<[1], [0], [0], [1], [0, 0, 1, 1], [], []>} : vector<16x32xf32>, vector<32x32xf32>, vector<16x32xf32> -> vector<16x32xf32>
      %c0_177 = arith.constant 0 : index
      %c0_178 = arith.constant 0 : index
      %290 = vector.load %arg53[%c0_177, %c0_178] : memref<1x32xf32, #tpu.memory_space<vmem>>, vector<1x32xf32>
      %291 = vector.broadcast %290 : vector<1x32xf32> to vector<16x32xf32>
      %292 = arith.addf %289, %291 : vector<16x32xf32>
      %cst_179 = arith.constant 0.000000e+00 : f32
      %293 = vector.broadcast %cst_179 : f32 to vector<16x32xf32>
      %294 = arith.cmpf oge, %292, %293 : vector<16x32xf32>
      %cst_180 = arith.constant 0.00999999977 : f32
      %295 = vector.broadcast %cst_180 : f32 to vector<16x32xf32>
      %296 = arith.mulf %295, %292 : vector<16x32xf32>
      %297 = arith.select %294, %292, %296 : vector<16x32xi1>, vector<16x32xf32>
      %c0_181 = arith.constant 0 : index
      %c0_182 = arith.constant 0 : index
      %298 = vector.load %arg54[%c0_181, %c0_182] : memref<32x32xf32, #tpu.memory_space<vmem>>, vector<32x32xf32>
      %cst_183 = arith.constant dense<0.000000e+00> : vector<16x32xf32>
      %299 = tpu.matmul %297, %298, %cst_183 {dimension_numbers = #tpu.dot_dimension_numbers<[1], [0], [0], [1], [0, 0, 1, 1], [], []>} : vector<16x32xf32>, vector<32x32xf32>, vector<16x32xf32> -> vector<16x32xf32>
      %c0_184 = arith.constant 0 : index
      %c0_185 = arith.constant 0 : index
      %300 = vector.load %arg55[%c0_184, %c0_185] : memref<1x32xf32, #tpu.memory_space<vmem>>, vector<1x32xf32>
      %301 = vector.broadcast %300 : vector<1x32xf32> to vector<16x32xf32>
      %302 = arith.addf %299, %301 : vector<16x32xf32>
      %cst_186 = arith.constant 0.000000e+00 : f32
      %303 = vector.broadcast %cst_186 : f32 to vector<16x32xf32>
      %304 = arith.cmpf oge, %302, %303 : vector<16x32xf32>
      %cst_187 = arith.constant 0.00999999977 : f32
      %305 = vector.broadcast %cst_187 : f32 to vector<16x32xf32>
      %306 = arith.mulf %305, %302 : vector<16x32xf32>
      %307 = arith.select %304, %302, %306 : vector<16x32xi1>, vector<16x32xf32>
      %c0_188 = arith.constant 0 : index
      %c0_189 = arith.constant 0 : index
      %308 = vector.load %arg56[%c0_188, %c0_189] : memref<1x32xf32, #tpu.memory_space<vmem>>, vector<1x32xf32>
      %c0_190 = arith.constant 0 : index
      %c0_191 = arith.constant 0 : index
      %309 = vector.load %arg57[%c0_190, %c0_191] : memref<1x32xf32, #tpu.memory_space<vmem>>, vector<1x32xf32>
      %cst_192 = arith.constant dense<0.000000e+00> : vector<16xf32>
      %310 = vector.multi_reduction <add>, %307, %cst_192 [1] : vector<16x32xf32> to vector<16xf32>
      %311 = vector.shape_cast %310 : vector<16xf32> to vector<16x1xf32>
      %cst_193 = arith.constant 3.200000e+01 : f32
      %312 = vector.broadcast %cst_193 : f32 to vector<16x1xf32>
      %313 = arith.divf %311, %312 : vector<16x1xf32>
      %314 = vector.broadcast %313 : vector<16x1xf32> to vector<16x32xf32>
      %315 = arith.subf %307, %314 : vector<16x32xf32>
      %316 = arith.mulf %315, %315 : vector<16x32xf32>
      %cst_194 = arith.constant dense<0.000000e+00> : vector<16xf32>
      %317 = vector.multi_reduction <add>, %316, %cst_194 [1] : vector<16x32xf32> to vector<16xf32>
      %318 = vector.shape_cast %317 : vector<16xf32> to vector<16x1xf32>
      %cst_195 = arith.constant 3.200000e+01 : f32
      %319 = vector.broadcast %cst_195 : f32 to vector<16x1xf32>
      %320 = arith.divf %318, %319 : vector<16x1xf32>
      %cst_196 = arith.constant 9.99999974E-6 : f32
      %321 = vector.broadcast %cst_196 : f32 to vector<16x1xf32>
      %322 = arith.addf %320, %321 : vector<16x1xf32>
      %323 = math.rsqrt %322 : vector<16x1xf32>
      %324 = vector.broadcast %323 : vector<16x1xf32> to vector<16x32xf32>
      %325 = arith.mulf %315, %324 : vector<16x32xf32>
      %326 = vector.broadcast %308 : vector<1x32xf32> to vector<16x32xf32>
      %327 = arith.mulf %325, %326 : vector<16x32xf32>
      %328 = vector.broadcast %309 : vector<1x32xf32> to vector<16x32xf32>
      %329 = arith.addf %327, %328 : vector<16x32xf32>
      %c0_197 = arith.constant 0 : index
      %c0_198 = arith.constant 0 : index
      %330 = vector.load %arg58[%c0_197, %c0_198] : memref<1x32xf32, #tpu.memory_space<vmem>>, vector<1x32xf32>
      %331 = tpu.transpose %329, [1, 0] : vector<16x32xf32> -> vector<32x16xf32>
      %cst_199 = arith.constant dense<0.000000e+00> : vector<1x16xf32>
      %332 = tpu.matmul %330, %331, %cst_199 {dimension_numbers = #tpu.dot_dimension_numbers<[1], [0], [0], [1], [0, 0, 1, 1], [], []>} : vector<1x32xf32>, vector<32x16xf32>, vector<1x16xf32> -> vector<1x16xf32>
      %c0_200 = arith.constant 0 : index
      %c0_201 = arith.constant 0 : index
      %333 = vector.load %arg59[%c0_200, %c0_201] : memref<1x1xf32, #tpu.memory_space<vmem>>, vector<1x1xf32>
      %334 = vector.broadcast %333 : vector<1x1xf32> to vector<1x16xf32>
      %335 = arith.addf %332, %334 : vector<1x16xf32>
      %c0_202 = arith.constant 0 : index
      %c0_203 = arith.constant 0 : index
      %336 = vector.load %arg60[%c0_202, %c0_203] : memref<1x16xf32, #tpu.memory_space<vmem>>, vector<1x16xf32>
      tpu.vector_store %arg60[%c0_202, %c0_203], %335 {strides = array<i32>} : memref<1x16xf32, #tpu.memory_space<vmem>>, vector<1x16xf32>,
    } else {
    }
    return
  }
  func.func @transform_0(%arg0: i32) -> (i32, i32) {
    %c0_i32 = arith.constant 0 : i32
    %c0_i32_0 = arith.constant 0 : i32
    %c0_i32_1 = arith.constant 0 : i32
    return %c0_i32, %c0_i32_0 : i32, i32
  }
  func.func @transform_1(%arg0: i32) -> (i32, i32) {
    %c0_i32 = arith.constant 0 : i32
    %c0_i32_0 = arith.constant 0 : i32
    %c0_i32_1 = arith.constant 0 : i32
    return %c0_i32, %c0_i32_0 : i32, i32
  }
  func.func @transform_2(%arg0: i32) -> (i32, i32) {
    %c0_i32 = arith.constant 0 : i32
    %c0_i32_0 = arith.constant 0 : i32
    %c0_i32_1 = arith.constant 0 : i32
    return %c0_i32, %c0_i32_0 : i32, i32
  }
  func.func @transform_3(%arg0: i32) -> (i32, i32) {
    %c0_i32 = arith.constant 0 : i32
    %c0_i32_0 = arith.constant 0 : i32
    %c0_i32_1 = arith.constant 0 : i32
    return %c0_i32, %c0_i32_0 : i32, i32
  }
  func.func @transform_4(%arg0: i32) -> (i32, i32) {
    %c0_i32 = arith.constant 0 : i32
    %c0_i32_0 = arith.constant 0 : i32
    %c0_i32_1 = arith.constant 0 : i32
    return %c0_i32, %c0_i32_0 : i32, i32
  }
  func.func @transform_5(%arg0: i32) -> (i32, i32) {
    %c0_i32 = arith.constant 0 : i32
    %c0_i32_0 = arith.constant 0 : i32
    %c0_i32_1 = arith.constant 0 : i32
    return %c0_i32, %c0_i32_0 : i32, i32
  }
  func.func @transform_6(%arg0: i32) -> (i32, i32) {
    %c0_i32 = arith.constant 0 : i32
    %c0_i32_0 = arith.constant 0 : i32
    %c0_i32_1 = arith.constant 0 : i32
    return %c0_i32, %c0_i32_0 : i32, i32
  }
  func.func @transform_7(%arg0: i32) -> (i32, i32) {
    %c0_i32 = arith.constant 0 : i32
    %c0_i32_0 = arith.constant 0 : i32
    %c0_i32_1 = arith.constant 0 : i32
    return %c0_i32, %c0_i32_0 : i32, i32
  }
  func.func @transform_8(%arg0: i32) -> (i32, i32) {
    %c0_i32 = arith.constant 0 : i32
    %c0_i32_0 = arith.constant 0 : i32
    %c0_i32_1 = arith.constant 0 : i32
    return %c0_i32, %c0_i32_0 : i32, i32
  }
  func.func @transform_9(%arg0: i32) -> (i32, i32, i32) {
    %c0_i32 = arith.constant 0 : i32
    %c0_i32_0 = arith.constant 0 : i32
    %c0_i32_1 = arith.constant 0 : i32
    return %arg0, %c0_i32, %c0_i32_0 : i32, i32, i32
  }
  func.func @transform_10(%arg0: i32) -> (i32, i32, i32) {
    %c0_i32 = arith.constant 0 : i32
    %c0_i32_0 = arith.constant 0 : i32
    %c0_i32_1 = arith.constant 0 : i32
    return %arg0, %c0_i32, %c0_i32_0 : i32, i32, i32
  }
  func.func @transform_11(%arg0: i32) -> (i32, i32, i32) {
    %c0_i32 = arith.constant 0 : i32
    %c0_i32_0 = arith.constant 0 : i32
    %c0_i32_1 = arith.constant 0 : i32
    return %arg0, %c0_i32, %c0_i32_0 : i32, i32, i32
  }
  func.func @transform_12(%arg0: i32) -> (i32, i32, i32) {
    %c0_i32 = arith.constant 0 : i32
    %c0_i32_0 = arith.constant 0 : i32
    %c0_i32_1 = arith.constant 0 : i32
    return %arg0, %c0_i32, %c0_i32_0 : i32, i32, i32
  }
  func.func @transform_13(%arg0: i32) -> (i32, i32, i32) {
    %c0_i32 = arith.constant 0 : i32
    %c0_i32_0 = arith.constant 0 : i32
    %c0_i32_1 = arith.constant 0 : i32
    return %arg0, %c0_i32, %c0_i32_0 : i32, i32, i32
  }
  func.func @transform_14(%arg0: i32) -> (i32, i32, i32) {
    %c0_i32 = arith.constant 0 : i32
    %c0_i32_0 = arith.constant 0 : i32
    %c0_i32_1 = arith.constant 0 : i32
    return %arg0, %c0_i32, %c0_i32_0 : i32, i32, i32
  }
  func.func @transform_15(%arg0: i32) -> (i32, i32, i32) {
    %c0_i32 = arith.constant 0 : i32
    %c0_i32_0 = arith.constant 0 : i32
    %c0_i32_1 = arith.constant 0 : i32
    return %arg0, %c0_i32, %c0_i32_0 : i32, i32, i32
  }
  func.func @transform_16(%arg0: i32) -> (i32, i32, i32) {
    %c0_i32 = arith.constant 0 : i32
    %c0_i32_0 = arith.constant 0 : i32
    %c0_i32_1 = arith.constant 0 : i32
    return %arg0, %c0_i32, %c0_i32_0 : i32, i32, i32
  }
  func.func @transform_17(%arg0: i32) -> (i32, i32, i32) {
    %c0_i32 = arith.constant 0 : i32
    %c0_i32_0 = arith.constant 0 : i32
    %c0_i32_1 = arith.constant 0 : i32
    return %arg0, %c0_i32, %c0_i32_0 : i32, i32, i32
  }
  func.func @transform_18(%arg0: i32) -> (i32, i32, i32) {
    %c0_i32 = arith.constant 0 : i32
    %c0_i32_0 = arith.constant 0 : i32
    %c0_i32_1 = arith.constant 0 : i32
    return %arg0, %c0_i32, %c0_i32_0 : i32, i32, i32
  }
  func.func @transform_19(%arg0: i32) -> (i32, i32, i32) {
    %c0_i32 = arith.constant 0 : i32
    %c0_i32_0 = arith.constant 0 : i32
    %c0_i32_1 = arith.constant 0 : i32
    return %arg0, %c0_i32, %c0_i32_0 : i32, i32, i32
  }
  func.func @transform_20(%arg0: i32) -> (i32, i32, i32) {
    %c0_i32 = arith.constant 0 : i32
    %c0_i32_0 = arith.constant 0 : i32
    %c0_i32_1 = arith.constant 0 : i32
    return %arg0, %c0_i32, %c0_i32_0 : i32, i32, i32
  }
  func.func @transform_21(%arg0: i32) -> (i32, i32, i32) {
    %c0_i32 = arith.constant 0 : i32
    %c0_i32_0 = arith.constant 0 : i32
    %c0_i32_1 = arith.constant 0 : i32
    return %arg0, %c0_i32, %c0_i32_0 : i32, i32, i32
  }
  func.func @transform_22(%arg0: i32) -> (i32, i32, i32) {
    %c0_i32 = arith.constant 0 : i32
    %c0_i32_0 = arith.constant 0 : i32
    %c0_i32_1 = arith.constant 0 : i32
    return %arg0, %c0_i32, %c0_i32_0 : i32, i32, i32
  }
  func.func @transform_23(%arg0: i32) -> (i32, i32, i32) {
    %c0_i32 = arith.constant 0 : i32
    %c0_i32_0 = arith.constant 0 : i32
    %c0_i32_1 = arith.constant 0 : i32
    return %arg0, %c0_i32, %c0_i32_0 : i32, i32, i32
  }
  func.func @transform_24(%arg0: i32) -> (i32, i32, i32) {
    %c0_i32 = arith.constant 0 : i32
    %c0_i32_0 = arith.constant 0 : i32
    %c0_i32_1 = arith.constant 0 : i32
    return %arg0, %c0_i32, %c0_i32_0 : i32, i32, i32
  }
  func.func @transform_25(%arg0: i32) -> (i32, i32) {
    %c0_i32 = arith.constant 0 : i32
    %c0_i32_0 = arith.constant 0 : i32
    %c0_i32_1 = arith.constant 0 : i32
    return %c0_i32, %c0_i32_0 : i32, i32
  }
  func.func @transform_26(%arg0: i32) -> (i32, i32) {
    %c0_i32 = arith.constant 0 : i32
    %c0_i32_0 = arith.constant 0 : i32
    %c0_i32_1 = arith.constant 0 : i32
    return %c0_i32, %c0_i32_0 : i32, i32
  }
  func.func @transform_27(%arg0: i32) -> (i32, i32) {
    %c0_i32 = arith.constant 0 : i32
    %c0_i32_0 = arith.constant 0 : i32
    %c0_i32_1 = arith.constant 0 : i32
    return %c0_i32, %c0_i32_0 : i32, i32
  }
  func.func @transform_28(%arg0: i32) -> (i32, i32) {
    %c0_i32 = arith.constant 0 : i32
    %c0_i32_0 = arith.constant 0 : i32
    %c0_i32_1 = arith.constant 0 : i32
    return %c0_i32, %c0_i32_0 : i32, i32
  }
  func.func @transform_29(%arg0: i32) -> (i32, i32) {
    %c0_i32 = arith.constant 0 : i32
    %c0_i32_0 = arith.constant 0 : i32
    %c0_i32_1 = arith.constant 0 : i32
    return %c0_i32, %c0_i32_0 : i32, i32
  }
  func.func @transform_30(%arg0: i32) -> (i32, i32) {
    %c0_i32 = arith.constant 0 : i32
    %c0_i32_0 = arith.constant 0 : i32
    %c0_i32_1 = arith.constant 0 : i32
    return %c0_i32, %c0_i32_0 : i32, i32
  }
  func.func @transform_31(%arg0: i32) -> (i32, i32) {
    %c0_i32 = arith.constant 0 : i32
    %c0_i32_0 = arith.constant 0 : i32
    %c0_i32_1 = arith.constant 0 : i32
    return %c0_i32, %c0_i32_0 : i32, i32
  }
  func.func @transform_32(%arg0: i32) -> (i32, i32) {
    %c0_i32 = arith.constant 0 : i32
    %c0_i32_0 = arith.constant 0 : i32
    %c0_i32_1 = arith.constant 0 : i32
    return %c0_i32, %c0_i32_0 : i32, i32
  }
  func.func @transform_33(%arg0: i32) -> (i32, i32) {
    %c0_i32 = arith.constant 0 : i32
    %c0_i32_0 = arith.constant 0 : i32
    %c0_i32_1 = arith.constant 0 : i32
    return %c0_i32, %c0_i32_0 : i32, i32
  }
  func.func @transform_34(%arg0: i32) -> (i32, i32) {
    %c0_i32 = arith.constant 0 : i32
    %c0_i32_0 = arith.constant 0 : i32
    %c0_i32_1 = arith.constant 0 : i32
    return %c0_i32, %c0_i32_0 : i32, i32
  }
  func.func @transform_35(%arg0: i32) -> (i32, i32) {
    %c0_i32 = arith.constant 0 : i32
    %c0_i32_0 = arith.constant 0 : i32
    %c0_i32_1 = arith.constant 0 : i32
    return %c0_i32, %c0_i32_0 : i32, i32
  }
  func.func @transform_36(%arg0: i32) -> (i32, i32) {
    %c0_i32 = arith.constant 0 : i32
    %c0_i32_0 = arith.constant 0 : i32
    %c0_i32_1 = arith.constant 0 : i32
    return %c0_i32, %c0_i32_0 : i32, i32
  }
  func.func @transform_37(%arg0: i32) -> (i32, i32) {
    %c0_i32 = arith.constant 0 : i32
    %c0_i32_0 = arith.constant 0 : i32
    %c0_i32_1 = arith.constant 0 : i32
    return %c0_i32, %c0_i32_0 : i32, i32
  }
  func.func @transform_38(%arg0: i32) -> (i32, i32) {
    %c0_i32 = arith.constant 0 : i32
    %c0_i32_0 = arith.constant 0 : i32
    %c0_i32_1 = arith.constant 0 : i32
    return %c0_i32, %c0_i32_0 : i32, i32
  }
  func.func @transform_39(%arg0: i32) -> (i32, i32) {
    %c0_i32 = arith.constant 0 : i32
    %c0_i32_0 = arith.constant 0 : i32
    %c0_i32_1 = arith.constant 0 : i32
    return %c0_i32, %c0_i32_0 : i32, i32
  }
  func.func @transform_40(%arg0: i32) -> (i32, i32) {
    %c0_i32 = arith.constant 0 : i32
    %c0_i32_0 = arith.constant 0 : i32
    %c0_i32_1 = arith.constant 0 : i32
    return %c0_i32, %c0_i32_0 : i32, i32
  }
  func.func @transform_41(%arg0: i32) -> (i32, i32) {
    %c0_i32 = arith.constant 0 : i32
    %c0_i32_0 = arith.constant 0 : i32
    %c0_i32_1 = arith.constant 0 : i32
    return %c0_i32, %c0_i32_0 : i32, i32
  }
  func.func @transform_42(%arg0: i32) -> (i32, i32) {
    %c0_i32 = arith.constant 0 : i32
    %c0_i32_0 = arith.constant 0 : i32
    %c0_i32_1 = arith.constant 0 : i32
    return %c0_i32, %c0_i32_0 : i32, i32
  }
  func.func @transform_43(%arg0: i32) -> (i32, i32) {
    %c0_i32 = arith.constant 0 : i32
    %c0_i32_0 = arith.constant 0 : i32
    %c0_i32_1 = arith.constant 0 : i32
    return %c0_i32, %c0_i32_0 : i32, i32
  }
  func.func @transform_44(%arg0: i32) -> (i32, i32) {
    %c0_i32 = arith.constant 0 : i32
    %c0_i32_0 = arith.constant 0 : i32
    %c0_i32_1 = arith.constant 0 : i32
    return %c0_i32, %c0_i32_0 : i32, i32
  }
  func.func @transform_45(%arg0: i32) -> (i32, i32) {
    %c0_i32 = arith.constant 0 : i32
    %c0_i32_0 = arith.constant 0 : i32
    %c0_i32_1 = arith.constant 0 : i32
    return %c0_i32, %c0_i32_0 : i32, i32
  }
  func.func @transform_46(%arg0: i32) -> (i32, i32) {
    %c0_i32 = arith.constant 0 : i32
    %c0_i32_0 = arith.constant 0 : i32
    %c0_i32_1 = arith.constant 0 : i32
    return %c0_i32, %c0_i32_0 : i32, i32
  }
  func.func @transform_47(%arg0: i32) -> (i32, i32) {
    %c0_i32 = arith.constant 0 : i32
    %c0_i32_0 = arith.constant 0 : i32
    %c0_i32_1 = arith.constant 0 : i32
    return %c0_i32, %c0_i32_0 : i32, i32
  }
  func.func @transform_48(%arg0: i32) -> (i32, i32) {
    %c0_i32 = arith.constant 0 : i32
    %c0_i32_0 = arith.constant 0 : i32
    %c0_i32_1 = arith.constant 0 : i32
    return %c0_i32, %c0_i32_0 : i32, i32
  }
  func.func @transform_49(%arg0: i32) -> (i32, i32) {
    %c0_i32 = arith.constant 0 : i32
    %c0_i32_0 = arith.constant 0 : i32
    %c0_i32_1 = arith.constant 0 : i32
    return %c0_i32, %c0_i32_0 : i32, i32
  }
  func.func @transform_50(%arg0: i32) -> (i32, i32) {
    %c0_i32 = arith.constant 0 : i32
    %c0_i32_0 = arith.constant 0 : i32
    %c0_i32_1 = arith.constant 0 : i32
    return %c0_i32, %c0_i32_0 : i32, i32
  }
  func.func @transform_51(%arg0: i32) -> (i32, i32) {
    %c0_i32 = arith.constant 0 : i32
    %c0_i32_0 = arith.constant 0 : i32
    %c0_i32_1 = arith.constant 0 : i32
    return %c0_i32, %c0_i32_0 : i32, i32
  }
  func.func @transform_52(%arg0: i32) -> (i32, i32) {
    %c0_i32 = arith.constant 0 : i32
    %c0_i32_0 = arith.constant 0 : i32
    %c0_i32_1 = arith.constant 0 : i32
    return %c0_i32, %c0_i32_0 : i32, i32
  }
  func.func @transform_53(%arg0: i32) -> (i32, i32) {
    %c0_i32 = arith.constant 0 : i32
    %c0_i32_0 = arith.constant 0 : i32
    %c0_i32_1 = arith.constant 0 : i32
    return %c0_i32, %c0_i32_0 : i32, i32
  }
  func.func @transform_54(%arg0: i32) -> (i32, i32) {
    %c0_i32 = arith.constant 0 : i32
    %c0_i32_0 = arith.constant 0 : i32
    %c0_i32_1 = arith.constant 0 : i32
    return %c0_i32, %c0_i32_0 : i32, i32
  }
  func.func @transform_55(%arg0: i32) -> (i32, i32) {
    %c0_i32 = arith.constant 0 : i32
    %c0_i32_0 = arith.constant 0 : i32
    %c0_i32_1 = arith.constant 0 : i32
    return %c0_i32, %c0_i32_0 : i32, i32
  }
  func.func @transform_56(%arg0: i32) -> (i32, i32) {
    %c0_i32 = arith.constant 0 : i32
    %c0_i32_0 = arith.constant 0 : i32
    %c0_i32_1 = arith.constant 0 : i32
    return %c0_i32, %c0_i32_0 : i32, i32
  }
  func.func @transform_57(%arg0: i32) -> (i32, i32) {
    %c0_i32 = arith.constant 0 : i32
    %c0_i32_0 = arith.constant 0 : i32
    %c0_i32_1 = arith.constant 0 : i32
    return %c0_i32, %c0_i32_0 : i32, i32
  }
  func.func @transform_58(%arg0: i32) -> (i32, i32) {
    %c0_i32 = arith.constant 0 : i32
    %c0_i32_0 = arith.constant 0 : i32
    %c0_i32_1 = arith.constant 0 : i32
    return %c0_i32, %c0_i32_0 : i32, i32
  }
  func.func @transform_59(%arg0: i32) -> (i32, i32) {
    %c0_i32 = arith.constant 0 : i32
    %c0_i32_0 = arith.constant 0 : i32
    %c0_i32_1 = arith.constant 0 : i32
    return %c0_i32, %c0_i32_0 : i32, i32
  }
}

</mosaic_0001>

<bundles_post_ra>
// kernel: deeponet_forward.1
= control target key start
LH: loop header
LB: loop body
LE: loop exit
PB: predicated region body
PF: predicated region fallthrough
CT: control target
= control target key end

     0   :  { %s7047_s6 = smov 1   ;;  %s7048_s10 = smov 2   ;;  %s8306_s0 = inlined_call_operand.smem [shape: u32[60], index: -1, kind: input, shape index: {}] }
   0x1   :  { %s7134_s5 = sld [smem:[%s8306_s0]]   ;;  %s7049_s14 = smov 3  }
   0x2   :  { %s7139_s9 = sld [smem:[%s8306_s0 + %s7047_s6]]   ;;  %s7050_s18 = smov 4  }
   0x3   :  { %s7144_s13 = sld [smem:[%s8306_s0 + %s7048_s10]]   ;;  %s7051_s22 = smov 5  }
   0x4   :  { %s7149_s17 = sld [smem:[%s8306_s0 + %s7049_s14]]   ;;  %s7052_s26 = smov 6  }
   0x5   :  { %s7154_s21 = sld [smem:[%s8306_s0 + %s7050_s18]]   ;;  %s7053_s30 = smov 7  }
   0x6   :  { %s7159_s25 = sld [smem:[%s8306_s0 + %s7051_s22]]   ;;  %s7054_s4 = smov 8  }
   0x7   :  { %8341 = sst [smem:[#allocation35_spill]] %s7134_s5  ;;  %s7055_s10 = smov 9  }
   0x8   :  { %8342 = sst [smem:[#allocation36_spill]] %s7139_s9  ;;  %s7056_s15 = smov 10  }
   0x9   :  { %8343 = sst [smem:[#allocation37_spill]] %s7144_s13  ;;  %s7057_s20 = smov 11  }
   0xa   :  { %8344 = sst [smem:[#allocation38_spill]] %s7149_s17  ;;  %s7059_s1 = smov 13  }
   0xb   :  { %8345 = sst [smem:[#allocation39_spill]] %s7154_s21  ;;  %s7060_s7 = smov 14  }
   0xc   :  { %8346 = sst [smem:[#allocation40_spill]] %s7159_s25  ;;  %s7062_s22 = smov 16  }
   0xd   :  { %s7164_s29 = sld [smem:[%s8306_s0 + %s7052_s26]]   ;;  %s7058_s26 = smov 12  }
   0xe   :  { %s7169_s3 = sld [smem:[%s8306_s0 + %s7053_s30]]   ;;  %s7063_s28 = smov 17  }
   0xf   :  { %s7174_s8 = sld [smem:[%s8306_s0 + %s7054_s4]]   ;;  %s7105_s16 = smov 59  }
  0x10   :  { %s7179_s14 = sld [smem:[%s8306_s0 + %s7055_s10]]  }
  0x11   :  { %s7184_s19 = sld [smem:[%s8306_s0 + %s7056_s15]]   ;;  %s7061_s15 = smov 15  }
  0x12   :  { %s7189_s24 = sld [smem:[%s8306_s0 + %s7057_s20]]  }
  0x13   :  { %8347 = sst [smem:[#allocation41_spill]] %s7164_s29 }
  0x14   :  { %8348 = sst [smem:[#allocation42_spill]] %s7169_s3 }
  0x15   :  { %8349 = sst [smem:[#allocation43_spill]] %s7174_s8 }
  0x16   :  { %8350 = sst [smem:[#allocation44_spill]] %s7179_s14 }
  0x17   :  { %8351 = sst [smem:[#allocation45_spill]] %s7184_s19 }
  0x18   :  { %8352 = sst [smem:[#allocation46_spill]] %s7189_s24 }
  0x19   :  { %s7194_s30 = sld [smem:[%s8306_s0 + %s7058_s26]]  }
  0x1a   :  { %s7199_s6 = sld [smem:[%s8306_s0 + %s7059_s1]]  }
  0x1b   :  { %s7204_s12 = sld [smem:[%s8306_s0 + %s7060_s7]]   ;;  %s7064_s7 = smov 18  }
  0x1c   :  { %s7209_s20 = sld [smem:[%s8306_s0 + %s7061_s15]]   ;;  %s7065_s15 = smov 19  }
  0x1d   :  { %s7214_s27 = sld [smem:[%s8306_s0 + %s7062_s22]]   ;;  %s7066_s22 = smov 20  }
  0x1e   :  { %s7219_s4 = sld [smem:[%s8306_s0 + %s7063_s28]]   ;;  %s7067_s28 = smov 21  }
  0x1f   :  { %8353 = sst [smem:[#allocation47_spill]] %s7194_s30 }
  0x20   :  { %8354 = sst [smem:[#allocation48_spill]] %s7199_s6 }
  0x21   :  { %8355 = sst [smem:[#allocation49_spill]] %s7204_s12 }
  0x22   :  { %8356 = sst [smem:[#allocation50_spill]] %s7209_s20 }
  0x23   :  { %8357 = sst [smem:[#allocation51_spill]] %s7214_s27 }
  0x24   :  { %8358 = sst [smem:[#allocation52_spill]] %s7219_s4 }
  0x25   :  { %s7224_s13 = sld [smem:[%s8306_s0 + %s7064_s7]]   ;;  %s7068_s7 = smov 22  }
  0x26   :  { %s7229_s21 = sld [smem:[%s8306_s0 + %s7065_s15]]   ;;  %s7069_s15 = smov 23  }
  0x27   :  { %s7234_s17 = sld [smem:[%s8306_s0 + %s7066_s22]]   ;;  %s7070_s22 = smov 24  }
  0x28   :  { %s7239_s29 = sld [smem:[%s8306_s0 + %s7067_s28]]   ;;  %s7071_s28 = smov 25  }
  0x29   :  { %s7244_s8 = sld [smem:[%s8306_s0 + %s7068_s7]]   ;;  %s7072_s7 = smov 26  }
  0x2a   :  { %s7249_s25 = sld [smem:[%s8306_s0 + %s7069_s15]]   ;;  %s7073_s15 = smov 27  }
  0x2b   :  { %8359 = sst [smem:[#allocation53_spill]] %s7224_s13 }
  0x2c   :  { %8360 = sst [smem:[#allocation54_spill]] %s7229_s21 }
  0x2d   :  { %8361 = sst [smem:[#allocation55_spill]] %s7234_s17 }
  0x2e   :  { %8362 = sst [smem:[#allocation56_spill]] %s7239_s29 }
  0x2f   :  { %8363 = sst [smem:[#allocation57_spill]] %s7244_s8 }
  0x30   :  { %8364 = sst [smem:[#allocation58_spill]] %s7249_s25 }
  0x31   :  { %s7254_s3 = sld [smem:[%s8306_s0 + %s7070_s22]]   ;;  %s7074_s22 = smov 28  }
  0x32   :  { %s7259_s5 = sld [smem:[%s8306_s0 + %s7071_s28]]   ;;  %s7075_s28 = smov 29  }
  0x33   :  { %s7264_s9 = sld [smem:[%s8306_s0 + %s7072_s7]]   ;;  %s7076_s7 = smov 30  }
  0x34   :  { %s7269_s25 = sld [smem:[%s8306_s0 + %s7073_s15]]   ;;  %s7077_s15 = smov 31  }
  0x35   :  { %s7427_s14 = sld [smem:[%s8306_s0 + %s7105_s16]]  }
  0x37   :  { %8365 = sst [smem:[#allocation59_spill]] %s7254_s3 }
  0x38   :  { %8366 = sst [smem:[#allocation60_spill]] %s7259_s5 }
  0x39   :  { %8367 = sst [smem:[#allocation61_spill]] %s7264_s9 }
  0x3a   :  { %8368 = sst [smem:[#allocation62_spill]] %s7269_s25 }
  0x3b   :  { %s7274_s3 = sld [smem:[%s8306_s0 + %s7074_s22]]   ;;  %s7078_s22 = smov 32  }
  0x3c   :  { %s7279_s5 = sld [smem:[%s8306_s0 + %s7075_s28]]   ;;  %s7079_s28 = smov 33  }
  0x3d   :  { %s7284_s9 = sld [smem:[%s8306_s0 + %s7076_s7]]   ;;  %s7080_s7 = smov 34  }
  0x3e   :  { %s7289_s25 = sld [smem:[%s8306_s0 + %s7077_s15]]   ;;  %s7081_s15 = smov 35  }
  0x3f   :  { %8399 = sst [smem:[#allocation93_spill]] %s7427_s14 }
  0x41   :  { %8369 = sst [smem:[#allocation63_spill]] %s7274_s3 }
  0x42   :  { %8370 = sst [smem:[#allocation64_spill]] %s7279_s5 }
  0x43   :  { %8371 = sst [smem:[#allocation65_spill]] %s7284_s9 }
  0x44   :  { %8372 = sst [smem:[#allocation66_spill]] %s7289_s25 }
  0x45   :  { %s7294_s3 = sld [smem:[%s8306_s0 + %s7078_s22]]   ;;  %s7082_s22 = smov 36  }
  0x46   :  { %s7299_s5 = sld [smem:[%s8306_s0 + %s7079_s28]]   ;;  %s7083_s28 = smov 37  }
  0x47   :  { %s7304_s9 = sld [smem:[%s8306_s0 + %s7080_s7]]   ;;  %s7084_s7 = smov 38  }
  0x48   :  { %s7309_s25 = sld [smem:[%s8306_s0 + %s7081_s15]]   ;;  %s7085_s15 = smov 39  }
  0x4b   :  { %8373 = sst [smem:[#allocation67_spill]] %s7294_s3 }
  0x4c   :  { %8374 = sst [smem:[#allocation68_spill]] %s7299_s5 }
  0x4d   :  { %8375 = sst [smem:[#allocation69_spill]] %s7304_s9 }
  0x4e   :  { %8376 = sst [smem:[#allocation70_spill]] %s7309_s25 }
  0x4f   :  { %s7314_s3 = sld [smem:[%s8306_s0 + %s7082_s22]]   ;;  %s7086_s22 = smov 40  }
  0x50   :  { %s7319_s5 = sld [smem:[%s8306_s0 + %s7083_s28]]   ;;  %s7087_s28 = smov 41  }
  0x51   :  { %s7324_s9 = sld [smem:[%s8306_s0 + %s7084_s7]]   ;;  %s7088_s7 = smov 42  }
  0x52   :  { %s7329_s25 = sld [smem:[%s8306_s0 + %s7085_s15]]   ;;  %s7089_s15 = smov 43  }
  0x53   :  { %s7334_s8 = sld [smem:[%s8306_s0 + %s7086_s22]]   ;;  %s7090_s22 = smov 44  }
  0x54   :  { %s7339_s29 = sld [smem:[%s8306_s0 + %s7087_s28]]   ;;  %s7091_s28 = smov 45  }
  0x55   :  { %8377 = sst [smem:[#allocation71_spill]] %s7314_s3 }
  0x56   :  { %8378 = sst [smem:[#allocation72_spill]] %s7319_s5 }
  0x57   :  { %8379 = sst [smem:[#allocation73_spill]] %s7324_s9 }
  0x58   :  { %8380 = sst [smem:[#allocation74_spill]] %s7329_s25 }
  0x59   :  { %8381 = sst [smem:[#allocation75_spill]] %s7334_s8 }
  0x5a   :  { %8382 = sst [smem:[#allocation76_spill]] %s7339_s29 }
  0x5b   :  { %s7344_s9 = sld [smem:[%s8306_s0 + %s7088_s7]]   ;;  %s7092_s7 = smov 46  }
  0x5c   :  { %s7349_s17 = sld [smem:[%s8306_s0 + %s7089_s15]]   ;;  %s7093_s15 = smov 47  }
  0x5d   :  { %s7354_s8 = sld [smem:[%s8306_s0 + %s7090_s22]]   ;;  %s7094_s22 = smov 48  }
  0x5e   :  { %s7359_s21 = sld [smem:[%s8306_s0 + %s7091_s28]]   ;;  %s7095_s28 = smov 49  }
  0x5f   :  { %s7364_s13 = sld [smem:[%s8306_s0 + %s7092_s7]]   ;;  %s7096_s7 = smov 50  }
  0x60   :  { %s7369_s4 = sld [smem:[%s8306_s0 + %s7093_s15]]   ;;  %s7097_s15 = smov 51  }
  0x61   :  { %8383 = sst [smem:[#allocation77_spill]] %s7344_s9 }
  0x62   :  { %8384 = sst [smem:[#allocation78_spill]] %s7349_s17 }
  0x63   :  { %8385 = sst [smem:[#allocation79_spill]] %s7354_s8 }
  0x64   :  { %8386 = sst [smem:[#allocation80_spill]] %s7359_s21 }
  0x65   :  { %8387 = sst [smem:[#allocation81_spill]] %s7364_s13 }
  0x66   :  { %8388 = sst [smem:[#allocation82_spill]] %s7369_s4 }
  0x67   :  { %s7374_s8 = sld [smem:[%s8306_s0 + %s7094_s22]]   ;;  %s7098_s22 = smov 52  }
  0x68   :  { %s7379_s27 = sld [smem:[%s8306_s0 + %s7095_s28]]   ;;  %s7099_s28 = smov 53  }
  0x69   :  { %s7384_s13 = sld [smem:[%s8306_s0 + %s7096_s7]]   ;;  %s7100_s7 = smov 54  }
  0x6a   :  { %s7389_s4 = sld [smem:[%s8306_s0 + %s7097_s15]]   ;;  %s7101_s15 = smov 55  }
  0x6b   :  { %s7394_s20 = sld [smem:[%s8306_s0 + %s7098_s22]]   ;;  %s7102_s22 = smov 56  }
  0x6c   :  { %s7399_s12 = sld [smem:[%s8306_s0 + %s7099_s28]]   ;;  %s7103_s28 = smov 57  }
  0x6d   :  { %8389 = sst [smem:[#allocation83_spill]] %s7374_s8 }
  0x6e   :  { %8390 = sst [smem:[#allocation84_spill]] %s7379_s27 }
  0x6f   :  { %8391 = sst [smem:[#allocation85_spill]] %s7384_s13 }
  0x70   :  { %8392 = sst [smem:[#allocation86_spill]] %s7389_s4 }
  0x71   :  { %8393 = sst [smem:[#allocation87_spill]] %s7394_s20 }
  0x72   :  { %8394 = sst [smem:[#allocation88_spill]] %s7399_s12 }
  0x73   :  { %s7404_s6 = sld [smem:[%s8306_s0 + %s7100_s7]]   ;;  %s7104_s7 = smov 58  }
  0x74   :  { %s7409_s4 = sld [smem:[%s8306_s0 + %s7101_s15]]  }
  0x75   :  { %s7414_s30 = sld [smem:[%s8306_s0 + %s7102_s22]]  }
  0x76   :  { %s7419_s12 = sld [smem:[%s8306_s0 + %s7103_s28]]  }
  0x77   :  { %s5409_s24 = sld [smem:[%s8306_s0 + %s7104_s7]]  }
  0x79   :  { %8395 = sst [smem:[#allocation89_spill]] %s7404_s6 }
  0x7a   :  { %8396 = sst [smem:[#allocation90_spill]] %s7409_s4 }
  0x7b   :  { %8397 = sst [smem:[#allocation91_spill]] %s7414_s30 }
  0x7c   :  { %8398 = sst [smem:[#allocation92_spill]] %s7419_s12 }
  0x7d   :  { %v124_v0 = vstv %s5409_s24 }
  0x7e   :  { %125 = vst [vmem:[#allocation3] sm:$0x1] %v124_v0 }
  0x7f   :  { %126 = vsyncpa [#allocation5], 0 }
  0x80   :  { %127 = vsyncpa [#allocation7], 0 }
  0x81   :  { %128 = vsyncpa [#allocation10], 0 }
  0x82   :  { %129 = vsyncpa [#allocation13], 0 }
  0x83   :  { %130 = vsyncpa [#allocation16], 0 }
  0x84   :  { %131 = vsyncpa [#allocation19], 0 }
  0x85   :  { %132 = vsyncpa [#allocation22], 0 }
  0x86   :  { %133 = vsyncpa [#allocation25], 0  ;;  %s7429_s22 = smov 0  }
  0x87 LB: > { %s8400_s30 = sld [smem:[#allocation91_spill]]  ;;  %s7438_s24 = sadd.s32 4294967295, %s7045_s22   ;;  %s7045_s22 = sphi %s7429_s22, %s139_s22  }
  0x88   : > { %s8401_s29 = sld [smem:[#allocation76_spill]]  ;;  %p5412_p0 = scmp.ge.s32.totalorder %s7045_s22, 1 }
  0x89   : > { %s8402_s27 = sld [smem:[#allocation84_spill]]  ;;  %p1484_p1 = scmp.lt.s32.totalorder %s7045_s22, 7 }
  0x8a   : > { %s8403_s25 = sld [smem:[#allocation74_spill]]  ;;  %p5413_p2 = scmp.ne.s32.totalorder %s7438_s24, 0 }
  0x8b   : > { %s8404_s21 = sld [smem:[#allocation80_spill]]  ;;  %p6363_p3 = scmp.eq.s32.totalorder %s7438_s24, 0 }
  0x8c   : > { %s8405_s20 = sld [smem:[#allocation87_spill]]  ;;  %p7444_p4 = pnand %p5412_p0, %p1484_p1 }
  0x8d   : > { %s8406_s17 = sld [smem:[#allocation78_spill]]  ;;  %s7106_s26 = smov [#allocation6]  }
  0x8e   : > { %s8407_s13 = sld [smem:[#allocation85_spill]]  ;;  %s1570_s28 = sshll.u32 %s7106_s26, 4  ;;  %s1571_s28 = int_to_ptr.vmem [resolvable:$true] %s1570_s28 }
  0x8f   : > { %s8408_s12 = sld [smem:[#allocation92_spill]]  ;;  %s1598_s1 = sshll.u32 %s8401_s29, 4  ;;  %s7451_s1 = int_to_ptr.hbm [resolvable:$true] %s1598_s1 }
  0x90   : > { %s8409_s9 = sld [smem:[#allocation77_spill]]  ;;  %p6317_p5 = pneg %p7444_p4 }
  0x91   : > { %s8410_s8 = sld [smem:[#allocation83_spill]]  ;;  %s7107_s10 = smov [#allocation9]  }
  0x92   : > { %s8411_s6 = sld [smem:[#allocation89_spill]]  ;;  %p7456_p6 = pnand %p6363_p3, %p6317_p5 }
  0x93   : > { %s8412_s5 = sld [smem:[#allocation72_spill]]  ;;  %s1622_s2 = sshll.u32 %s8406_s17, 4  ;;  %s7463_s2 = int_to_ptr.hbm [resolvable:$true] %s1622_s2 }
  0x94   : > { %s8413_s4 = sld [smem:[#allocation90_spill]]  ;;  %s7460_s11 = sshll.u32 %s7107_s10, 4  ;;  %s1601_s11 = int_to_ptr.vmem [resolvable:$true] %s7460_s11 }
  0x95   : > { %s8414_s3 = sld [smem:[#allocation71_spill]]  ;;  %p7468_p8 = pneg %p7456_p6 }
  0x96   : > { %8415 = sst [smem:[#allocation94_spill]] %s7045_s22 }
  0x99   : > { %s1568_s0 = sshll.u32 %s8412_s5, 4  ;;  %s6564_s26 = scalar_lea.hbm %s8412_s5, 1  ;;  %s7435_s0 = int_to_ptr.hbm [resolvable:$true] %s1568_s0 }
  0x9a   : > { %s6557_s16 = sshra.s32 %s7435_s0, 4  ;;  %s6558_s16 = int_to_ptr.hbm [resolvable:$true] %s6557_s16 }
  0x9b   : > { %s6559_s15 = scalar_lea.hbm %s6558_s16, 1  ;;  %p6565_p11 = scmp.lt.s32.totalorder %s6558_s16, %s8412_s5 }
  0x9c   : > { %p6560_p7 = scmp.ne.s32.totalorder %s6558_s16, %s6559_s15  ;;  %p6566_p12 = scmp.lt.s32.totalorder %s6564_s26, %s6559_s15 }
  0x9e   : > { %p6562_p9 = pnand %p7468_p8, %p6560_p7  ;;  %p6567_p13 = por %p6566_p12, %p6565_p11 }
  0xa0   : > { %p6563_p10 = pneg %p6562_p9 }
  0xa2   : > { %p6568_p0 = pnand %p6567_p13, %p6563_p10 }
  0xa4   : > { %6571 = shalt.err (!%p6568_p0)
}
  0xa5   : > { %6323 = dma.hbm_to_vmem [thread:$0]  (!%p7456_p6), %s7435_s0, 16, %s1571_s28, [#allocation7]  }
  0xa6   : > { %s6587_s10 = sshra.s32 %s7451_s1, 4  ;;  %s6594_s16 = scalar_lea.hbm %s8401_s29, 1  ;;  %s6588_s10 = int_to_ptr.hbm [resolvable:$true] %s6587_s10 }
  0xa7   : > { %s6589_s22 = scalar_lea.hbm %s6588_s10, 1  ;;  %p6595_p9 = scmp.lt.s32.totalorder %s6588_s10, %s8401_s29 }
  0xa8   : > { %p6590_p1 = scmp.ne.s32.totalorder %s6588_s10, %s6589_s22  ;;  %p6596_p11 = scmp.lt.s32.totalorder %s6594_s16, %s6589_s22 }
  0xaa   : > { %p6592_p5 = pnand %p6590_p1, %p7468_p8  ;;  %p6597_p10 = por %p6596_p11, %p6595_p9 }
  0xac   : > { %p6593_p7 = pneg %p6592_p5 }
  0xae   : > { %p6598_p12 = pnand %p6597_p10, %p6593_p7 }
  0xb0   : > { %6601 = shalt.err (!%p6598_p12)
}
  0xb1   : > { %6329 = dma.hbm_to_vmem [thread:$0]  (!%p7456_p6), %s7451_s1, 16, %s1601_s11, [#allocation10]  }
  0xb2   : > { %s7108_s0 = smov [#allocation12]   ;;  %s1655_s15 = sshll.u32 %s8410_s8, 4  ;;  %s7488_s15 = int_to_ptr.hbm [resolvable:$true] %s1655_s15 }
  0xb3   : > { %s1624_s28 = sshll.u32 %s7108_s0, 4  ;;  %s6617_s26 = sshra.s32 %s7463_s2, 4  ;;  %s1625_s28 = int_to_ptr.vmem [resolvable:$true] %s1624_s28  ;;  %s6618_s26 = int_to_ptr.hbm [resolvable:$true] %s6617_s26 }
  0xb4   : > { %s6619_s22 = scalar_lea.hbm %s6618_s26, 1  ;;  %s6624_s10 = scalar_lea.hbm %s8406_s17, 1 }
  0xb5   : > { %p6620_p13 = scmp.ne.s32.totalorder %s6618_s26, %s6619_s22  ;;  %p6625_p5 = scmp.lt.s32.totalorder %s6618_s26, %s8406_s17 }
  0xb6   : > { %p6626_p7 = scmp.lt.s32.totalorder %s6624_s10, %s6619_s22 }
  0xb7   : > { %p6622_p0 = pnand %p6620_p13, %p7468_p8 }
  0xb8   : > { %p6627_p9 = por %p6626_p7, %p6625_p5 }
  0xb9   : > { %p6623_p1 = pneg %p6622_p0 }
  0xbb   : > { %p6628_p11 = pnand %p6627_p9, %p6623_p1 }
  0xbd   : > { %6631 = shalt.err (!%p6628_p11)
}
  0xbe   : > { %6335 = dma.hbm_to_vmem [thread:$0]  (!%p7456_p6), %s7463_s2, 16, %s1625_s28, [#allocation13]  }
  0xbf   : > { %s1679_s1 = sshll.u32 %s8407_s13, 4  ;;  %s7109_s11 = smov [#allocation15]   ;;  %s7499_s1 = int_to_ptr.hbm [resolvable:$true] %s1679_s1 }
  0xc0   : > { %s1657_s16 = sshll.u32 %s7109_s11, 4  ;;  %s6647_s0 = sshra.s32 %s7488_s15, 4  ;;  %s1658_s16 = int_to_ptr.vmem [resolvable:$true] %s1657_s16  ;;  %s6648_s0 = int_to_ptr.hbm [resolvable:$true] %s6647_s0 }
  0xc1   : > { %s6649_s26 = scalar_lea.hbm %s6648_s0, 1  ;;  %s6654_s22 = scalar_lea.hbm %s8410_s8, 1 }
  0xc2   : > { %p6650_p10 = scmp.ne.s32.totalorder %s6648_s0, %s6649_s26  ;;  %p6655_p0 = scmp.lt.s32.totalorder %s6648_s0, %s8410_s8 }
  0xc3   : > { %p6656_p1 = scmp.lt.s32.totalorder %s6654_s22, %s6649_s26 }
  0xc4   : > { %p6652_p12 = pnand %p6650_p10, %p7468_p8 }
  0xc5   : > { %p6657_p5 = por %p6656_p1, %p6655_p0 }
  0xc6   : > { %p6653_p13 = pneg %p6652_p12 }
  0xc8   : > { %p6658_p7 = pnand %p6657_p5, %p6653_p13 }
  0xca   : > { %6661 = shalt.err (!%p6658_p7)
}
  0xcb   : > { %6341 = dma.hbm_to_vmem [thread:$0]  (!%p7456_p6), %s7488_s15, 16, %s1658_s16, [#allocation16]  }
  0xcc   : > { %s7110_s2 = smov [#allocation18]   ;;  %s1709_s10 = sshll.u32 %s8411_s6, 4  ;;  %s7510_s10 = int_to_ptr.hbm [resolvable:$true] %s1709_s10 }
  0xcd   : > { %s1681_s28 = sshll.u32 %s7110_s2, 4  ;;  %s6677_s11 = sshra.s32 %s7499_s1, 4  ;;  %s1682_s28 = int_to_ptr.vmem [resolvable:$true] %s1681_s28  ;;  %s6678_s11 = int_to_ptr.hbm [resolvable:$true] %s6677_s11 }
  0xce   : > { %s6679_s0 = scalar_lea.hbm %s6678_s11, 1  ;;  %s6684_s26 = scalar_lea.hbm %s8407_s13, 1 }
  0xcf   : > { %p6680_p9 = scmp.ne.s32.totalorder %s6678_s11, %s6679_s0  ;;  %p6685_p12 = scmp.lt.s32.totalorder %s6678_s11, %s8407_s13 }
  0xd0   : > { %p6686_p13 = scmp.lt.s32.totalorder %s6684_s26, %s6679_s0 }
  0xd1   : > { %p6682_p11 = pnand %p6680_p9, %p7468_p8 }
  0xd2   : > { %p6687_p0 = por %p6686_p13, %p6685_p12 }
  0xd3   : > { %p6683_p10 = pneg %p6682_p11 }
  0xd5   : > { %p6688_p1 = pnand %p6687_p0, %p6683_p10 }
  0xd7   : > { %6691 = shalt.err (!%p6688_p1)
}
  0xd8   : > { %6347 = dma.hbm_to_vmem [thread:$0]  (!%p7456_p6), %s7499_s1, 16, %s1682_s28, [#allocation19]  }
  0xd9   : > { %s1733_s15 = sshll.u32 %s8400_s30, 4  ;;  %s7111_s16 = smov [#allocation21]   ;;  %s7521_s15 = int_to_ptr.hbm [resolvable:$true] %s1733_s15 }
  0xda   : > { %s1711_s22 = sshll.u32 %s7111_s16, 4  ;;  %s6707_s2 = sshra.s32 %s7510_s10, 4  ;;  %s1712_s22 = int_to_ptr.vmem [resolvable:$true] %s1711_s22  ;;  %s6708_s2 = int_to_ptr.hbm [resolvable:$true] %s6707_s2 }
  0xdb   : > { %s6709_s11 = scalar_lea.hbm %s6708_s2, 1  ;;  %s6714_s0 = scalar_lea.hbm %s8411_s6, 1 }
  0xdc   : > { %p6710_p5 = scmp.ne.s32.totalorder %s6708_s2, %s6709_s11  ;;  %p6715_p11 = scmp.lt.s32.totalorder %s6708_s2, %s8411_s6 }
  0xdd   : > { %p6716_p10 = scmp.lt.s32.totalorder %s6714_s0, %s6709_s11 }
  0xde   : > { %p6712_p7 = pnand %p6710_p5, %p7468_p8 }
  0xdf   : > { %p6717_p12 = por %p6716_p10, %p6715_p11 }
  0xe0   : > { %p6713_p9 = pneg %p6712_p7 }
  0xe2   : > { %p6718_p13 = pnand %p6717_p12, %p6713_p9 }
  0xe4   : > { %6721 = shalt.err (!%p6718_p13)
}
  0xe5   : > { %6353 = dma.hbm_to_vmem [thread:$0]  (!%p7456_p6), %s7510_s10, 16, %s1712_s22, [#allocation22]  }
  0xe6   : > { %s7112_s1 = smov [#allocation24]   ;;  %s1556_s26 = sshll.u32 %s8414_s3, 4  ;;  %s7532_s26 = int_to_ptr.hbm [resolvable:$true] %s1556_s26 }
  0xe7   : > { %s1735_s28 = sshll.u32 %s7112_s1, 4  ;;  %s6737_s16 = sshra.s32 %s7521_s15, 4  ;;  %s1736_s28 = int_to_ptr.vmem [resolvable:$true] %s1735_s28  ;;  %s6738_s16 = int_to_ptr.hbm [resolvable:$true] %s6737_s16 }
  0xe8   : > { %s6739_s2 = scalar_lea.hbm %s6738_s16, 1  ;;  %s6744_s11 = scalar_lea.hbm %s8400_s30, 1 }
  0xe9   : > { %p6740_p0 = scmp.ne.s32.totalorder %s6738_s16, %s6739_s2  ;;  %p6745_p7 = scmp.lt.s32.totalorder %s6738_s16, %s8400_s30 }
  0xea   : > { %p6746_p9 = scmp.lt.s32.totalorder %s6744_s11, %s6739_s2 }
  0xeb   : > { %p6742_p1 = pnand %p6740_p0, %p7468_p8 }
  0xec   : > { %p6747_p11 = por %p6746_p9, %p6745_p7 }
  0xed   : > { %p6743_p5 = pneg %p6742_p1 }
  0xef   : > { %p6748_p10 = pnand %p6747_p11, %p6743_p5 }
  0xf1   : > { %6751 = shalt.err (!%p6748_p10)
}
  0xf2   : > { %6359 = dma.hbm_to_vmem [thread:$0]  (!%p7456_p6), %s7521_s15, 16, %s1736_s28, [#allocation25]  }
  0xf3   : > { %s1583_s10 = sshll.u32 %s8403_s25, 4  ;;  %s7113_s22 = smov [#allocation4]   ;;  %s7543_s10 = int_to_ptr.hbm [resolvable:$true] %s1583_s10 }
  0xf4   : > { %s1558_s0 = sshll.u32 %s7113_s22, 4  ;;  %s6767_s1 = sshra.s32 %s7532_s26, 4  ;;  %s1559_s0 = int_to_ptr.vmem [resolvable:$true] %s1558_s0  ;;  %s6768_s1 = int_to_ptr.hbm [resolvable:$true] %s6767_s1 }
  0xf5   : > { %s6769_s16 = scalar_lea.hbm %s6768_s1, 1  ;;  %s6774_s2 = scalar_lea.hbm %s8414_s3, 1 }
  0xf6   : > { %p6770_p12 = scmp.ne.s32.totalorder %s6768_s1, %s6769_s16  ;;  %p6775_p1 = scmp.lt.s32.totalorder %s6768_s1, %s8414_s3 }
  0xf7   : > { %p6776_p5 = scmp.lt.s32.totalorder %s6774_s2, %s6769_s16 }
  0xf8   : > { %p6772_p13 = pnand %p6770_p12, %p7468_p8 }
  0xf9   : > { %p6777_p7 = por %p6776_p5, %p6775_p1 }
  0xfa   : > { %p6773_p0 = pneg %p6772_p13 }
  0xfc   : > { %p6778_p9 = pnand %p6777_p7, %p6773_p0 }
  0xfe   : > { %6781 = shalt.err (!%p6778_p9)
}
  0xff   : > { %6320 = dma.hbm_to_vmem [thread:$0]  (!%p7456_p6), %s7532_s26, 16, %s1559_s0, [#allocation5]  }
 0x100   : > { %s7114_s15 = smov [#allocation8]   ;;  %s1610_s11 = sshll.u32 %s8409_s9, 4  ;;  %s7554_s11 = int_to_ptr.hbm [resolvable:$true] %s1610_s11 }
 0x101   : > { %s1585_s28 = sshll.u32 %s7114_s15, 4  ;;  %s6797_s22 = sshra.s32 %s7543_s10, 4  ;;  %s1586_s28 = int_to_ptr.vmem [resolvable:$true] %s1585_s28  ;;  %s6798_s22 = int_to_ptr.hbm [resolvable:$true] %s6797_s22 }
 0x102   : > { %s6799_s1 = scalar_lea.hbm %s6798_s22, 1  ;;  %s6804_s16 = scalar_lea.hbm %s8403_s25, 1 }
 0x103   : > { %p6800_p11 = scmp.ne.s32.totalorder %s6798_s22, %s6799_s1  ;;  %p6805_p13 = scmp.lt.s32.totalorder %s6798_s22, %s8403_s25 }
 0x104   : > { %p6806_p0 = scmp.lt.s32.totalorder %s6804_s16, %s6799_s1 }
 0x105   : > { %p6802_p10 = pnand %p6800_p11, %p7468_p8 }
 0x106   : > { %p6807_p1 = por %p6806_p0, %p6805_p13 }
 0x107   : > { %p6803_p12 = pneg %p6802_p10 }
 0x109   : > { %p6808_p5 = pnand %p6807_p1, %p6803_p12 }
 0x10b   : > { %6811 = shalt.err (!%p6808_p5)
}
 0x10c   : > { %6326 = dma.hbm_to_vmem [thread:$0]  (!%p7456_p6), %s7543_s10, 16, %s1586_s28, [#allocation7]  }
 0x10d   : > { %s1637_s26 = sshll.u32 %s8404_s21, 4  ;;  %s7115_s0 = smov [#allocation11]   ;;  %s7565_s26 = int_to_ptr.hbm [resolvable:$true] %s1637_s26 }
 0x10e   : > { %s1612_s2 = sshll.u32 %s7115_s0, 4  ;;  %s6827_s15 = sshra.s32 %s7554_s11, 4  ;;  %s1613_s2 = int_to_ptr.vmem [resolvable:$true] %s1612_s2  ;;  %s6828_s15 = int_to_ptr.hbm [resolvable:$true] %s6827_s15 }
 0x10f   : > { %s6829_s22 = scalar_lea.hbm %s6828_s15, 1  ;;  %s6834_s1 = scalar_lea.hbm %s8409_s9, 1 }
 0x110   : > { %p6830_p7 = scmp.ne.s32.totalorder %s6828_s15, %s6829_s22  ;;  %p6835_p10 = scmp.lt.s32.totalorder %s6828_s15, %s8409_s9 }
 0x111   : > { %p6836_p12 = scmp.lt.s32.totalorder %s6834_s1, %s6829_s22 }
 0x112   : > { %p6832_p9 = pnand %p6830_p7, %p7468_p8 }
 0x113   : > { %p6837_p13 = por %p6836_p12, %p6835_p10 }
 0x114   : > { %p6833_p11 = pneg %p6832_p9 }
 0x116   : > { %p6838_p0 = pnand %p6837_p13, %p6833_p11 }
 0x118   : > { %6841 = shalt.err (!%p6838_p0)
}
 0x119   : > { %6332 = dma.hbm_to_vmem [thread:$0]  (!%p7456_p6), %s7554_s11, 16, %s1613_s2, [#allocation10]  }
 0x11a   : > { %s7116_s10 = smov [#allocation14]   ;;  %s1667_s16 = sshll.u32 %s8402_s27, 4  ;;  %s7576_s16 = int_to_ptr.hbm [resolvable:$true] %s1667_s16 }
 0x11b   : > { %s1639_s28 = sshll.u32 %s7116_s10, 4  ;;  %s6857_s0 = sshra.s32 %s7565_s26, 4  ;;  %s1640_s28 = int_to_ptr.vmem [resolvable:$true] %s1639_s28  ;;  %s6858_s0 = int_to_ptr.hbm [resolvable:$true] %s6857_s0 }
 0x11c   : > { %s6859_s15 = scalar_lea.hbm %s6858_s0, 1  ;;  %s6864_s22 = scalar_lea.hbm %s8404_s21, 1 }
 0x11d   : > { %p6860_p1 = scmp.ne.s32.totalorder %s6858_s0, %s6859_s15  ;;  %p6865_p9 = scmp.lt.s32.totalorder %s6858_s0, %s8404_s21 }
 0x11e   : > { %p6866_p11 = scmp.lt.s32.totalorder %s6864_s22, %s6859_s15 }
 0x11f   : > { %p6862_p5 = pnand %p6860_p1, %p7468_p8 }
 0x120   : > { %p6867_p10 = por %p6866_p11, %p6865_p9 }
 0x121   : > { %p6863_p7 = pneg %p6862_p5 }
 0x123   : > { %p6868_p12 = pnand %p6867_p10, %p6863_p7 }
 0x125   : > { %6871 = shalt.err (!%p6868_p12)
}
 0x126   : > { %6338 = dma.hbm_to_vmem [thread:$0]  (!%p7456_p6), %s7565_s26, 16, %s1640_s28, [#allocation13]  }
 0x127   : > { %s1694_s11 = sshll.u32 %s8405_s20, 4  ;;  %s7117_s2 = smov [#allocation17]   ;;  %s7587_s11 = int_to_ptr.hbm [resolvable:$true] %s1694_s11 }
 0x128   : > { %s1669_s1 = sshll.u32 %s7117_s2, 4  ;;  %s6887_s10 = sshra.s32 %s7576_s16, 4  ;;  %s1670_s1 = int_to_ptr.vmem [resolvable:$true] %s1669_s1  ;;  %s6888_s10 = int_to_ptr.hbm [resolvable:$true] %s6887_s10 }
 0x129   : > { %s6889_s0 = scalar_lea.hbm %s6888_s10, 1  ;;  %s6894_s15 = scalar_lea.hbm %s8402_s27, 1 }
 0x12a   : > { %p6890_p13 = scmp.ne.s32.totalorder %s6888_s10, %s6889_s0  ;;  %p6895_p5 = scmp.lt.s32.totalorder %s6888_s10, %s8402_s27 }
 0x12b   : > { %p6896_p7 = scmp.lt.s32.totalorder %s6894_s15, %s6889_s0 }
 0x12c   : > { %p6892_p0 = pnand %p6890_p13, %p7468_p8 }
 0x12d   : > { %p6897_p9 = por %p6896_p7, %p6895_p5 }
 0x12e   : > { %p6893_p1 = pneg %p6892_p0 }
 0x130   : > { %p6898_p11 = pnand %p6897_p9, %p6893_p1 }
 0x132   : > { %6901 = shalt.err (!%p6898_p11)
}
 0x133   : > { %6344 = dma.hbm_to_vmem [thread:$0]  (!%p7456_p6), %s7576_s16, 16, %s1670_s1, [#allocation16]  }
 0x134   : > { %s7118_s26 = smov [#allocation20]   ;;  %s1721_s22 = sshll.u32 %s8413_s4, 4  ;;  %s7598_s22 = int_to_ptr.hbm [resolvable:$true] %s1721_s22 }
 0x135   : > { %s1696_s28 = sshll.u32 %s7118_s26, 4  ;;  %s6917_s2 = sshra.s32 %s7587_s11, 4  ;;  %s1697_s28 = int_to_ptr.vmem [resolvable:$true] %s1696_s28  ;;  %s6918_s2 = int_to_ptr.hbm [resolvable:$true] %s6917_s2 }
 0x136   : > { %s6919_s10 = scalar_lea.hbm %s6918_s2, 1  ;;  %s6924_s0 = scalar_lea.hbm %s8405_s20, 1 }
 0x137   : > { %p6920_p10 = scmp.ne.s32.totalorder %s6918_s2, %s6919_s10  ;;  %p6925_p0 = scmp.lt.s32.totalorder %s6918_s2, %s8405_s20 }
 0x138   : > { %p6926_p1 = scmp.lt.s32.totalorder %s6924_s0, %s6919_s10 }
 0x139   : > { %p6922_p12 = pnand %p6920_p10, %p7468_p8 }
 0x13a   : > { %p6927_p5 = por %p6926_p1, %p6925_p0 }
 0x13b   : > { %p6923_p13 = pneg %p6922_p12 }
 0x13d   : > { %p6928_p7 = pnand %p6927_p5, %p6923_p13 }
 0x13f   : > { %6931 = shalt.err (!%p6928_p7)
}
 0x140   : > { %6350 = dma.hbm_to_vmem [thread:$0]  (!%p7456_p6), %s7587_s11, 16, %s1697_s28, [#allocation19]  }
 0x141   : > { %s1745_s16 = sshll.u32 %s8408_s12, 4  ;;  %s7119_s1 = smov [#allocation23]   ;;  %s7609_s16 = int_to_ptr.hbm [resolvable:$true] %s1745_s16 }
 0x142   : > { %s1723_s15 = sshll.u32 %s7119_s1, 4  ;;  %s6947_s26 = sshra.s32 %s7598_s22, 4  ;;  %s1724_s15 = int_to_ptr.vmem [resolvable:$true] %s1723_s15  ;;  %s6948_s26 = int_to_ptr.hbm [resolvable:$true] %s6947_s26 }
 0x143   : > { %s6949_s2 = scalar_lea.hbm %s6948_s26, 1  ;;  %s6954_s10 = scalar_lea.hbm %s8413_s4, 1 }
 0x144   : > { %p6950_p9 = scmp.ne.s32.totalorder %s6948_s26, %s6949_s2  ;;  %p6955_p12 = scmp.lt.s32.totalorder %s6948_s26, %s8413_s4 }
 0x145   : > { %p6956_p13 = scmp.lt.s32.totalorder %s6954_s10, %s6949_s2 }
 0x146   : > { %p6952_p11 = pnand %p6950_p9, %p7468_p8 }
 0x147   : > { %p6957_p0 = por %p6956_p13, %p6955_p12 }
 0x148   : > { %p6953_p10 = pneg %p6952_p11 }
 0x14a   : > { %p6958_p1 = pnand %p6957_p0, %p6953_p10 }
 0x14c   : > { %6961 = shalt.err (!%p6958_p1)
}
 0x14d   : > { %6356 = dma.hbm_to_vmem [thread:$0]  (!%p7456_p6), %s7598_s22, 16, %s1724_s15, [#allocation22]  }
 0x14e   : > { %s7120_s11 = smov [#allocation26]   ;;  %s6977_s0 = sshra.s32 %s7609_s16, 4  ;;  %s6978_s0 = int_to_ptr.hbm [resolvable:$true] %s6977_s0 }
 0x14f   : > { %s1747_s28 = sshll.u32 %s7120_s11, 4  ;;  %s6979_s1 = scalar_lea.hbm %s6978_s0, 1  ;;  %s1748_s28 = int_to_ptr.vmem [resolvable:$true] %s1747_s28 }
 0x150   : > { %p6980_p5 = scmp.ne.s32.totalorder %s6978_s0, %s6979_s1  ;;  %s6984_s26 = scalar_lea.hbm %s8408_s12, 1 }
 0x151   : > { %p6985_p11 = scmp.lt.s32.totalorder %s6978_s0, %s8408_s12  ;;  %p6986_p10 = scmp.lt.s32.totalorder %s6984_s26, %s6979_s1 }
 0x152   : > { %p6982_p7 = pnand %p6980_p5, %p7468_p8 }
 0x153   : > { %p6987_p12 = por %p6986_p10, %p6985_p11 }
 0x154   : > { %p6983_p9 = pneg %p6982_p7 }
 0x156   : > { %p6988_p13 = pnand %p6987_p12, %p6983_p9 }
 0x158   : > { %6991 = shalt.err (!%p6988_p13)
}
 0x159   : > { %6362 = dma.hbm_to_vmem [thread:$0]  (!%p7456_p6), %s7609_s16, 16, %s1748_s28, [#allocation25]  }
 0x15a   : > { %1872 = sbr.rel (%p7444_p4) target bundleno = 5044 (0x13b4), region = 256 }
 0x15f   : > { %7012 = dma.done.wait (%p6363_p3), [#allocation5], 16  }
 0x160   : > { %7014 = vsyncadd (%p6363_p3), [#allocation5], 4294967280 }
 0x161   : > { %7016 = dma.done.wait (%p6363_p3), [#allocation7], 32  }
 0x162   : > { %7018 = vsyncadd (%p6363_p3), [#allocation7], 4294967264 }
 0x163   : > { %7020 = dma.done.wait (%p6363_p3), [#allocation10], 32  }
 0x164   : > { %7022 = vsyncadd (%p6363_p3), [#allocation10], 4294967264 }
 0x165   : > { %7024 = dma.done.wait (%p6363_p3), [#allocation13], 32  }
 0x166   : > { %7026 = vsyncadd (%p6363_p3), [#allocation13], 4294967264 }
 0x167   : > { %7028 = dma.done.wait (%p6363_p3), [#allocation16], 32  }
 0x168   : > { %7030 = vsyncadd (%p6363_p3), [#allocation16], 4294967264 }
 0x169   : > { %7032 = dma.done.wait (%p6363_p3), [#allocation19], 32  }
 0x16a   : > { %7034 = vsyncadd (%p6363_p3), [#allocation19], 4294967264 }
 0x16b   : > { %7036 = dma.done.wait (%p6363_p3), [#allocation22], 32  }
 0x16c   : > { %7038 = vsyncadd (%p6363_p3), [#allocation22], 4294967264 }
 0x16d   : > { %7040 = dma.done.wait (%p6363_p3), [#allocation25], 32  }
 0x16e   : > { %7042 = vsyncadd (%p6363_p3), [#allocation25], 4294967264  ;;  %s8420_s23 = sld [smem:[#allocation44_spill]]  ;;  %p2130_p4 = scmp.lt.s32.totalorder %s7438_s24, 5 }
 0x16f   : > { %s8421_s7 = sld [smem:[#allocation46_spill]] }
 0x170   : > { %s8422_s18 = sld [smem:[#allocation47_spill]] }
 0x171   : > { %s8423_s22 = sld [smem:[#allocation48_spill]] }
 0x172   : > { %s8424_s16 = sld [smem:[#allocation49_spill]] }
 0x173   : > { %s8425_s15 = sld [smem:[#allocation50_spill]] }
 0x174   : > { %s8426_s2 = sld [smem:[#allocation51_spill]] }
 0x175   : > { %s8427_s10 = sld [smem:[#allocation52_spill]] }
 0x176   : > { %s8428_s11 = sld [smem:[#allocation53_spill]] }
 0x177   : > { %s8429_s28 = sld [smem:[#allocation54_spill]] }
 0x178   : > { %s7663_s0 = scalar_select %p2130_p4, %s7438_s24, 5 }
 0x179   : > { %s8430_s1 = sld [smem:[#allocation55_spill]] }
 0x17a   : > { %s5536_s26 = sshll.u32 %s7663_s0, 5  ;;  %s8431_s3 = sld [smem:[#allocation56_spill]] }
 0x17b   : > { %s8432_s5 = sld [smem:[#allocation57_spill]]  ;;  %s7669_s6 = scalar_lea.vmem %s8420_s23, %s5536_s26 }
 0x17c   : > { %8433 = sst [smem:[#allocation95_spill]] %s7669_s6  ;;  %s7672_s9 = scalar_lea.vmem %s8421_s7, %s5536_s26 }
 0x17d   : > { %s8434_s8 = sld [smem:[#allocation58_spill]]  ;;  %s2145_s13 = scalar_lea.vmem %s8422_s18, %s7663_s0 }
 0x17e   : > { %8435 = sst [smem:[#allocation96_spill]] %s7672_s9  ;;  %s7677_s17 = scalar_lea.vmem %s8423_s22, %s5536_s26 }
 0x17f   : > { %s8436_s12 = sld [smem:[#allocation59_spill]]  ;;  %s2153_s20 = scalar_lea.vmem %s8424_s16, %s7663_s0 }
 0x180   : > { %s7682_s21 = scalar_lea.vmem %s8425_s15, %s5536_s26  ;;  %s2161_s25 = scalar_lea.vmem %s8426_s2, %s7663_s0 }
 0x181   : > { %s5540_s27 = sshll.u32 %s7663_s0, 9  ;;  %s5455_s4 = sshll.u32 %s7663_s0, 4 }
 0x182   : > { %s7688_s29 = scalar_lea.vmem %s8427_s10, %s5540_s27  ;;  %s7692_s30 = scalar_lea.vmem %s8428_s11, %s5455_s4 }
 0x183   : > { %s5541_s23 = sshll.u32 %s7663_s0, 10  ;;  %s2178_s7 = scalar_lea.vmem %s8430_s1, %s7663_s0 }
 0x184   : > { %s7696_s14 = scalar_lea.vmem %s8429_s28, %s5541_s23  ;;  %s2181_s19 = scalar_lea.vmem %s8431_s3, %s7663_s0 }
 0x185   : > { %s2184_s6 = scalar_lea.vmem %s8432_s5, %s7663_s0  ;;  %s2187_s9 = scalar_lea.vmem %s8434_s8, %s7663_s0 }
 0x186   : > { %s2190_s18 = scalar_lea.vmem %s8436_s12, %s7663_s0  ;;  %2194 = sbr.rel (%p5413_p2) target bundleno = 617 (0x269), region = 320 }
 0x187   : > { %s8437_s22 = sld [smem:[#allocation36_spill]] (!%p5413_p2)  ;;  %s7122_s5 = smov (!%p5413_p2), 32  }
 0x188   : > { %s8439_s15 = sld [smem:[#allocation35_spill]] (!%p5413_p2) }
 0x189   : > { %s8440_s27 = sld [smem:[#allocation42_spill]] (!%p5413_p2) }
 0x18a   : > { %s8441_s2 = sld [smem:[#allocation40_spill]] (!%p5413_p2) }
 0x18b   : > { %s8442_s10 = sld [smem:[#allocation43_spill]]  ;;  %v7121_v3 = vmov 0   ;;  %vm2219_vm0 = vcmask 261120   ;;  %vm2254_vm1 = vcmask 523520  }
 0x18c   : > { %s8443_s4 = sld [smem:[#allocation41_spill]]  ;;  %6480 = vset.pattern.permute.xlu0 %v7121_v3  ;;  %6481 = vset.pattern.permute.xlu1 %v7121_v3 }
 0x18d   : > { %s8438_s16 = smov %s8437_s22  ;;  %v2222_v1 = vld [vmem:[%s8437_s22] sm:$0xff] }
 0x18e   : > { %v2195_v2 = vld [vmem:[%s8439_s15] sm:$0xff]  ;;  %2227 = vperm.xlu0 %6480, %v2222_v1   ;;  %v2223_v4 = vld [vmem:[%s8438_s16 + $0x8] sm:$0xff] }
 0x18f   : > { %2200 = vperm.xlu1 %6481, %v2195_v2   ;;  %v2196_v5 = vld [vmem:[%s8439_s15 + $0x8] sm:$0xff]  ;;  %v6482_v6 = vld [vmem:[%s8440_s27] ss:$0 sm:$0xff] }
 0x190   : > { %v6484_v7 = vld [vmem:[%s8441_s2] ss:$0 sm:$0xff] }
 0x191   : > { %v6483_v8 = vld [vmem:[%s8442_s10] ss:$0 sm:$0xff] }
 0x192   : > { %v6485_v9 = vld [vmem:[%s8443_s4] ss:$0 sm:$0xff] }
 0x196   : > { %2232 = vperm.xlu0 %6480, %v2223_v4  }
 0x197   : > { %2205 = vperm.xlu1 %6481, %v2196_v5  }
 0x200   : > { %v2228_v10 = vpop.permute.xlu0 %2227 }
 0x201   : > { %v2201_v11 = vpop.permute.xlu1 %2200  ;;  %v2238_v12 = vmul.f32 %v6482_v6, %v2228_v10 }
 0x202   : > { %v2211_v13 = vmul.f32 %v6484_v7, %v2201_v11 }
 0x203   : > { %v2244_v14 = vadd.f32 %v6483_v8, %v2238_v12 }
 0x204   : > { %v2217_v15 = vadd.f32 %v6485_v9, %v2211_v13 }
 0x205   : > { %2248 = vrot.lane.b32.xlu2 %v2244_v14, %s7122_s5 }
 0x206   : > { %2220 = vst.msk [vmem:[#allocation2] sm:$0xff] %vm2219_vm0, %v2217_v15 }
 0x208   : > { %v2233_v16 = vpop.permute.xlu0 %2232 }
 0x209   : > { %v2206_v17 = vpop.permute.xlu1 %2205  ;;  %v2239_v18 = vmul.f32 %v6482_v6, %v2233_v16 }
 0x20a   : > { %v2212_v19 = vmul.f32 %v6484_v7, %v2206_v17 }
 0x20b   : > { %v2245_v20 = vadd.f32 %v6483_v8, %v2239_v18 }
 0x20c   : > { %v2218_v21 = vadd.f32 %v6485_v9, %v2212_v19 }
 0x20d   : > { %2250 = vrot.lane.b32.xlu2 %v2245_v20, %s7122_s5 }
 0x20e   : > { %2221 = vst.msk [vmem:[#allocation2 + $0x8] sm:$0xff] %vm2219_vm0, %v2218_v21 }
 0x25f   : > { %v2249_v22 = vpop.permute.xlu2 %2248 }
 0x260   : > { %2255 = vst.msk [vmem:[#allocation2] sm:$0xff] %vm2254_vm1, %v2249_v22 }
 0x267   : > { %v2251_v23 = vpop.permute.xlu2 %2250 }
 0x268   : > { %2256 = vst.msk [vmem:[#allocation2 + $0x8] sm:$0xff] %vm2254_vm1, %v2251_v23 }
 0x269 PF: > { %s8444_s3 = sld [smem:[#allocation96_spill]]  ;;  %v7726_v47 = vld [vmem:[#allocation2] sm:$0xff]  ;;  %vm2279_vm2 = vcmask 523264   ;;  %v6126_v60 = vld [vmem:[%s7677_s17 + $0x18] sm:$0xff]   ;;  %v6125_v61 = vld [vmem:[%s7677_s17 + $0x10] sm:$0xff]   ;;  %vm2432_vm3 = vcmask 130048  }
 0x26a   : > { %s8445_s8 = sld [smem:[#allocation95_spill]]  ;;  %v6486_v51 = vld [vmem:[%s2145_s13] ss:$0 sm:$0xff]  ;;  %v5589_v62 = vunpack.c.h.bf16 %v6126_v60  ;;  %v5588_v63 = vunpack.c.l.bf16 %v6126_v60  ;;  %v5585_v0 = vunpack.c.h.bf16 %v6125_v61  ;;  %v6124_v1 = vld [vmem:[%s7677_s17 + $0x8] sm:$0xff]   ;;  %v5584_v2 = vunpack.c.l.bf16 %v6125_v61  ;;  %p5505_p2 = scmp.ne.s32.totalorder %s7438_s24, 5 }
 0x26b   : > { %s8447_s11 = sld [smem:[#allocation45_spill]]  ;;  %v5581_v3 = vunpack.c.h.bf16 %v6124_v1  ;;  %v5575_v4 = vld [vmem:[%s7677_s17] sm:$0xff]   ;;  %v5580_v5 = vunpack.c.l.bf16 %v6124_v1 }
 0x26c   : > { %2380 = vmatpush.msra.mxu2 %v5589_v62  ;;  %s8449_s13 = sld [smem:[#allocation38_spill]]  ;;  %v5577_v6 = vunpack.c.h.bf16 %v5575_v4  ;;  %v5576_v7 = vunpack.c.l.bf16 %v5575_v4  ;;  %v7123_v62 = vmov 64.0  }
 0x26d   : > { %s8460_s24 = sld [smem:[#allocation64_spill]] (!%p5505_p2) }
 0x26e   : > { %2381 = vmatpush.msra.mxu2 %v5588_v63  ;;  %s8462_s1 = sld [smem:[#allocation65_spill]] (!%p5505_p2) }
 0x26f   : > { %v6123_v24 = vld [vmem:[%s8444_s3 + $0x18] sm:$0xff]   ;;  %v6122_v25 = vld [vmem:[%s8444_s3 + $0x10] sm:$0xff]   ;;  %v6121_v31 = vld [vmem:[%s8444_s3 + $0x8] sm:$0xff]   ;;  %s8463_s26 = sld [smem:[#allocation39_spill]] (!%p5505_p2) }
 0x270   : > { %v5573_v26 = vunpack.c.h.bf16 %v6123_v24  ;;  %v5572_v27 = vunpack.c.l.bf16 %v6123_v24  ;;  %v6120_v28 = vld [vmem:[%s8445_s8 + $0x18] sm:$0xff]   ;;  %v6119_v29 = vld [vmem:[%s8445_s8 + $0x10] sm:$0xff]   ;;  %v5569_v30 = vunpack.c.h.bf16 %v6122_v25  ;;  %v5568_v34 = vunpack.c.l.bf16 %v6122_v25  ;;  %v6118_v36 = vld [vmem:[%s8445_s8 + $0x8] sm:$0xff]   ;;  %2382 = vmatpush.msra.mxu2 %v5585_v0  ;;  %s8464_s23 = sld [smem:[#allocation37_spill]] (!%p5505_p2) }
 0x271   : > { %v5557_v32 = vunpack.c.h.bf16 %v6120_v28  ;;  %v5556_v33 = vunpack.c.l.bf16 %v6120_v28  ;;  %v5553_v35 = vunpack.c.h.bf16 %v6119_v29  ;;  %v5565_v37 = vunpack.c.h.bf16 %v6121_v31  ;;  %v5559_v39 = vld [vmem:[%s8444_s3] sm:$0xff]   ;;  %v7732_v49 = vld [vmem:[#allocation2 + $0x8] sm:$0xff]  ;;  %s8448_s28 = scalar_lea.vmem %s8447_s11, %s7663_s0  ;;  %s8461_s0 = sld [smem:[#allocation62_spill]] (!%p5505_p2) }
 0x272   : > { %2337 = vmatpush.msra.mxu1 %v5573_v26  ;;  %v5552_v38 = vunpack.c.l.bf16 %v6119_v29  ;;  %v5564_v40 = vunpack.c.l.bf16 %v6121_v31  ;;  %v5549_v41 = vunpack.c.h.bf16 %v6118_v36  ;;  %v5543_v42 = vld [vmem:[%s8445_s8] sm:$0xff]   ;;  %v5561_v43 = vunpack.c.h.bf16 %v5559_v39  ;;  %2383 = vmatpush.msra.mxu2 %v5584_v2  ;;  %v2396_v12 = vld [vmem:[%s8449_s13 + $0x8] sm:$0xff]  ;;  %v6129_v31 = vld [vmem:[%s7682_s21 + $0x18] sm:$0xff]   ;;  %s8467_s22 = sld [smem:[#allocation67_spill]] (!%p5505_p2) }
 0x273   : > { %2294 = vmatpush.msra.mxu0 %v5557_v32  ;;  %v5548_v44 = vunpack.c.l.bf16 %v6118_v36  ;;  %v5560_v45 = vunpack.c.l.bf16 %v5559_v39  ;;  %v5545_v46 = vunpack.c.h.bf16 %v5543_v42  ;;  %v5544_v48 = vunpack.c.l.bf16 %v5543_v42  ;;  %v6487_v55 = vld [vmem:[%s8448_s28] ss:$0 sm:$0xff]  ;;  %v6128_v32 = vld [vmem:[%s7682_s21 + $0x10] sm:$0xff]   ;;  %v6127_v36 = vld [vmem:[%s7682_s21 + $0x8] sm:$0xff]   ;;  %s8469_s2 = sld [smem:[#allocation42_spill]] (!%p5505_p2) }
 0x274   : > { %2338 = vmatpush.msra.mxu1 %v5572_v27  ;;  %2384 = vmatpush.msra.mxu2 %v5581_v3  ;;  %v2395_v8 = vld [vmem:[%s8449_s13] sm:$0xff]  ;;  %s8470_s10 = sld [smem:[#allocation43_spill]] (!%p5505_p2) }
 0x275   : > { %2295 = vmatpush.msra.mxu0 %v5556_v33  ;;  %v6488_v25 = vld [vmem:[%s2153_s20] ss:$0 sm:$0xff]  ;;  %v5605_v33 = vunpack.c.h.bf16 %v6129_v31  ;;  %s8471_s4 = sld [smem:[#allocation81_spill]] (!%p5505_p2) }
 0x276   : > { %2339 = vmatpush.msra.mxu1 %v5569_v30  ;;  %2385 = vmatpush.msra.mxu2 %v5580_v5  ;;  %v5591_v39 = vld [vmem:[%s7682_s21] sm:$0xff]   ;;  %s8472_s5 = sld [smem:[#allocation70_spill]] (!%p5505_p2) }
 0x277   : > { %2296 = vmatpush.msra.mxu0 %v5553_v35  ;;  %v5601_v35 = vunpack.c.h.bf16 %v6128_v32  ;;  %s8473_s3 = sld [smem:[#allocation68_spill]] (!%p5505_p2) }
 0x278   : > { %2340 = vmatpush.msra.mxu1 %v5568_v34  ;;  %2386 = vmatpush.msra.mxu2 %v5577_v6  ;;  %v5604_v34 = vunpack.c.l.bf16 %v6129_v31  ;;  %v2630_v31 = vld [vmem:[%s7688_s29 + $0x100] sm:$0xff]  ;;  %s8468_s27 = smov (!%p5505_p2), %s8467_s22  ;;  %s8474_s8 = sld [smem:[#allocation73_spill]] (!%p5505_p2) }
 0x279   : > { %2297 = vmatpush.msra.mxu0 %v5552_v38  ;;  %v5597_v38 = vunpack.c.h.bf16 %v6127_v36  ;;  %s8475_s12 = sld [smem:[#allocation75_spill]] (!%p5505_p2) }
 0x27a   : > { %2341 = vmatpush.msra.mxu1 %v5565_v37  ;;  %2387 = vmatpush.msra.mxu2 %v5576_v7  ;;  %v5600_v37 = vunpack.c.l.bf16 %v6128_v32  ;;  %v2631_v32 = vld [vmem:[%s7688_s29 + $0x108] sm:$0xff]  ;;  %s8476_s11 = sld [smem:[#allocation79_spill]] (!%p5505_p2) }
 0x27b   : > { %2298 = vmatpush.msra.mxu0 %v5549_v41  ;;  %5463 = vmatmul.msk.f32.vlgmr.msra.gmra.mxu2 %vm2279_vm2, %v7726_v47  ;;  %v5593_v41 = vunpack.c.h.bf16 %v5591_v39  ;;  %s8477_s28 = sld [smem:[#allocation82_spill]] (!%p5505_p2) }
 0x27c   : > { %2342 = vmatpush.msra.mxu1 %v5564_v40  ;;  %v5596_v40 = vunpack.c.l.bf16 %v6127_v36  ;;  %v2729_v36 = vunpack.c.h.bf16 %v2631_v32  ;;  %s8478_s17 = sld [smem:[#allocation86_spill]] (!%p5505_p2) }
 0x27d   : > { %2299 = vmatpush.msra.mxu0 %v5548_v44  ;;  %s8479_s20 = sld [smem:[#allocation88_spill]] (!%p5505_p2) }
 0x27e   : > { %2343 = vmatpush.msra.mxu1 %v5561_v43  ;;  %s8480_s21 = sld [smem:[#allocation93_spill]] (!%p5505_p2) }
 0x27f   : > { %2300 = vmatpush.msra.mxu0 %v5545_v46 }
 0x280   : > { %2344 = vmatpush.msra.mxu1 %v5560_v45 }
 0x281   : > { %5461 = vmatmul.msk.f32.vlgmr.msra.gmra.mxu1 %vm2279_vm2, %v7726_v47  ;;  %2301 = vmatpush.msra.mxu0 %v5544_v48 }
 0x282   : > { %5459 = vmatmul.msk.f32.vlgmr.msra.gmra.mxu0 %vm2279_vm2, %v7726_v47 }
 0x283   : > { %5464 = vmatmul.msk.f32.gmra.mxu2 %vm2279_vm2, %v7732_v49  ;;  %2518 = vmatpush.msrb.mxu0 %v5605_v33  ;;  %v2726_v33 = vunpack.c.l.bf16 %v2630_v31 }
 0x285   : > { %2519 = vmatpush.msrb.mxu0 %v5604_v34  ;;  %v2727_v34 = vunpack.c.h.bf16 %v2630_v31 }
 0x287   : > { %2520 = vmatpush.msrb.mxu0 %v5601_v35  ;;  %v2728_v35 = vunpack.c.l.bf16 %v2631_v32 }
 0x289   : > { %5462 = vmatmul.msk.f32.gmra.mxu1 %vm2279_vm2, %v7732_v49  ;;  %2521 = vmatpush.msrb.mxu0 %v5600_v37  ;;  %v2622_v37 = vld [vmem:[%s7688_s29 + $0xc0] sm:$0xff] }
 0x28a   : > { %5460 = vmatmul.msk.f32.gmra.mxu0 %vm2279_vm2, %v7732_v49 }
 0x28b   : > { %2522 = vmatpush.msrb.mxu0 %v5597_v38  ;;  %v2623_v38 = vld [vmem:[%s7688_s29 + $0xc8] sm:$0xff] }
 0x28d   : > { %2523 = vmatpush.msrb.mxu0 %v5596_v40  ;;  %v2711_v40 = vunpack.c.h.bf16 %v2622_v37 }
 0x28f   : > { %2524 = vmatpush.msrb.mxu0 %v5593_v41  ;;  %v2712_v41 = vunpack.c.l.bf16 %v2623_v38 }
 0x2fe   : > { %v2346_v50 = vpop.f32.mrf.mxu1  ;;  %v2389_v21 = vpop.f32.mrf.mxu2 }
 0x2ff   : > { %v2303_v54 = vpop.f32.mrf.mxu0  ;;  %v2347_v56 = vadd.f32 %v6486_v51, %v2346_v50  ;;  %v2390_v28 = vadd.f32 %v6488_v25, %v2389_v21  ;;  %v5592_v50 = vunpack.c.l.bf16 %v5591_v39  ;;  %v2710_v39 = vunpack.c.l.bf16 %v2622_v37 }
 0x300   : > { %v2304_v57 = vadd.f32 %v6487_v55, %v2303_v54 }
 0x301   : > { %2525 = vmatpush.msrb.mxu0 %v5592_v50 }
 0x306   : > { %v2349_v52 = vpop.f32.mrf.mxu1  ;;  %v2392_v26 = vpop.f32.mrf.mxu2 }
 0x307   : > { %v2350_v53 = vadd.f32 %v6486_v51, %v2349_v52  ;;  %v2306_v58 = vpop.f32.mrf.mxu0  ;;  %v2393_v29 = vadd.f32 %v6488_v25, %v2392_v26  ;;  %v2638_v25 = vld [vmem:[%s7688_s29 + $0x140] sm:$0xff]  ;;  %v2639_v26 = vld [vmem:[%s7688_s29 + $0x148] sm:$0xff] }
 0x308   : > { %v2307_v59 = vadd.f32 %v6487_v55, %v2306_v58 }
 0x309   : > { %5465 = vmatpush.xpose.msk.msra.mxu3 %vm2279_vm2, %v2350_v53  ;;  %v6489_v53 = vld [vmem:[%s2161_s25] ss:$0 sm:$0xff] }
 0x30d   : > { %5466 = vmatpush.xpose.msk.msra.mxu3 %vm2279_vm2, %v2347_v56 }
 0x310   : > { %5467 = vmatmul.msk.f32.vlgmr.msra.gmra.mxu3 %vm2279_vm2, %v2304_v57 }
 0x311   : > { %2475 = vmatpush.msrb.mxu3 %v2393_v29  ;;  %v2744_v29 = vunpack.c.l.bf16 %v2639_v26 }
 0x313   : > { %2476 = vmatpush.msrb.mxu3 %v2390_v28  ;;  %v2743_v28 = vunpack.c.h.bf16 %v2638_v25 }
 0x318   : > { %5468 = vmatmul.msk.f32.gmra.mxu3 %vm2279_vm2, %v2307_v59 }
 0x393   : > { %v2426_v9 = vpop.f32.mrf.mxu3 }
 0x394   : > { %v2427_v10 = vadd.f32 %v2426_v9, %v2395_v8 }
 0x396   : > { %v2433_v11 = vsel %vm2432_vm3, %v2427_v10, -inf }
 0x397   : > { %2434 = vmax.xlane.f32.xlu0 %v2433_v11 }
 0x39b   : > { %v2429_v13 = vpop.f32.mrf.mxu3 }
 0x39c   : > { %v2430_v14 = vadd.f32 %v2429_v13, %v2396_v12  ;;  %v2654_v13 = vld [vmem:[%s7688_s29 + $0x1c0] sm:$0xff] }
 0x39e   : > { %v2436_v15 = vsel %vm2432_vm3, %v2430_v14, -inf }
 0x39f   : > { %2437 = vmax.xlane.f32.xlu0 %v2436_v15  ;;  %v2774_v15 = vunpack.c.l.bf16 %v2654_v13 }
 0x3a1   : > { %2840 = vmatpush.msrb.mxu1 %v2774_v15 }
 0x40a   : > { %v2435_v16 = vpop.xlane.xlu0 %2434 }
 0x40b   : > { %v2439_v17 = vsub.f32 %v2427_v10, %v2435_v16  ;;  %v2775_v16 = vunpack.c.h.bf16 %v2654_v13  ;;  %v2640_v13 = vld [vmem:[%s7688_s29 + $0x150] sm:$0xff] }
 0x40d   : > { %v2441_v18 = vmul.f32 1.442695, %v2439_v17  ;;  %2863 = vmatpush.msrb.mxu2 %v2775_v16  ;;  %v2746_v16 = vunpack.c.l.bf16 %v2640_v13 }
 0x40f   : > { %6495 = vpow2.f32 %v2441_v18 }
 0x412   : > { %v2438_v19 = vpop.xlane.xlu0 %2437 }
 0x413   : > { %v2440_v20 = vsub.f32 %v2430_v14, %v2438_v19  ;;  %v2655_v14 = vld [vmem:[%s7688_s29 + $0x1c8] sm:$0xff]  ;;  %v2646_v19 = vld [vmem:[%s7688_s29 + $0x180] sm:$0xff] }
 0x414   : > { %v2776_v17 = vunpack.c.l.bf16 %v2655_v14  ;;  %v2777_v18 = vunpack.c.h.bf16 %v2655_v14  ;;  %v2758_v21 = vunpack.c.l.bf16 %v2646_v19  ;;  %v2641_v14 = vld [vmem:[%s7688_s29 + $0x158] sm:$0xff] }
 0x415   : > { %v6496_v22 = vpop.eup %6495  ;;  %v2443_v23 = vmul.f32 1.442695, %v2440_v20  ;;  %v2647_v20 = vld [vmem:[%s7688_s29 + $0x188] sm:$0xff] }
 0x416   : > { %v2445_v24 = vsel %vm2432_vm3, %v6496_v22, 0.0  ;;  %2886 = vmatpush.msra.mxu3 %v2776_v17  ;;  %2909 = vmatpush.msra.mxu0 %v2777_v18  ;;  %v2747_v17 = vunpack.c.h.bf16 %v2640_v13  ;;  %v2748_v18 = vunpack.c.l.bf16 %v2641_v14 }
 0x417   : > { %6497 = vpow2.f32 %v2443_v23  ;;  %2446 = vadd.xlane.f32.xlu1 %v2445_v24  ;;  %v2760_v23 = vunpack.c.l.bf16 %v2647_v20  ;;  %v2761_v24 = vunpack.c.h.bf16 %v2647_v20  ;;  %2841 = vmatpush.msrb.mxu1 %v2758_v21  ;;  %v2632_v20 = vld [vmem:[%s7688_s29 + $0x110] sm:$0xff]  ;;  %v2633_v21 = vld [vmem:[%s7688_s29 + $0x118] sm:$0xff] }
 0x419   : > { %2887 = vmatpush.msra.mxu3 %v2760_v23  ;;  %2910 = vmatpush.msra.mxu0 %v2761_v24  ;;  %v2730_v23 = vunpack.c.l.bf16 %v2632_v20  ;;  %v2731_v24 = vunpack.c.h.bf16 %v2632_v20 }
 0x41b   : > { %2888 = vmatpush.msra.mxu3 %v2744_v29 }
 0x41d   : > { %v6498_v27 = vpop.eup %6497  ;;  %2889 = vmatpush.msra.mxu3 %v2728_v35  ;;  %v2608_v35 = vld [vmem:[%s7688_s29 + $0x50] sm:$0xff] }
 0x41e   : > { %v2448_v30 = vsel %vm2432_vm3, %v6498_v27, 0.0 }
 0x41f   : > { %2449 = vadd.xlane.f32.xlu1 %v2448_v30  ;;  %v2745_v30 = vunpack.c.h.bf16 %v2639_v26  ;;  %2890 = vmatpush.msra.mxu3 %v2712_v41  ;;  %v2733_v26 = vunpack.c.h.bf16 %v2633_v21  ;;  %v2600_v41 = vld [vmem:[%s7688_s29 + $0x10] sm:$0xff] }
 0x421   : > { %2911 = vmatpush.msra.mxu0 %v2745_v30 }
 0x423   : > { %2912 = vmatpush.msra.mxu0 %v2729_v36 }
 0x48a   : > { %v2447_v42 = vpop.xlane.xlu1 %2446 }
 0x48b   : > { %6499 = vrcp.f32 %v2447_v42  ;;  %v2713_v42 = vunpack.c.h.bf16 %v2623_v38 }
 0x48d   : > { %2913 = vmatpush.msra.mxu0 %v2713_v42  ;;  %v2601_v42 = vld [vmem:[%s7688_s29 + $0x18] sm:$0xff] }
 0x491   : > { %v6500_v43 = vpop.eup %6499 }
 0x492   : > { %v2450_v44 = vpop.xlane.xlu1 %2449  ;;  %v2453_v45 = vmul.f32 %v6500_v43, %v6496_v22  ;;  %v2759_v22 = vunpack.c.h.bf16 %v2646_v19  ;;  %v2614_v43 = vld [vmem:[%s7688_s29 + $0x80] sm:$0xff]  ;;  %v2749_v19 = vunpack.c.h.bf16 %v2641_v14 }
 0x493   : > { %6501 = vrcp.f32 %v2450_v44  ;;  %v2615_v44 = vld [vmem:[%s7688_s29 + $0x88] sm:$0xff] }
 0x494   : > { %5469 = vmatmul.msk.f32.vlgmr.msrb.gmra.mxu3 %vm2432_vm3, %v2453_v45  ;;  %6503 = vrcp.f32 %v7123_v62  ;;  %2864 = vmatpush.msrb.mxu2 %v2759_v22  ;;  %v2694_v45 = vunpack.c.l.bf16 %v2614_v43  ;;  %v2697_v50 = vunpack.c.h.bf16 %v2615_v44 }
 0x496   : > { %2865 = vmatpush.msrb.mxu2 %v2743_v28  ;;  %2914 = vmatpush.msra.mxu0 %v2697_v50  ;;  %v2625_v28 = vld [vmem:[%s7688_s29 + $0xd8] sm:$0xff] }
 0x497   : > { %v2716_v31 = vunpack.c.l.bf16 %v2625_v28  ;;  %v2717_v32 = vunpack.c.h.bf16 %v2625_v28 }
 0x498   : > { %2866 = vmatpush.msrb.mxu2 %v2727_v34  ;;  %v2617_v34 = vld [vmem:[%s7688_s29 + $0x98] sm:$0xff] }
 0x499   : > { %v6502_v46 = vpop.eup %6501  ;;  %v2700_v38 = vunpack.c.l.bf16 %v2617_v34 }
 0x49a   : > { %v2454_v48 = vmul.f32 %v6502_v46, %v6498_v27  ;;  %v6504_v63 = vpop.eup %6503  ;;  %v2742_v27 = vunpack.c.l.bf16 %v2638_v25  ;;  %2867 = vmatpush.msrb.mxu2 %v2711_v40  ;;  %v2695_v46 = vunpack.c.h.bf16 %v2614_v43  ;;  %v2732_v25 = vunpack.c.l.bf16 %v2633_v21  ;;  %v2609_v40 = vld [vmem:[%s7688_s29 + $0x58] sm:$0xff]  ;;  %v2643_v21 = vld [vmem:[%s7688_s29 + $0x168] sm:$0xff] }
 0x49b   : > { %v2544_v0 = vmul.f32 64.0, %v6504_v63  ;;  %vm2548_vm4 = vweird.f32 %v6504_v63  ;;  %v2752_v28 = vunpack.c.l.bf16 %v2643_v21 }
 0x49c   : > { %5470 = vmatmul.msk.f32.gmra.mxu3 %vm2432_vm3, %v2454_v48  ;;  %2842 = vmatpush.msrb.mxu1 %v2742_v27  ;;  %v2696_v48 = vunpack.c.l.bf16 %v2615_v44  ;;  %v2624_v27 = vld [vmem:[%s7688_s29 + $0xd0] sm:$0xff]  ;;  %v2682_v44 = vunpack.c.l.bf16 %v2608_v35 }
 0x49d   : > { %v2545_v1 = vsub.f32 1.0, %v2544_v0  ;;  %2868 = vmatpush.msrb.mxu2 %v2695_v46  ;;  %v2657_v0 = vld [vmem:[%s7688_s29 + $0x1d8] sm:$0xff]  ;;  %v2714_v29 = vunpack.c.l.bf16 %v2624_v27  ;;  %v2715_v30 = vunpack.c.h.bf16 %v2624_v27  ;;  %v2684_v46 = vunpack.c.l.bf16 %v2609_v40 }
 0x49e   : > { %2843 = vmatpush.msrb.mxu1 %v2726_v33  ;;  %2891 = vmatpush.msra.mxu3 %v2696_v48  ;;  %v2616_v33 = vld [vmem:[%s7688_s29 + $0x90] sm:$0xff]  ;;  %v2685_v48 = vunpack.c.h.bf16 %v2609_v40 }
 0x49f   : > { %v2546_v2 = vmul.f32 %v6504_v63, %v2545_v1  ;;  %v2698_v36 = vunpack.c.l.bf16 %v2616_v33  ;;  %v2699_v37 = vunpack.c.h.bf16 %v2616_v33  ;;  %v2626_v33 = vld [vmem:[%s7688_s29 + $0xe0] sm:$0xff] }
 0x4a0   : > { %2844 = vmatpush.msrb.mxu1 %v2710_v39  ;;  %v2701_v39 = vunpack.c.h.bf16 %v2617_v34  ;;  %v2718_v40 = vunpack.c.l.bf16 %v2626_v33 }
 0x4a1   : > { %v2547_v3 = vadd.f32 %v6504_v63, %v2546_v2 }
 0x4a2   : > { %2845 = vmatpush.msrb.mxu1 %v2694_v45  ;;  %v2683_v45 = vunpack.c.h.bf16 %v2608_v35 }
 0x517   : > { %v2478_v51 = vpop.f32.mrf.mxu3 }
 0x518   : > { %5471 = vmatmul.msk.f32.vlgmr.msrb.gmra.mxu0 %vm2279_vm2, %v2478_v51  ;;  %v2606_v51 = vld [vmem:[%s7688_s29 + $0x40] sm:$0xff] }
 0x51f   : > { %v2481_v52 = vpop.f32.mrf.mxu3 }
 0x520   : > { %5472 = vmatmul.msk.f32.gmra.mxu0 %vm2279_vm2, %v2481_v52  ;;  %v2607_v52 = vld [vmem:[%s7688_s29 + $0x48] sm:$0xff] }
 0x595   : > { %v2527_v54 = vpop.f32.mrf.mxu0 }
 0x596   : > { %v2528_v55 = vadd.f32 %v6489_v53, %v2527_v54  ;;  %v2679_v54 = vunpack.c.h.bf16 %v2606_v51 }
 0x598   : > { %v2533_v56 = vadd.f32 %v2528_v55, %v7726_v47  ;;  %v7780_v47 = vsel %vm2548_vm4, %v6504_v63, %v2547_v3  ;;  %v2680_v55 = vunpack.c.l.bf16 %v2607_v52  ;;  %2869 = vmatpush.msrb.mxu2 %v2679_v54  ;;  %v2656_v63 = vld [vmem:[%s7688_s29 + $0x1d0] sm:$0xff]  ;;  %v2780_v3 = vunpack.c.l.bf16 %v2657_v0 }
 0x599   : > { %v2778_v1 = vunpack.c.l.bf16 %v2656_v63  ;;  %v2779_v2 = vunpack.c.h.bf16 %v2656_v63  ;;  %v2669_v54 = vunpack.c.h.bf16 %v2601_v42 }
 0x59a   : > { %v2537_v57 = vsel %vm2279_vm2, %v2533_v56, 0.0  ;;  %2892 = vmatpush.msra.mxu3 %v2680_v55 }
 0x59b   : > { %2538 = vadd.xlane.f32.xlu2 %v2537_v57  ;;  %v2598_v57 = vld [vmem:[%s7688_s29] sm:$0xff] }
 0x59d   : > { %v2530_v58 = vpop.f32.mrf.mxu0 }
 0x59e   : > { %v2531_v59 = vadd.f32 %v6489_v53, %v2530_v58  ;;  %v2678_v53 = vunpack.c.l.bf16 %v2606_v51  ;;  %v2599_v58 = vld [vmem:[%s7688_s29 + $0x8] sm:$0xff]  ;;  %v2666_v51 = vunpack.c.l.bf16 %v2600_v41 }
 0x59f   : > { %v2665_v62 = vunpack.c.h.bf16 %v2599_v58 }
 0x5a0   : > { %v2534_v60 = vadd.f32 %v2531_v59, %v7732_v49  ;;  %2846 = vmatpush.msrb.mxu1 %v2678_v53  ;;  %v2662_v59 = vunpack.c.l.bf16 %v2598_v57  ;;  %v2668_v53 = vunpack.c.l.bf16 %v2601_v42  ;;  %v2619_v42 = vld [vmem:[%s7688_s29 + $0xa8] sm:$0xff] }
 0x5a2   : > { %v2540_v61 = vsel %vm2279_vm2, %v2534_v60, 0.0  ;;  %2847 = vmatpush.msrb.mxu1 %v2662_v59 }
 0x5a3   : > { %2541 = vadd.xlane.f32.xlu2 %v2540_v61  ;;  %v2664_v61 = vunpack.c.l.bf16 %v2599_v58 }
 0x5a4   : > { %2932 = vmatpush.msra.mxu1 %v2778_v1 }
 0x5a5   : > { %2893 = vmatpush.msra.mxu3 %v2664_v61 }
 0x5a7   : > { %2978 = vmatpush.msrb.mxu3 %v2780_v3  ;;  %v6491_v3 = vld [vmem:[%s2184_s6] ss:$0 sm:$0xff]  ;;  %s8459_s6 = sld [smem:[#allocation60_spill]] (!%p5505_p2) }
 0x60e   : > { %v2539_v4 = vpop.xlane.xlu2 %2538 }
 0x60f   : > { %v2550_v5 = vmul.f32 %v7780_v47, %v2539_v4  ;;  %v2781_v4 = vunpack.c.h.bf16 %v2657_v0  ;;  %v6490_v0 = vld [vmem:[%s2181_s19] ss:$0 sm:$0xff] }
 0x611   : > { %v7783_v6 = vsub.f32 %v2533_v56, %v2550_v5  ;;  %v2681_v56 = vunpack.c.h.bf16 %v2607_v52  ;;  %v2648_v5 = vld [vmem:[%s7688_s29 + $0x190] sm:$0xff]  ;;  %v2667_v52 = vunpack.c.h.bf16 %v2600_v41  ;;  %v2719_v41 = vunpack.c.h.bf16 %v2626_v33 }
 0x613   : > { %v2554_v49 = vmul.f32 %v7783_v6, %v7783_v6  ;;  %2915 = vmatpush.msra.mxu0 %v2681_v56 }
 0x615   : > { %v2556_v7 = vsel %vm2279_vm2, %v2554_v49, 0.0  ;;  %2916 = vmatpush.msra.mxu0 %v2665_v62  ;;  %v2649_v49 = vld [vmem:[%s7688_s29 + $0x198] sm:$0xff] }
 0x616   : > { %2557 = vadd.xlane.f32.xlu0 %v2556_v7  ;;  %v2542_v8 = vpop.xlane.xlu2 %2541  ;;  %v2762_v7 = vunpack.c.l.bf16 %v2648_v5 }
 0x617   : > { %v2551_v9 = vmul.f32 %v7780_v47, %v2542_v8  ;;  %v2763_v8 = vunpack.c.h.bf16 %v2648_v5  ;;  %3001 = vmatpush.msrb.mxu0 %v2781_v4 }
 0x618   : > { %2933 = vmatpush.msra.mxu1 %v2762_v7 }
 0x619   : > { %v7789_v10 = vsub.f32 %v2534_v60, %v2551_v9  ;;  %v2663_v60 = vunpack.c.h.bf16 %v2598_v57  ;;  %v2764_v9 = vunpack.c.l.bf16 %v2649_v49 }
 0x61a   : > { %2934 = vmatpush.msra.mxu1 %v2746_v16 }
 0x61b   : > { %v2555_v11 = vmul.f32 %v7789_v10, %v7789_v10  ;;  %2870 = vmatpush.msrb.mxu2 %v2663_v60  ;;  %2979 = vmatpush.msrb.mxu3 %v2764_v9 }
 0x61c   : > { %2935 = vmatpush.msra.mxu1 %v2730_v23 }
 0x61d   : > { %v2559_v12 = vsel %vm2279_vm2, %v2555_v11, 0.0  ;;  %2955 = vmatpush.msra.mxu2 %v2779_v2  ;;  %v2765_v11 = vunpack.c.h.bf16 %v2649_v49  ;;  %2980 = vmatpush.msrb.mxu3 %v2748_v18  ;;  %v2658_v49 = vld [vmem:[%s7688_s29 + $0x1e0] sm:$0xff] }
 0x61e   : > { %2560 = vadd.xlane.f32.xlu1 %v2559_v12  ;;  %2936 = vmatpush.msra.mxu1 %v2714_v29  ;;  %v2782_v13 = vunpack.c.l.bf16 %v2658_v49  ;;  %v2783_v14 = vunpack.c.h.bf16 %v2658_v49  ;;  %v2753_v29 = vunpack.c.h.bf16 %v2643_v21  ;;  %v2653_v49 = vld [vmem:[%s7688_s29 + $0x1b8] sm:$0xff] }
 0x61f   : > { %2956 = vmatpush.msra.mxu2 %v2763_v8  ;;  %3002 = vmatpush.msrb.mxu0 %v2765_v11  ;;  %v2659_v8 = vld [vmem:[%s7688_s29 + $0x1e8] sm:$0xff]  ;;  %v2650_v11 = vld [vmem:[%s7688_s29 + $0x1a0] sm:$0xff] }
 0x620   : > { %2981 = vmatpush.msrb.mxu3 %v2732_v25  ;;  %2937 = vmatpush.msra.mxu1 %v2698_v36  ;;  %v2785_v18 = vunpack.c.h.bf16 %v2659_v8  ;;  %v2767_v20 = vunpack.c.h.bf16 %v2650_v11  ;;  %v2627_v36 = vld [vmem:[%s7688_s29 + $0xe8] sm:$0xff] }
 0x621   : > { %2957 = vmatpush.msra.mxu2 %v2747_v17  ;;  %3003 = vmatpush.msrb.mxu0 %v2749_v19  ;;  %v2784_v17 = vunpack.c.l.bf16 %v2659_v8  ;;  %v2642_v19 = vld [vmem:[%s7688_s29 + $0x160] sm:$0xff] }
 0x622   : > { %2982 = vmatpush.msrb.mxu3 %v2716_v31  ;;  %2938 = vmatpush.msra.mxu1 %v2682_v44  ;;  %v2751_v27 = vunpack.c.h.bf16 %v2642_v19  ;;  %v2721_v44 = vunpack.c.h.bf16 %v2627_v36 }
 0x623   : > { %2958 = vmatpush.msra.mxu2 %v2731_v24  ;;  %3004 = vmatpush.msrb.mxu0 %v2733_v26  ;;  %v2750_v26 = vunpack.c.l.bf16 %v2642_v19 }
 0x624   : > { %2983 = vmatpush.msrb.mxu3 %v2700_v38  ;;  %2939 = vmatpush.msra.mxu1 %v2666_v51  ;;  %v2610_v51 = vld [vmem:[%s7688_s29 + $0x60] sm:$0xff] }
 0x625   : > { %2959 = vmatpush.msra.mxu2 %v2715_v30  ;;  %3005 = vmatpush.msrb.mxu0 %v2717_v32  ;;  %v2634_v30 = vld [vmem:[%s7688_s29 + $0x120] sm:$0xff]  ;;  %v2635_v32 = vld [vmem:[%s7688_s29 + $0x128] sm:$0xff] }
 0x626   : > { %2984 = vmatpush.msrb.mxu3 %v2684_v46  ;;  %v2734_v34 = vunpack.c.l.bf16 %v2634_v30  ;;  %v2735_v35 = vunpack.c.h.bf16 %v2634_v30  ;;  %v2737_v38 = vunpack.c.h.bf16 %v2635_v32 }
 0x627   : > { %2960 = vmatpush.msra.mxu2 %v2699_v37  ;;  %3006 = vmatpush.msrb.mxu0 %v2701_v39  ;;  %v2736_v37 = vunpack.c.l.bf16 %v2635_v32  ;;  %v2618_v39 = vld [vmem:[%s7688_s29 + $0xa0] sm:$0xff]  ;;  %v2612_v32 = vld [vmem:[%s7688_s29 + $0x70] sm:$0xff] }
 0x628   : > { %2985 = vmatpush.msrb.mxu3 %v2668_v53  ;;  %v2703_v46 = vunpack.c.h.bf16 %v2618_v39  ;;  %v2602_v53 = vld [vmem:[%s7688_s29 + $0x20] sm:$0xff] }
 0x629   : > { %2961 = vmatpush.msra.mxu2 %v2683_v45  ;;  %3007 = vmatpush.msrb.mxu0 %v2685_v48  ;;  %v2702_v45 = vunpack.c.l.bf16 %v2618_v39  ;;  %v2704_v48 = vunpack.c.l.bf16 %v2619_v42  ;;  %v2691_v39 = vunpack.c.h.bf16 %v2612_v32 }
 0x62b   : > { %2962 = vmatpush.msra.mxu2 %v2667_v52  ;;  %3008 = vmatpush.msrb.mxu0 %v2669_v54  ;;  %v2611_v52 = vld [vmem:[%s7688_s29 + $0x68] sm:$0xff]  ;;  %v2686_v54 = vunpack.c.l.bf16 %v2610_v51 }
 0x689   : > { %v2558_v12 = vpop.xlane.xlu0 %2557 }
 0x68a   : > { %v2562_v15 = vmul.f32 %v2558_v12, %v7780_v47 }
 0x68c   : > { %v7819_v22 = vadd.f32 1e-05, %v2562_v15  ;;  %v2651_v15 = vld [vmem:[%s7688_s29 + $0x1a8] sm:$0xff] }
 0x68d   : > { %v2768_v23 = vunpack.c.l.bf16 %v2651_v15  ;;  %v2769_v24 = vunpack.c.h.bf16 %v2651_v15  ;;  %v2636_v15 = vld [vmem:[%s7688_s29 + $0x130] sm:$0xff] }
 0x68e   : > { %6505 = vrsqrt.f32 %v7819_v22  ;;  %vm2572_vm6 = vweird.f32 %v7819_v22  ;;  %v2739_v21 = vunpack.c.h.bf16 %v2636_v15 }
 0x691   : > { %v2561_v43 = vpop.xlane.xlu1 %2560 }
 0x692   : > { %v2563_v50 = vmul.f32 %v2561_v43, %v7780_v47  ;;  %v2720_v43 = vunpack.c.l.bf16 %v2627_v36 }
 0x694   : > { %v6506_v55 = vpop.eup %6505  ;;  %v2565_v56 = vadd.f32 1e-05, %v2563_v50  ;;  %v2705_v50 = vunpack.c.h.bf16 %v2619_v42  ;;  %v2604_v42 = vld [vmem:[%s7688_s29 + $0x30] sm:$0xff] }
 0x695   : > { %v2567_v57 = vmul.f32 %v6506_v55, %v7819_v22  ;;  %vm2573_vm5 = vweird.f32 %v6506_v55 }
 0x696   : > { %6507 = vrsqrt.f32 %v2565_v56  ;;  %vm2574_vm7 = vmor %vm2572_vm6, %vm2573_vm5  ;;  %vm2582_vm9 = vweird.f32 %v2565_v56 }
 0x697   : > { %v2568_v58 = vmul.f32 %v6506_v55, %v2567_v57  ;;  %v2688_v57 = vunpack.c.l.bf16 %v2611_v52 }
 0x699   : > { %v2569_v59 = vmul.f32 0.5, %v2568_v58  ;;  %v2689_v58 = vunpack.c.h.bf16 %v2611_v52 }
 0x69b   : > { %v2570_v60 = vsub.f32 1.5, %v2569_v59  ;;  %v2660_v59 = vld [vmem:[%s7688_s29 + $0x1f0] sm:$0xff] }
 0x69c   : > { %v6508_v61 = vpop.eup %6507 }
 0x69d   : > { %v2571_v62 = vmul.f32 %v6506_v55, %v2570_v60  ;;  %v2577_v63 = vmul.f32 %v6508_v61, %v2565_v56  ;;  %vm2583_vm8 = vweird.f32 %v6508_v61  ;;  %v2603_v56 = vld [vmem:[%s7688_s29 + $0x28] sm:$0xff]  ;;  %v2670_v60 = vunpack.c.l.bf16 %v2602_v53 }
 0x69e   : > { %vm2584_vm10 = vmor %vm2582_vm9, %vm2583_vm8 }
 0x69f   : > { %v2575_v1 = vsel %vm2574_vm7, %v6506_v55, %v2571_v62  ;;  %v2578_v2 = vmul.f32 %v6508_v61, %v2577_v63  ;;  %v2687_v55 = vunpack.c.h.bf16 %v2610_v51  ;;  %v2661_v62 = vld [vmem:[%s7688_s29 + $0x1f8] sm:$0xff]  ;;  %v2672_v63 = vunpack.c.l.bf16 %v2603_v56 }
 0x6a0   : > { %v2586_v4 = vmul.f32 %v2575_v1, %v7783_v6  ;;  %v2766_v6 = vunpack.c.l.bf16 %v2650_v11  ;;  %v2786_v1 = vunpack.c.l.bf16 %v2660_v59  ;;  %v2645_v11 = vld [vmem:[%s7688_s29 + $0x178] sm:$0xff] }
 0x6a1   : > { %v2579_v5 = vmul.f32 0.5, %v2578_v2  ;;  %v2787_v2 = vunpack.c.h.bf16 %v2660_v59  ;;  %v2756_v19 = vunpack.c.l.bf16 %v2645_v11  ;;  %v6152_v51 = vld [vmem:[%s7696_s14 + $0xb8] sm:$0xff]  }
 0x6a2   : > { %v2591_v7 = vmul.f32 %v6490_v0, %v2586_v4  ;;  %v2789_v4 = vunpack.c.h.bf16 %v2661_v62 }
 0x6a3   : > { %v2580_v9 = vsub.f32 1.5, %v2579_v5  ;;  %v2652_v5 = vld [vmem:[%s7688_s29 + $0x1b0] sm:$0xff] }
 0x6a4   : > { %v7843_v12 = vadd.f32 %v6491_v3, %v2591_v7  ;;  %v2644_v7 = vld [vmem:[%s7688_s29 + $0x170] sm:$0xff]  ;;  %v2770_v8 = vunpack.c.l.bf16 %v2652_v5 }
 0x6a5   : > { %v2581_v16 = vmul.f32 %v6508_v61, %v2580_v9  ;;  %v2771_v9 = vunpack.c.h.bf16 %v2652_v5  ;;  %v6158_v5 = vld [vmem:[%s7696_s14 + $0xe8] sm:$0xff]  }
 0x6a6   : > { %5473 = vmatmul.msk.f32.vlgmr.msrb.gmra.mxu1 %vm2279_vm2, %v7843_v12  ;;  %5475 = vmatmul.msk.f32.vlgmr.msrb.gmra.mxu2 %vm2279_vm2, %v7843_v12 }
 0x6a7   : > { %v2585_v22 = vsel %vm2584_vm10, %v6508_v61, %v2581_v16  ;;  %5477 = vmatmul.msk.f32.vlgmr.msra.gmra.mxu3 %vm2279_vm2, %v7843_v12  ;;  %5479 = vmatmul.msk.f32.vlgmr.msra.gmra.mxu0 %vm2279_vm2, %v7843_v12  ;;  %v2671_v61 = vunpack.c.h.bf16 %v2602_v53  ;;  %v2754_v16 = vunpack.c.l.bf16 %v2644_v7 }
 0x6a8   : > { %v2587_v25 = vmul.f32 %v2585_v22, %v7789_v10  ;;  %3024 = vmatpush.msrb.mxu1 %v2782_v13  ;;  %3047 = vmatpush.msrb.mxu2 %v2783_v14  ;;  %v2772_v13 = vunpack.c.l.bf16 %v2653_v49  ;;  %v2773_v14 = vunpack.c.h.bf16 %v2653_v49 }
 0x6a9   : > { %3070 = vmatpush.msra.mxu3 %v2784_v17  ;;  %3093 = vmatpush.msra.mxu0 %v2785_v18  ;;  %v2755_v17 = vunpack.c.h.bf16 %v2644_v7  ;;  %v2637_v18 = vld [vmem:[%s7688_s29 + $0x138] sm:$0xff] }
 0x6aa   : > { %v2592_v31 = vmul.f32 %v6490_v0, %v2587_v25  ;;  %3025 = vmatpush.msrb.mxu1 %v2766_v6  ;;  %3048 = vmatpush.msrb.mxu2 %v2767_v20  ;;  %v2673_v0 = vunpack.c.h.bf16 %v2603_v56  ;;  %v2757_v6 = vunpack.c.h.bf16 %v2645_v11  ;;  %v2738_v20 = vunpack.c.l.bf16 %v2636_v15  ;;  %v2629_v25 = vld [vmem:[%s7688_s29 + $0xf8] sm:$0xff]  ;;  %v6142_v11 = vld [vmem:[%s7696_s14 + $0x68] sm:$0xff]  }
 0x6ab   : > { %3071 = vmatpush.msra.mxu3 %v2768_v23  ;;  %3094 = vmatpush.msra.mxu0 %v2769_v24  ;;  %v2740_v22 = vunpack.c.l.bf16 %v2637_v18  ;;  %v2741_v23 = vunpack.c.h.bf16 %v2637_v18  ;;  %v2628_v24 = vld [vmem:[%s7688_s29 + $0xf0] sm:$0xff]  ;;  %v2724_v30 = vunpack.c.l.bf16 %v2629_v25  ;;  %v5661_v18 = vunpack.c.h.bf16 %v6142_v11 }
 0x6ac   : > { %v7860_v10 = vadd.f32 %v6491_v3, %v2592_v31  ;;  %3026 = vmatpush.msrb.mxu1 %v2750_v26  ;;  %3049 = vmatpush.msrb.mxu2 %v2751_v27  ;;  %v2788_v3 = vunpack.c.l.bf16 %v2661_v62  ;;  %v2620_v26 = vld [vmem:[%s7688_s29 + $0xb0] sm:$0xff]  ;;  %v2722_v27 = vunpack.c.l.bf16 %v2628_v24  ;;  %v2725_v31 = vunpack.c.h.bf16 %v2629_v25 }
 0x6ad   : > { %3072 = vmatpush.msra.mxu3 %v2752_v28  ;;  %3095 = vmatpush.msra.mxu0 %v2753_v29  ;;  %v2723_v28 = vunpack.c.h.bf16 %v2628_v24  ;;  %v2621_v29 = vld [vmem:[%s7688_s29 + $0xb8] sm:$0xff]  ;;  %v2706_v33 = vunpack.c.l.bf16 %v2620_v26  ;;  %v6149_v24 = vld [vmem:[%s7696_s14 + $0xa0] sm:$0xff]   ;;  %v5660_v25 = vunpack.c.l.bf16 %v6142_v11 }
 0x6ae   : > { %5474 = vmatmul.msk.f32.gmra.mxu1 %vm2279_vm2, %v7860_v10  ;;  %5476 = vmatmul.msk.f32.gmra.mxu2 %vm2279_vm2, %v7860_v10  ;;  %v2708_v36 = vunpack.c.l.bf16 %v2621_v29  ;;  %v6145_v11 = vld [vmem:[%s7696_s14 + $0x80] sm:$0xff]  }
 0x6af   : > { %5478 = vmatmul.msk.f32.gmra.mxu3 %vm2279_vm2, %v7860_v10  ;;  %5480 = vmatmul.msk.f32.gmra.mxu0 %vm2279_vm2, %v7860_v10 }
 0x6b0   : > { %3027 = vmatpush.msrb.mxu1 %v2734_v34  ;;  %3050 = vmatpush.msrb.mxu2 %v2735_v35  ;;  %v2707_v34 = vunpack.c.h.bf16 %v2620_v26  ;;  %v2613_v35 = vld [vmem:[%s7688_s29 + $0x78] sm:$0xff] }
 0x6b1   : > { %3073 = vmatpush.msra.mxu3 %v2736_v37  ;;  %3096 = vmatpush.msra.mxu0 %v2737_v38  ;;  %v2709_v37 = vunpack.c.h.bf16 %v2621_v29  ;;  %v2690_v38 = vunpack.c.l.bf16 %v2612_v32  ;;  %v6132_v29 = vld [vmem:[%s7696_s14 + $0x18] sm:$0xff]   ;;  %v5689_v32 = vunpack.c.h.bf16 %v6149_v24 }
 0x6b2   : > { %3028 = vmatpush.msrb.mxu1 %v2718_v40  ;;  %3051 = vmatpush.msrb.mxu2 %v2719_v41  ;;  %v2692_v40 = vunpack.c.l.bf16 %v2613_v35  ;;  %v2693_v41 = vunpack.c.h.bf16 %v2613_v35  ;;  %v6140_v35 = vld [vmem:[%s7696_s14 + $0x58] sm:$0xff]  }
 0x6b3   : > { %3074 = vmatpush.msra.mxu3 %v2720_v43  ;;  %3097 = vmatpush.msra.mxu0 %v2721_v44  ;;  %v2605_v43 = vld [vmem:[%s7688_s29 + $0x38] sm:$0xff] }
 0x6b4   : > { %3029 = vmatpush.msrb.mxu1 %v2702_v45  ;;  %3052 = vmatpush.msrb.mxu2 %v2703_v46  ;;  %v6136_v44 = vld [vmem:[%s7696_s14 + $0x38] sm:$0xff]   ;;  %v2674_v46 = vunpack.c.l.bf16 %v2604_v42  ;;  %v2676_v52 = vunpack.c.l.bf16 %v2605_v43  ;;  %v2677_v53 = vunpack.c.h.bf16 %v2605_v43  ;;  %v5653_v43 = vunpack.c.h.bf16 %v6140_v35 }
 0x6b5   : > { %3075 = vmatpush.msra.mxu3 %v2704_v48  ;;  %3098 = vmatpush.msra.mxu0 %v2705_v50  ;;  %v6160_v45 = vld [vmem:[%s7696_s14 + $0xf8] sm:$0xff]   ;;  %v2675_v48 = vunpack.c.h.bf16 %v2604_v42  ;;  %v6155_v42 = vld [vmem:[%s7696_s14 + $0xd0] sm:$0xff]  }
 0x6b6   : > { %5481 = vmatmul.msk.f32.vlgmr.msra.gmra.mxu1 %vm2279_vm2, %v7843_v12  ;;  %5483 = vmatmul.msk.f32.vlgmr.msra.gmra.mxu2 %vm2279_vm2, %v7843_v12  ;;  %v6144_v50 = vld [vmem:[%s7696_s14 + $0x78] sm:$0xff]   ;;  %v5732_v59 = vunpack.c.l.bf16 %v6160_v45 }
 0x6b7   : > { %5485 = vmatmul.msk.f32.vlgmr.msrb.gmra.mxu3 %vm2279_vm2, %v7843_v12  ;;  %5487 = vmatmul.msk.f32.vlgmr.msrb.gmra.mxu0 %vm2279_vm2, %v7843_v12  ;;  %v5669_v56 = vunpack.c.h.bf16 %v6144_v50  ;;  %v5668_v62 = vunpack.c.l.bf16 %v6144_v50  ;;  %v6147_v50 = vld [vmem:[%s7696_s14 + $0x90] sm:$0xff]  }
 0x6b8   : > { %3030 = vmatpush.msrb.mxu1 %v2686_v54  ;;  %3053 = vmatpush.msrb.mxu2 %v2687_v55  ;;  %v5637_v54 = vunpack.c.h.bf16 %v6136_v44  ;;  %v5733_v55 = vunpack.c.h.bf16 %v6160_v45  ;;  %v5620_v45 = vunpack.c.l.bf16 %v6132_v29 }
 0x6b9   : > { %3076 = vmatpush.msra.mxu3 %v2688_v57  ;;  %3099 = vmatpush.msra.mxu0 %v2689_v58  ;;  %v5701_v57 = vunpack.c.h.bf16 %v6152_v51  ;;  %v5636_v58 = vunpack.c.l.bf16 %v6136_v44 }
 0x6ba   : > { %3031 = vmatpush.msrb.mxu1 %v2670_v60  ;;  %3054 = vmatpush.msrb.mxu2 %v2671_v61  ;;  %v6135_v60 = vld [vmem:[%s7696_s14 + $0x30] sm:$0xff]  }
 0x6bb   : > { %3077 = vmatpush.msra.mxu3 %v2672_v63  ;;  %3100 = vmatpush.msra.mxu0 %v2673_v0  ;;  %v6159_v61 = vld [vmem:[%s7696_s14 + $0xf0] sm:$0xff]   ;;  %v5700_v63 = vunpack.c.l.bf16 %v6152_v51  ;;  %v5652_v51 = vunpack.c.l.bf16 %v6140_v35 }
 0x6bc   : > { %3116 = vmatpush.msra.mxu1 %v2786_v1  ;;  %3139 = vmatpush.msra.mxu2 %v2787_v2  ;;  %v6143_v0 = vld [vmem:[%s7696_s14 + $0x70] sm:$0xff]   ;;  %v5633_v2 = vunpack.c.h.bf16 %v6135_v60 }
 0x6bd   : > { %3162 = vmatpush.msrb.mxu3 %v2788_v3  ;;  %3185 = vmatpush.msrb.mxu0 %v2789_v4  ;;  %v6151_v1 = vld [vmem:[%s7696_s14 + $0xb0] sm:$0xff]   ;;  %v5729_v3 = vunpack.c.h.bf16 %v6159_v61  ;;  %v6134_v4 = vld [vmem:[%s7696_s14 + $0x28] sm:$0xff]   ;;  %v5665_v49 = vunpack.c.h.bf16 %v6143_v0 }
 0x6be   : > { %5482 = vmatmul.msk.f32.gmra.mxu1 %vm2279_vm2, %v7860_v10  ;;  %5484 = vmatmul.msk.f32.gmra.mxu2 %vm2279_vm2, %v7860_v10  ;;  %v5697_v7 = vunpack.c.h.bf16 %v6151_v1  ;;  %v5696_v15 = vunpack.c.l.bf16 %v6151_v1 }
 0x6bf   : > { %5486 = vmatmul.msk.f32.gmra.mxu3 %vm2279_vm2, %v7860_v10  ;;  %5488 = vmatmul.msk.f32.gmra.mxu0 %vm2279_vm2, %v7860_v10 }
 0x6c0   : > { %3117 = vmatpush.msra.mxu1 %v2770_v8  ;;  %3140 = vmatpush.msra.mxu2 %v2771_v9  ;;  %v5632_v8 = vunpack.c.l.bf16 %v6135_v60  ;;  %v5728_v9 = vunpack.c.l.bf16 %v6159_v61  ;;  %v5712_v60 = vunpack.c.l.bf16 %v6155_v42  ;;  %v6138_v61 = vld [vmem:[%s7696_s14 + $0x48] sm:$0xff]  }
 0x6c1   : > { %3163 = vmatpush.msrb.mxu3 %v2772_v13  ;;  %3186 = vmatpush.msrb.mxu0 %v2773_v14  ;;  %v6150_v13 = vld [vmem:[%s7696_s14 + $0xa8] sm:$0xff]   ;;  %v5664_v14 = vunpack.c.l.bf16 %v6143_v0  ;;  %v5680_v0 = vunpack.c.l.bf16 %v6147_v50 }
 0x6c2   : > { %3118 = vmatpush.msra.mxu1 %v2754_v16  ;;  %3141 = vmatpush.msra.mxu2 %v2755_v17  ;;  %v5629_v16 = vunpack.c.h.bf16 %v6134_v4  ;;  %v5725_v17 = vunpack.c.h.bf16 %v6158_v5  ;;  %v5692_v26 = vunpack.c.l.bf16 %v6150_v13 }
 0x6c3   : > { %3164 = vmatpush.msrb.mxu3 %v2756_v19  ;;  %3187 = vmatpush.msrb.mxu0 %v2757_v6  ;;  %v5693_v19 = vunpack.c.h.bf16 %v6150_v13  ;;  %v6133_v6 = vld [vmem:[%s7696_s14 + $0x20] sm:$0xff]   ;;  %v5644_v13 = vunpack.c.l.bf16 %v6138_v61 }
 0x6c4   : > { %3119 = vmatpush.msra.mxu1 %v2738_v20  ;;  %3142 = vmatpush.msra.mxu2 %v2739_v21  ;;  %v6157_v20 = vld [vmem:[%s7696_s14 + $0xe0] sm:$0xff]   ;;  %v5628_v21 = vunpack.c.l.bf16 %v6134_v4 }
 0x6c5   : > { %3165 = vmatpush.msrb.mxu3 %v2740_v22  ;;  %3188 = vmatpush.msrb.mxu0 %v2741_v23  ;;  %v5724_v22 = vunpack.c.l.bf16 %v6158_v5  ;;  %v6141_v23 = vld [vmem:[%s7696_s14 + $0x60] sm:$0xff]   ;;  %v5645_v5 = vunpack.c.h.bf16 %v6138_v61 }
 0x6c6   : > { %5489 = vmatmul.msk.f32.vlgmr.msrb.gmra.mxu1 %vm2279_vm2, %v7843_v12  ;;  %5491 = vmatmul.msk.f32.vlgmr.msrb.gmra.mxu2 %vm2279_vm2, %v7843_v12  ;;  %v6153_v4 = vld [vmem:[%s7696_s14 + $0xc0] sm:$0xff]  }
 0x6c7   : > { %5493 = vmatmul.msk.f32.vlgmr.msra.gmra.mxu3 %vm2279_vm2, %v7843_v12  ;;  %5495 = vmatmul.msk.f32.vlgmr.msra.gmra.mxu0 %vm2279_vm2, %v7843_v12 }
 0x6c8   : > { %3120 = vmatpush.msra.mxu1 %v2722_v27  ;;  %3143 = vmatpush.msra.mxu2 %v2723_v28  ;;  %v5625_v27 = vunpack.c.h.bf16 %v6133_v6  ;;  %v5721_v28 = vunpack.c.h.bf16 %v6157_v20 }
 0x6c9   : > { %3166 = vmatpush.msrb.mxu3 %v2724_v30  ;;  %3189 = vmatpush.msrb.mxu0 %v2725_v31  ;;  %v6156_v30 = vld [vmem:[%s7696_s14 + $0xd8] sm:$0xff]   ;;  %v5657_v31 = vunpack.c.h.bf16 %v6141_v23 }
 0x6ca   : > { %3121 = vmatpush.msra.mxu1 %v2706_v33  ;;  %3144 = vmatpush.msra.mxu2 %v2707_v34  ;;  %v5624_v33 = vunpack.c.l.bf16 %v6133_v6  ;;  %v5720_v34 = vunpack.c.l.bf16 %v6157_v20  ;;  %v5673_v6 = vunpack.c.h.bf16 %v6145_v11 }
 0x6cb   : > { %3167 = vmatpush.msrb.mxu3 %v2708_v36  ;;  %3190 = vmatpush.msrb.mxu0 %v2709_v37  ;;  %v6148_v36 = vld [vmem:[%s7696_s14 + $0x98] sm:$0xff]   ;;  %v5656_v37 = vunpack.c.l.bf16 %v6141_v23 }
 0x6cc   : > { %3122 = vmatpush.msra.mxu1 %v2690_v38  ;;  %3145 = vmatpush.msra.mxu2 %v2691_v39  ;;  %v5688_v38 = vunpack.c.l.bf16 %v6149_v24  ;;  %v5621_v39 = vunpack.c.h.bf16 %v6132_v29  ;;  %v5685_v44 = vunpack.c.h.bf16 %v6148_v36  ;;  %v6176_v24 = vld [vmem:[%s7696_s14 + $0x178] sm:$0xff]   ;;  %v5672_v29 = vunpack.c.l.bf16 %v6145_v11 }
 0x6cd   : > { %3168 = vmatpush.msrb.mxu3 %v2692_v40  ;;  %3191 = vmatpush.msrb.mxu0 %v2693_v41  ;;  %v5717_v40 = vunpack.c.h.bf16 %v6156_v30  ;;  %v6131_v41 = vld [vmem:[%s7696_s14 + $0x10] sm:$0xff]   ;;  %v6172_v11 = vld [vmem:[%s7696_s14 + $0x158] sm:$0xff]  }
 0x6ce   : > { %5490 = vmatmul.msk.f32.gmra.mxu1 %vm2279_vm2, %v7860_v10  ;;  %5492 = vmatmul.msk.f32.gmra.mxu2 %vm2279_vm2, %v7860_v10 }
 0x6cf   : > { %5494 = vmatmul.msk.f32.gmra.mxu3 %vm2279_vm2, %v7860_v10  ;;  %5496 = vmatmul.msk.f32.gmra.mxu0 %vm2279_vm2, %v7860_v10 }
 0x6d0   : > { %3123 = vmatpush.msra.mxu1 %v2674_v46  ;;  %3146 = vmatpush.msra.mxu2 %v2675_v48  ;;  %v5716_v46 = vunpack.c.l.bf16 %v6156_v30  ;;  %v6139_v48 = vld [vmem:[%s7696_s14 + $0x50] sm:$0xff]  }
 0x6d1   : > { %3169 = vmatpush.msrb.mxu3 %v2676_v52  ;;  %3192 = vmatpush.msrb.mxu0 %v2677_v53  ;;  %v5684_v52 = vunpack.c.l.bf16 %v6148_v36  ;;  %v5617_v53 = vunpack.c.h.bf16 %v6131_v41  ;;  %v6175_v36 = vld [vmem:[%s7696_s14 + $0x170] sm:$0xff]  }
 0x6d2   : > { %3748 = vmatpush.msrb.mxu1 %v5637_v54  ;;  %3771 = vmatpush.msrb.mxu2 %v5669_v56  ;;  %v5713_v54 = vunpack.c.h.bf16 %v6155_v42  ;;  %v6154_v56 = vld [vmem:[%s7696_s14 + $0xc8] sm:$0xff]  }
 0x6d3   : > { %3817 = vmatpush.msra.mxu0 %v5733_v55  ;;  %3794 = vmatpush.msra.mxu3 %v5701_v57  ;;  %v6130_v55 = vld [vmem:[%s7696_s14 + $0x8] sm:$0xff]   ;;  %v5649_v57 = vunpack.c.h.bf16 %v6139_v48 }
 0x6d4   : > { %3749 = vmatpush.msrb.mxu1 %v5636_v58  ;;  %3772 = vmatpush.msrb.mxu2 %v5668_v62  ;;  %v5681_v58 = vunpack.c.h.bf16 %v6147_v50  ;;  %v6146_v62 = vld [vmem:[%s7696_s14 + $0x88] sm:$0xff]   ;;  %v5613_v1 = vunpack.c.h.bf16 %v6130_v55 }
 0x6d5   : > { %3818 = vmatpush.msra.mxu0 %v5732_v59  ;;  %3795 = vmatpush.msra.mxu3 %v5700_v63  ;;  %v5616_v59 = vunpack.c.l.bf16 %v6131_v41  ;;  %v5648_v63 = vunpack.c.l.bf16 %v6139_v48  ;;  %v6190_v41 = vld [vmem:[%s7696_s14 + $0x1e8] sm:$0xff]  }
 0x6d6   : > { %5497 = vmatmul.msk.f32.vlgmr.msra.gmra.mxu1 %vm2279_vm2, %v7843_v12  ;;  %5499 = vmatmul.msk.f32.vlgmr.msra.gmra.mxu2 %vm2279_vm2, %v7843_v12  ;;  %v5853_v48 = vunpack.c.h.bf16 %v6190_v41  ;;  %v6174_v50 = vld [vmem:[%s7696_s14 + $0x168] sm:$0xff]  }
 0x6d7   : > { %5501 = vmatmul.msk.f32.vlgmr.msrb.gmra.mxu3 %vm2279_vm2, %v7843_v12  ;;  %5503 = vmatmul.msk.f32.vlgmr.msrb.gmra.mxu0 %vm2279_vm2, %v7843_v12 }
 0x6d8   : > { %3750 = vmatpush.msrb.mxu1 %v5633_v2  ;;  %3819 = vmatpush.msra.mxu0 %v5729_v3  ;;  %v5709_v2 = vunpack.c.h.bf16 %v6154_v56  ;;  %v5607_v3 = vld [vmem:[%s7696_s14] sm:$0xff]  }
 0x6d9   : > { %3773 = vmatpush.msrb.mxu2 %v5665_v49  ;;  %3796 = vmatpush.msra.mxu3 %v5697_v7  ;;  %v5677_v49 = vunpack.c.h.bf16 %v6146_v62  ;;  %v5612_v7 = vunpack.c.l.bf16 %v6130_v55  ;;  %v5608_v20 = vunpack.c.l.bf16 %v5607_v3  ;;  %v6189_v55 = vld [vmem:[%s7696_s14 + $0x1e0] sm:$0xff]  }
 0x6da   : > { %3751 = vmatpush.msrb.mxu1 %v5632_v8  ;;  %3820 = vmatpush.msra.mxu0 %v5728_v9  ;;  %v5708_v8 = vunpack.c.l.bf16 %v6154_v56  ;;  %v6137_v9 = vld [vmem:[%s7696_s14 + $0x40] sm:$0xff]   ;;  %v5849_v61 = vunpack.c.h.bf16 %v6189_v55 }
 0x6db   : > { %3774 = vmatpush.msrb.mxu2 %v5664_v14  ;;  %3797 = vmatpush.msra.mxu3 %v5696_v15  ;;  %v5676_v14 = vunpack.c.l.bf16 %v6146_v62  ;;  %v5609_v15 = vunpack.c.h.bf16 %v5607_v3  ;;  %v6173_v62 = vld [vmem:[%s7696_s14 + $0x160] sm:$0xff]   ;;  %v6188_v3 = vld [vmem:[%s7696_s14 + $0x1d8] sm:$0xff]  }
 0x6dc   : > { %3752 = vmatpush.msrb.mxu1 %v5629_v16  ;;  %3821 = vmatpush.msra.mxu0 %v5725_v17  ;;  %v5705_v16 = vunpack.c.h.bf16 %v6153_v4  ;;  %v6168_v17 = vld [vmem:[%s7696_s14 + $0x138] sm:$0xff]  }
 0x6dd   : > { %3775 = vmatpush.msrb.mxu2 %v5661_v18  ;;  %3798 = vmatpush.msra.mxu3 %v5693_v19  ;;  %v6192_v18 = vld [vmem:[%s7696_s14 + $0x1f8] sm:$0xff]   ;;  %v5641_v19 = vunpack.c.h.bf16 %v6137_v9  ;;  %v5764_v30 = vunpack.c.l.bf16 %v6168_v17 }
 0x6de   : > { %5498 = vmatmul.msk.f32.gmra.mxu1 %vm2279_vm2, %v7860_v10  ;;  %5500 = vmatmul.msk.f32.gmra.mxu2 %vm2279_vm2, %v7860_v10  ;;  %v5861_v23 = vunpack.c.h.bf16 %v6192_v18 }
 0x6df   : > { %5502 = vmatmul.msk.f32.gmra.mxu3 %vm2279_vm2, %v7860_v10  ;;  %5504 = vmatmul.msk.f32.gmra.mxu0 %vm2279_vm2, %v7860_v10 }
 0x6e0   : > { %3753 = vmatpush.msrb.mxu1 %v5628_v21  ;;  %3822 = vmatpush.msra.mxu0 %v5724_v22  ;;  %v5704_v21 = vunpack.c.l.bf16 %v6153_v4  ;;  %v5765_v22 = vunpack.c.h.bf16 %v6168_v17  ;;  %v6187_v17 = vld [vmem:[%s7696_s14 + $0x1d0] sm:$0xff]  }
 0x6e1   : > { %3776 = vmatpush.msrb.mxu2 %v5660_v25  ;;  %3799 = vmatpush.msra.mxu3 %v5692_v26  ;;  %v6184_v25 = vld [vmem:[%s7696_s14 + $0x1b8] sm:$0xff]   ;;  %v6167_v26 = vld [vmem:[%s7696_s14 + $0x130] sm:$0xff]  }
 0x6e2   : > { %3754 = vmatpush.msrb.mxu1 %v5625_v27  ;;  %3823 = vmatpush.msra.mxu0 %v5721_v28  ;;  %v6191_v27 = vld [vmem:[%s7696_s14 + $0x1f0] sm:$0xff]   ;;  %v5640_v28 = vunpack.c.l.bf16 %v6137_v9  ;;  %v5760_v42 = vunpack.c.l.bf16 %v6167_v26  ;;  %v5845_v9 = vunpack.c.h.bf16 %v6188_v3 }
 0x6e3   : > { %3777 = vmatpush.msrb.mxu2 %v5657_v31  ;;  %3800 = vmatpush.msra.mxu3 %v5689_v32  ;;  %v5860_v31 = vunpack.c.l.bf16 %v6192_v18  ;;  %v5797_v32 = vunpack.c.h.bf16 %v6176_v24  ;;  %v5857_v35 = vunpack.c.h.bf16 %v6191_v27 }
 0x6e4   : > { %3755 = vmatpush.msrb.mxu1 %v5624_v33  ;;  %3824 = vmatpush.msra.mxu0 %v5720_v34  ;;  %v5829_v33 = vunpack.c.h.bf16 %v6184_v25  ;;  %v5761_v34 = vunpack.c.h.bf16 %v6167_v26  ;;  %v5780_v26 = vunpack.c.l.bf16 %v6172_v11 }
 0x6e5   : > { %3778 = vmatpush.msrb.mxu2 %v5656_v37  ;;  %3801 = vmatpush.msra.mxu3 %v5688_v38  ;;  %v6183_v37 = vld [vmem:[%s7696_s14 + $0x1b0] sm:$0xff]   ;;  %v6166_v38 = vld [vmem:[%s7696_s14 + $0x128] sm:$0xff]  }
 0x6e6   : > { %3756 = vmatpush.msrb.mxu1 %v5621_v39  ;;  %3825 = vmatpush.msra.mxu0 %v5717_v40  ;;  %v5796_v39 = vunpack.c.l.bf16 %v6176_v24  ;;  %v5828_v40 = vunpack.c.l.bf16 %v6184_v25  ;;  %v5756_v56 = vunpack.c.l.bf16 %v6166_v38  ;;  %v6179_v24 = vld [vmem:[%s7696_s14 + $0x190] sm:$0xff]   ;;  %v6162_v25 = vld [vmem:[%s7696_s14 + $0x108] sm:$0xff]  }
 0x6e7   : > { %3779 = vmatpush.msrb.mxu2 %v5653_v43  ;;  %3802 = vmatpush.msra.mxu3 %v5685_v44  ;;  %v5856_v43 = vunpack.c.l.bf16 %v6191_v27  ;;  %v5793_v44 = vunpack.c.h.bf16 %v6175_v36 }
 0x6e8   : > { %3757 = vmatpush.msrb.mxu1 %v5620_v45  ;;  %3826 = vmatpush.msra.mxu0 %v5716_v46  ;;  %v5825_v45 = vunpack.c.h.bf16 %v6183_v37  ;;  %v5757_v46 = vunpack.c.h.bf16 %v6166_v38 }
 0x6e9   : > { %3780 = vmatpush.msrb.mxu2 %v5652_v51  ;;  %3803 = vmatpush.msra.mxu3 %v5684_v52  ;;  %v6182_v51 = vld [vmem:[%s7696_s14 + $0x1a8] sm:$0xff]   ;;  %v6165_v52 = vld [vmem:[%s7696_s14 + $0x120] sm:$0xff]  }
 0x6ea   : > { %3758 = vmatpush.msrb.mxu1 %v5617_v53  ;;  %3827 = vmatpush.msra.mxu0 %v5713_v54  ;;  %v5792_v53 = vunpack.c.l.bf16 %v6175_v36  ;;  %v5824_v54 = vunpack.c.l.bf16 %v6183_v37  ;;  %v5752_v4 = vunpack.c.l.bf16 %v6165_v52  ;;  %v6178_v36 = vld [vmem:[%s7696_s14 + $0x188] sm:$0xff]   ;;  %v6161_v37 = vld [vmem:[%s7696_s14 + $0x100] sm:$0xff]  }
 0x6eb   : > { %3781 = vmatpush.msrb.mxu2 %v5649_v57  ;;  %3804 = vmatpush.msra.mxu3 %v5681_v58  ;;  %v5852_v57 = vunpack.c.l.bf16 %v6190_v41  ;;  %v5789_v58 = vunpack.c.h.bf16 %v6174_v50  ;;  %v5740_v41 = vunpack.c.l.bf16 %v6162_v25 }
 0x6ec   : > { %3759 = vmatpush.msrb.mxu1 %v5616_v59  ;;  %3828 = vmatpush.msra.mxu0 %v5712_v60  ;;  %v5821_v59 = vunpack.c.h.bf16 %v6182_v51  ;;  %v5753_v60 = vunpack.c.h.bf16 %v6165_v52  ;;  %v5804_v52 = vunpack.c.l.bf16 %v6178_v36 }
 0x6ed   : > { %3782 = vmatpush.msrb.mxu2 %v5648_v63  ;;  %3805 = vmatpush.msra.mxu3 %v5680_v0  ;;  %v6181_v63 = vld [vmem:[%s7696_s14 + $0x1a0] sm:$0xff]   ;;  %v6164_v0 = vld [vmem:[%s7696_s14 + $0x118] sm:$0xff]  }
 0x6ee   : > { %3760 = vmatpush.msrb.mxu1 %v5613_v1  ;;  %3829 = vmatpush.msra.mxu0 %v5709_v2  ;;  %v5788_v1 = vunpack.c.l.bf16 %v6174_v50  ;;  %v5820_v2 = vunpack.c.l.bf16 %v6182_v51  ;;  %v5748_v18 = vunpack.c.l.bf16 %v6164_v0  ;;  %v6177_v50 = vld [vmem:[%s7696_s14 + $0x180] sm:$0xff]  }
 0x6ef   : > { %3783 = vmatpush.msrb.mxu2 %v5645_v5  ;;  %3806 = vmatpush.msra.mxu3 %v5677_v49  ;;  %v5848_v5 = vunpack.c.l.bf16 %v6189_v55  ;;  %v5785_v49 = vunpack.c.h.bf16 %v6173_v62 }
 0x6f0   : > { %3761 = vmatpush.msrb.mxu1 %v5612_v7  ;;  %3830 = vmatpush.msra.mxu0 %v5708_v8  ;;  %v5817_v7 = vunpack.c.h.bf16 %v6181_v63  ;;  %v5749_v8 = vunpack.c.h.bf16 %v6164_v0  ;;  %v6224_v0 = vld [vmem:[%s7696_s14 + $0x2f8] sm:$0xff]  }
 0x6f1   : > { %3784 = vmatpush.msrb.mxu2 %v5644_v13  ;;  %3807 = vmatpush.msra.mxu3 %v5676_v14  ;;  %v6180_v13 = vld [vmem:[%s7696_s14 + $0x198] sm:$0xff]   ;;  %v6163_v14 = vld [vmem:[%s7696_s14 + $0x110] sm:$0xff]  }
 0x6f2   : > { %3762 = vmatpush.msrb.mxu1 %v5609_v15  ;;  %3831 = vmatpush.msra.mxu0 %v5705_v16  ;;  %v5784_v15 = vunpack.c.l.bf16 %v6173_v62  ;;  %v5816_v16 = vunpack.c.l.bf16 %v6181_v63  ;;  %v5812_v27 = vunpack.c.l.bf16 %v6180_v13  ;;  %v6200_v62 = vld [vmem:[%s7696_s14 + $0x238] sm:$0xff]  }
 0x6f3   : > { %3785 = vmatpush.msrb.mxu2 %v5641_v19  ;;  %3808 = vmatpush.msra.mxu3 %v5673_v6  ;;  %v5844_v19 = vunpack.c.l.bf16 %v6188_v3  ;;  %v5781_v6 = vunpack.c.h.bf16 %v6172_v11 }
 0x6f4   : > { %3763 = vmatpush.msrb.mxu1 %v5608_v20  ;;  %3832 = vmatpush.msra.mxu0 %v5704_v21  ;;  %v5813_v20 = vunpack.c.h.bf16 %v6180_v13  ;;  %v5745_v21 = vunpack.c.h.bf16 %v6163_v14  ;;  %v5892_v13 = vunpack.c.l.bf16 %v6200_v62 }
 0x6f5   : > { %3786 = vmatpush.msrb.mxu2 %v5640_v28  ;;  %3809 = vmatpush.msra.mxu3 %v5672_v29  ;;  %v6186_v28 = vld [vmem:[%s7696_s14 + $0x1c8] sm:$0xff]   ;;  %v5744_v29 = vunpack.c.l.bf16 %v6163_v14  ;;  %v6223_v14 = vld [vmem:[%s7696_s14 + $0x2f0] sm:$0xff]  }
 0x6f6   : > { %3840 = vmatpush.msra.mxu1 %v5765_v22  ;;  %3909 = vmatpush.msrb.mxu0 %v5861_v23  ;;  %v5841_v22 = vunpack.c.h.bf16 %v6187_v17  ;;  %v6171_v23 = vld [vmem:[%s7696_s14 + $0x150] sm:$0xff]  }
 0x6f7   : > { %3863 = vmatpush.msra.mxu2 %v5797_v32  ;;  %3886 = vmatpush.msrb.mxu3 %v5829_v33  ;;  %v5809_v32 = vunpack.c.h.bf16 %v6179_v24  ;;  %v5741_v33 = vunpack.c.h.bf16 %v6162_v25  ;;  %v5776_v38 = vunpack.c.l.bf16 %v6171_v23  ;;  %v6198_v25 = vld [vmem:[%s7696_s14 + $0x228] sm:$0xff]  }
 0x6f8   : > { %3841 = vmatpush.msra.mxu1 %v5764_v30  ;;  %3910 = vmatpush.msrb.mxu0 %v5860_v31  ;;  %v5840_v30 = vunpack.c.l.bf16 %v6187_v17  ;;  %v5777_v31 = vunpack.c.h.bf16 %v6171_v23 }
 0x6f9   : > { %3864 = vmatpush.msra.mxu2 %v5796_v39  ;;  %3887 = vmatpush.msrb.mxu3 %v5828_v40  ;;  %v5808_v39 = vunpack.c.l.bf16 %v6179_v24  ;;  %v6185_v40 = vld [vmem:[%s7696_s14 + $0x1c0] sm:$0xff]  }
 0x6fa   : > { %3842 = vmatpush.msra.mxu1 %v5761_v34  ;;  %3911 = vmatpush.msrb.mxu0 %v5857_v35  ;;  %v5837_v34 = vunpack.c.h.bf16 %v6186_v28  ;;  %v6170_v35 = vld [vmem:[%s7696_s14 + $0x148] sm:$0xff]  }
 0x6fb   : > { %3865 = vmatpush.msra.mxu2 %v5793_v44  ;;  %3888 = vmatpush.msrb.mxu3 %v5825_v45  ;;  %v5805_v44 = vunpack.c.h.bf16 %v6178_v36  ;;  %v5737_v45 = vunpack.c.h.bf16 %v6161_v37  ;;  %v5772_v51 = vunpack.c.l.bf16 %v6170_v35  ;;  %v5885_v36 = vunpack.c.h.bf16 %v6198_v25 }
 0x6fc   : > { %3843 = vmatpush.msra.mxu1 %v5760_v42  ;;  %3912 = vmatpush.msrb.mxu0 %v5856_v43  ;;  %v5836_v42 = vunpack.c.l.bf16 %v6186_v28  ;;  %v5773_v43 = vunpack.c.h.bf16 %v6170_v35 }
 0x6fd   : > { %3866 = vmatpush.msra.mxu2 %v5792_v53  ;;  %3889 = vmatpush.msrb.mxu3 %v5824_v54  ;;  %v5736_v53 = vunpack.c.l.bf16 %v6161_v37  ;;  %v5832_v54 = vunpack.c.l.bf16 %v6185_v40  ;;  %v6207_v37 = vld [vmem:[%s7696_s14 + $0x270] sm:$0xff]  }
 0x6fe   : > { %3844 = vmatpush.msra.mxu1 %v5757_v46  ;;  %3913 = vmatpush.msrb.mxu0 %v5853_v48  ;;  %v5833_v46 = vunpack.c.h.bf16 %v6185_v40  ;;  %v6169_v48 = vld [vmem:[%s7696_s14 + $0x140] sm:$0xff]  }
 0x6ff   : > { %3867 = vmatpush.msra.mxu2 %v5789_v58  ;;  %3890 = vmatpush.msrb.mxu3 %v5821_v59  ;;  %v5769_v55 = vunpack.c.h.bf16 %v6169_v48  ;;  %v5800_v58 = vunpack.c.l.bf16 %v6177_v50  ;;  %v8006_v59 = vld [vmem:[%s7692_s30] sm:$0xff] }
 0x700   : > { %3845 = vmatpush.msra.mxu1 %v5756_v56  ;;  %3914 = vmatpush.msrb.mxu0 %v5852_v57  ;;  %v5801_v56 = vunpack.c.h.bf16 %v6177_v50  ;;  %v5768_v57 = vunpack.c.l.bf16 %v6169_v48  ;;  %v2796_v11 = vperm.slane %v8006_v59, 2  ;;  %v5921_v48 = vunpack.c.h.bf16 %v6207_v37 }
 0x701   : > { %3868 = vmatpush.msra.mxu2 %v5788_v1  ;;  %3891 = vmatpush.msrb.mxu3 %v5820_v2 }
 0x702   : > { %3846 = vmatpush.msra.mxu1 %v5753_v60  ;;  %3915 = vmatpush.msrb.mxu0 %v5849_v61  ;;  %v2794_v60 = vperm.slane %v8006_v59, 0  ;;  %v2797_v61 = vperm.slane %v8006_v59, 3 }
 0x703   : > { %3869 = vmatpush.msra.mxu2 %v5785_v49  ;;  %3892 = vmatpush.msrb.mxu3 %v5817_v7  ;;  %v5989_v49 = vunpack.c.h.bf16 %v6224_v0  ;;  %v2795_v7 = vperm.slane %v8006_v59, 1 }
 0x704   : > { %3847 = vmatpush.msra.mxu1 %v5752_v4  ;;  %3916 = vmatpush.msrb.mxu0 %v5848_v5  ;;  %v5893_v4 = vunpack.c.h.bf16 %v6200_v62  ;;  %v6206_v62 = vld [vmem:[%s7696_s14 + $0x268] sm:$0xff]  }
 0x705   : > { %3870 = vmatpush.msra.mxu2 %v5784_v15  ;;  %3893 = vmatpush.msrb.mxu3 %v5816_v16  ;;  %v5988_v15 = vunpack.c.l.bf16 %v6224_v0 }
 0x706   : > { %3848 = vmatpush.msra.mxu1 %v5749_v8  ;;  %3917 = vmatpush.msrb.mxu0 %v5845_v9  ;;  %v6199_v8 = vld [vmem:[%s7696_s14 + $0x230] sm:$0xff]  }
 0x707   : > { %3871 = vmatpush.msra.mxu2 %v5781_v6  ;;  %3894 = vmatpush.msrb.mxu3 %v5813_v20  ;;  %v5889_v17 = vunpack.c.h.bf16 %v6199_v8  ;;  %v5888_v24 = vunpack.c.l.bf16 %v6199_v8  ;;  %v5917_v8 = vunpack.c.h.bf16 %v6206_v62 }
 0x708   : > { %3849 = vmatpush.msra.mxu1 %v5748_v18  ;;  %3918 = vmatpush.msrb.mxu0 %v5844_v19  ;;  %v6208_v18 = vld [vmem:[%s7696_s14 + $0x278] sm:$0xff]  }
 0x709   : > { %3872 = vmatpush.msra.mxu2 %v5780_v26  ;;  %3895 = vmatpush.msrb.mxu3 %v5812_v27  ;;  %v6216_v19 = vld [vmem:[%s7696_s14 + $0x2b8] sm:$0xff]   ;;  %v5924_v40 = vunpack.c.l.bf16 %v6208_v18 }
 0x70a   : > { %3850 = vmatpush.msra.mxu1 %v5745_v21  ;;  %3919 = vmatpush.msrb.mxu0 %v5841_v22  ;;  %v5985_v21 = vunpack.c.h.bf16 %v6223_v14 }
 0x70b   : > { %3873 = vmatpush.msra.mxu2 %v5777_v31  ;;  %3896 = vmatpush.msrb.mxu3 %v5809_v32 }
 0x70c   : > { %3851 = vmatpush.msra.mxu1 %v5744_v29  ;;  %3920 = vmatpush.msrb.mxu0 %v5840_v30  ;;  %v5925_v29 = vunpack.c.h.bf16 %v6208_v18  ;;  %v5957_v30 = vunpack.c.h.bf16 %v6216_v19 }
 0x70d   : > { %3874 = vmatpush.msra.mxu2 %v5776_v38  ;;  %3897 = vmatpush.msrb.mxu3 %v5808_v39  ;;  %v6215_v38 = vld [vmem:[%s7696_s14 + $0x2b0] sm:$0xff]  }
 0x70e   : > { %3852 = vmatpush.msra.mxu1 %v5741_v33  ;;  %3921 = vmatpush.msrb.mxu0 %v5837_v34  ;;  %v5984_v33 = vunpack.c.l.bf16 %v6223_v14  ;;  %v6222_v34 = vld [vmem:[%s7696_s14 + $0x2e8] sm:$0xff]   ;;  %v5953_v50 = vunpack.c.h.bf16 %v6215_v38 }
 0x70f   : > { %3875 = vmatpush.msra.mxu2 %v5773_v43  ;;  %3898 = vmatpush.msrb.mxu3 %v5805_v44  ;;  %v5981_v43 = vunpack.c.h.bf16 %v6222_v34  ;;  %v5884_v44 = vunpack.c.l.bf16 %v6198_v25 }
 0x710   : > { %3853 = vmatpush.msra.mxu1 %v5740_v41  ;;  %3922 = vmatpush.msrb.mxu0 %v5836_v42  ;;  %v5956_v41 = vunpack.c.l.bf16 %v6216_v19  ;;  %v6197_v42 = vld [vmem:[%s7696_s14 + $0x220] sm:$0xff]  }
 0x711   : > { %3876 = vmatpush.msra.mxu2 %v5772_v51  ;;  %3899 = vmatpush.msrb.mxu3 %v5804_v52  ;;  %v2801_v51 = vperm.slane %v8006_v59, 7  ;;  %v6221_v52 = vld [vmem:[%s7696_s14 + $0x2e0] sm:$0xff]  }
 0x712   : > { %3854 = vmatpush.msra.mxu1 %v5737_v45  ;;  %3923 = vmatpush.msrb.mxu0 %v5833_v46  ;;  %v2798_v45 = vperm.slane %v8006_v59, 4  ;;  %v5976_v14 = vunpack.c.l.bf16 %v6221_v52  ;;  %v6205_v19 = vld [vmem:[%s7696_s14 + $0x260] sm:$0xff]  }
 0x713   : > { %3877 = vmatpush.msra.mxu2 %v5769_v55  ;;  %3900 = vmatpush.msrb.mxu3 %v5801_v56  ;;  %v5980_v55 = vunpack.c.l.bf16 %v6222_v34  ;;  %v5881_v56 = vunpack.c.h.bf16 %v6197_v42 }
 0x714   : > { %3855 = vmatpush.msra.mxu1 %v5736_v53  ;;  %3924 = vmatpush.msrb.mxu0 %v5832_v54 }
 0x715   : > { %3878 = vmatpush.msra.mxu2 %v5768_v57  ;;  %3901 = vmatpush.msrb.mxu3 %v5800_v58 }
 0x723   : > { %v2849_v63 = vpop.f32.mrf.mxu1 }
 0x724   : > { %v2850_v1 = vadd.f32 %v2849_v63, %v2794_v60  ;;  %v2918_v2 = vpop.f32.mrf.mxu0  ;;  %v6214_v63 = vld [vmem:[%s7696_s14 + $0x2a8] sm:$0xff]  }
 0x725   : > { %v2919_v3 = vadd.f32 %v2918_v2, %v2797_v61 }
 0x726   : > { %v3200_v5 = vmax.f32 %v2850_v1, 0.0 }
 0x727   : > { %v3203_v9 = vmax.f32 %v2919_v3, 0.0  ;;  %v5977_v3 = vunpack.c.h.bf16 %v6221_v52 }
 0x728   : > { %3764 = vmatmul.f32.vlgmr.msrb.gmra.mxu1 %v3200_v5 }
 0x729   : > { %3833 = vmatmul.f32.vlgmr.msra.gmra.mxu0 %v3203_v9  ;;  %3932 = vmatpush.msrb.mxu1 %v5893_v4  ;;  %v2872_v16 = vpop.f32.mrf.mxu2  ;;  %v5949_v9 = vunpack.c.h.bf16 %v6214_v63 }
 0x72a   : > { %4001 = vmatpush.msra.mxu0 %v5989_v49  ;;  %v2873_v6 = vadd.f32 %v2872_v16, %v2795_v7  ;;  %v2895_v20 = vpop.f32.mrf.mxu3  ;;  %v5880_v49 = vunpack.c.l.bf16 %v6197_v42  ;;  %v2800_v16 = vperm.slane %v8006_v59, 6 }
 0x72b   : > { %v2896_v22 = vadd.f32 %v2895_v20, %v2796_v11  ;;  %3933 = vmatpush.msrb.mxu1 %v5892_v13  ;;  %v2852_v23 = vpop.f32.mrf.mxu1  ;;  %v5916_v20 = vunpack.c.l.bf16 %v6206_v62 }
 0x72c   : > { %v3201_v26 = vmax.f32 %v2873_v6, 0.0  ;;  %4002 = vmatpush.msra.mxu0 %v5988_v15  ;;  %v2853_v27 = vadd.f32 %v2852_v23, %v2794_v60  ;;  %v2921_v28 = vpop.f32.mrf.mxu0  ;;  %v5920_v60 = vunpack.c.l.bf16 %v6207_v37  ;;  %v6220_v15 = vld [vmem:[%s7696_s14 + $0x2d8] sm:$0xff]   ;;  %v6213_v6 = vld [vmem:[%s7696_s14 + $0x2a0] sm:$0xff]   ;;  %v6195_v23 = vld [vmem:[%s7696_s14 + $0x210] sm:$0xff]   ;;  %v5912_v37 = vunpack.c.l.bf16 %v6205_v19 }
 0x72d   : > { %v3202_v31 = vmax.f32 %v2896_v22, 0.0  ;;  %v2922_v32 = vadd.f32 %v2921_v28, %v2797_v61  ;;  %3934 = vmatpush.msrb.mxu1 %v5889_v17  ;;  %v5952_v61 = vunpack.c.l.bf16 %v6215_v38  ;;  %v5944_v38 = vunpack.c.l.bf16 %v6213_v6 }
 0x72e   : > { %v3216_v35 = vmax.f32 %v2853_v27, 0.0  ;;  %4003 = vmatpush.msra.mxu0 %v5985_v21  ;;  %3787 = vmatmul.f32.vlgmr.msrb.gmra.mxu2 %v3201_v26  ;;  %v5948_v21 = vunpack.c.l.bf16 %v6214_v63 }
 0x72f   : > { %v3219_v39 = vmax.f32 %v2922_v32, 0.0  ;;  %3810 = vmatmul.f32.vlgmr.msra.gmra.mxu3 %v3202_v31  ;;  %3935 = vmatpush.msrb.mxu1 %v5888_v24  ;;  %v5973_v24 = vunpack.c.h.bf16 %v6220_v15  ;;  %v6219_v32 = vld [vmem:[%s7696_s14 + $0x2d0] sm:$0xff]  }
 0x730   : > { %3955 = vmatpush.msrb.mxu2 %v5925_v29  ;;  %3978 = vmatpush.msra.mxu3 %v5957_v30  ;;  %v5913_v29 = vunpack.c.h.bf16 %v6205_v19  ;;  %v5945_v30 = vunpack.c.h.bf16 %v6213_v6 }
 0x731   : > { %4004 = vmatpush.msra.mxu0 %v5984_v33  ;;  %3767 = vmatmul.f32.gmra.mxu1 %v3216_v35  ;;  %v2875_v46 = vpop.f32.mrf.mxu2  ;;  %v5972_v33 = vunpack.c.l.bf16 %v6220_v15  ;;  %v5873_v35 = vunpack.c.h.bf16 %v6195_v23 }
 0x732   : > { %3836 = vmatmul.f32.gmra.mxu0 %v3219_v39  ;;  %3936 = vmatpush.msrb.mxu1 %v5885_v36  ;;  %v2876_v53 = vadd.f32 %v2875_v46, %v2795_v7  ;;  %v2898_v54 = vpop.f32.mrf.mxu3  ;;  %v6196_v7 = vld [vmem:[%s7696_s14 + $0x218] sm:$0xff]   ;;  %v5872_v46 = vunpack.c.l.bf16 %v6195_v23 }
 0x733   : > { %3956 = vmatpush.msrb.mxu2 %v5924_v40  ;;  %3979 = vmatpush.msra.mxu3 %v5956_v41  ;;  %v2899_v57 = vadd.f32 %v2898_v54, %v2796_v11  ;;  %v2941_v58 = vpop.f32.mrf.mxu1  ;;  %v2799_v11 = vperm.slane %v8006_v59, 5  ;;  %v5877_v18 = vunpack.c.h.bf16 %v6196_v7  ;;  %v5876_v27 = vunpack.c.l.bf16 %v6196_v7  ;;  %v6204_v39 = vld [vmem:[%s7696_s14 + $0x258] sm:$0xff]   ;;  %v6218_v54 = vld [vmem:[%s7696_s14 + $0x2c8] sm:$0xff]  }
 0x734   : > { %4005 = vmatpush.msra.mxu0 %v5981_v43  ;;  %v3217_v0 = vmax.f32 %v2876_v53, 0.0  ;;  %3937 = vmatpush.msrb.mxu1 %v5884_v44  ;;  %v2942_v1 = vadd.f32 %v2941_v58, %v2798_v45  ;;  %v3010_v2 = vpop.f32.mrf.mxu0  ;;  %v6212_v40 = vld [vmem:[%s7696_s14 + $0x298] sm:$0xff]   ;;  %v5969_v43 = vunpack.c.h.bf16 %v6219_v32  ;;  %v5968_v53 = vunpack.c.l.bf16 %v6219_v32 }
 0x735   : > { %v3218_v4 = vmax.f32 %v2899_v57, 0.0  ;;  %3957 = vmatpush.msrb.mxu2 %v5921_v48  ;;  %3980 = vmatpush.msra.mxu3 %v5953_v50  ;;  %v3011_v5 = vadd.f32 %v3010_v2, %v2801_v51  ;;  %v6194_v48 = vld [vmem:[%s7696_s14 + $0x208] sm:$0xff]   ;;  %v5941_v50 = vunpack.c.h.bf16 %v6212_v40  ;;  %v5908_v62 = vunpack.c.l.bf16 %v6204_v39 }
 0x736   : > { %4006 = vmatpush.msra.mxu0 %v5980_v55  ;;  %3938 = vmatpush.msrb.mxu1 %v5881_v56  ;;  %v3204_v13 = vmax.f32 %v2942_v1, 0.0  ;;  %v8057_v55 = vld [vmem:[%s7692_s30 + $0x8] sm:$0xff]  ;;  %v5869_v57 = vunpack.c.h.bf16 %v6194_v48  ;;  %v5940_v63 = vunpack.c.l.bf16 %v6212_v40  ;;  %v5965_v1 = vunpack.c.h.bf16 %v6218_v54  ;;  %s8458_s30 = sld [smem:[#allocation61_spill]] (!%p5505_p2) }
 0x737   : > { %3958 = vmatpush.msrb.mxu2 %v5920_v60  ;;  %3981 = vmatpush.msra.mxu3 %v5952_v61  ;;  %v3207_v17 = vmax.f32 %v3011_v5, 0.0  ;;  %v6203_v60 = vld [vmem:[%s7696_s14 + $0x250] sm:$0xff]   ;;  %v2803_v32 = vperm.slane %v8057_v55, 1 }
 0x738   : > { %4007 = vmatpush.msra.mxu0 %v5977_v3  ;;  %3790 = vmatmul.f32.gmra.mxu2 %v3217_v0  ;;  %v6211_v61 = vld [vmem:[%s7696_s14 + $0x290] sm:$0xff]   ;;  %v6193_v0 = vld [vmem:[%s7696_s14 + $0x200] sm:$0xff]   ;;  %v5868_v3 = vunpack.c.l.bf16 %v6194_v48 }
 0x739   : > { %3813 = vmatmul.f32.gmra.mxu3 %v3218_v4  ;;  %3939 = vmatpush.msrb.mxu1 %v5880_v49  ;;  %v2964_v22 = vpop.f32.mrf.mxu2  ;;  %v2802_v4 = vperm.slane %v8057_v55, 0  ;;  %v5905_v49 = vunpack.c.h.bf16 %v6203_v60  ;;  %v5937_v7 = vunpack.c.h.bf16 %v6211_v61  ;;  %v5936_v59 = vunpack.c.l.bf16 %v6211_v61 }
 0x73a   : > { %3959 = vmatpush.msrb.mxu2 %v5917_v8  ;;  %3982 = vmatpush.msra.mxu3 %v5949_v9  ;;  %v2965_v25 = vadd.f32 %v2964_v22, %v2799_v11  ;;  %v2987_v26 = vpop.f32.mrf.mxu3  ;;  %v6217_v9 = vld [vmem:[%s7696_s14 + $0x2c0] sm:$0xff]   ;;  %v5864_v23 = vunpack.c.l.bf16 %v6193_v0 }
 0x73b   : > { %4008 = vmatpush.msra.mxu0 %v5976_v14  ;;  %3856 = vmatmul.f32.vlgmr.msra.gmra.mxu1 %v3204_v13  ;;  %v2988_v28 = vadd.f32 %v2987_v26, %v2800_v16  ;;  %v2944_v31 = vpop.f32.mrf.mxu1  ;;  %v5964_v13 = vunpack.c.l.bf16 %v6218_v54  ;;  %v5865_v14 = vunpack.c.h.bf16 %v6193_v0  ;;  %v6248_v54 = vld [vmem:[%s7696_s14 + $0x3b8] sm:$0xff]  }
 0x73c   : > { %3925 = vmatmul.f32.vlgmr.msrb.gmra.mxu0 %v3207_v17  ;;  %3940 = vmatpush.msrb.mxu1 %v5877_v18  ;;  %v3013_v34 = vpop.f32.mrf.mxu0  ;;  %v2945_v36 = vadd.f32 %v2944_v31, %v2798_v45  ;;  %v3205_v41 = vmax.f32 %v2965_v25, 0.0  ;;  %v5909_v45 = vunpack.c.h.bf16 %v6204_v39  ;;  %v5904_v17 = vunpack.c.l.bf16 %v6203_v60  ;;  %v6202_v18 = vld [vmem:[%s7696_s14 + $0x248] sm:$0xff]   ;;  %v6231_v39 = vld [vmem:[%s7696_s14 + $0x330] sm:$0xff]  }
 0x73d   : > { %3960 = vmatpush.msrb.mxu2 %v5916_v20  ;;  %3983 = vmatpush.msra.mxu3 %v5948_v21  ;;  %v3014_v42 = vadd.f32 %v3013_v34, %v2801_v51  ;;  %v3206_v44 = vmax.f32 %v2988_v28, 0.0  ;;  %v5961_v20 = vunpack.c.h.bf16 %v6217_v9  ;;  %v6232_v21 = vld [vmem:[%s7696_s14 + $0x338] sm:$0xff]   ;;  %v5901_v26 = vunpack.c.h.bf16 %v6202_v18 }
 0x73e   : > { %4009 = vmatpush.msra.mxu0 %v5973_v24  ;;  %3941 = vmatpush.msrb.mxu1 %v5876_v27  ;;  %v3220_v52 = vmax.f32 %v2945_v36, 0.0  ;;  %v6256_v24 = vld [vmem:[%s7696_s14 + $0x3f8] sm:$0xff]   ;;  %v5960_v28 = vunpack.c.l.bf16 %v6217_v9  ;;  %v5900_v34 = vunpack.c.l.bf16 %v6202_v18  ;;  %v6016_v61 = vunpack.c.l.bf16 %v6231_v39 }
 0x73f   : > { %3961 = vmatpush.msrb.mxu2 %v5913_v29  ;;  %3984 = vmatpush.msra.mxu3 %v5945_v30  ;;  %v3223_v56 = vmax.f32 %v3014_v42, 0.0  ;;  %v6021_v29 = vunpack.c.h.bf16 %v6232_v21  ;;  %v6117_v31 = vunpack.c.h.bf16 %v6256_v24  ;;  %v6020_v42 = vunpack.c.l.bf16 %v6232_v21  ;;  %v6253_v21 = vld [vmem:[%s7696_s14 + $0x3e0] sm:$0xff]  }
 0x740   : > { %4010 = vmatpush.msra.mxu0 %v5972_v33  ;;  %3942 = vmatpush.msrb.mxu1 %v5873_v35  ;;  %v6201_v33 = vld [vmem:[%s7696_s14 + $0x240] sm:$0xff]   ;;  %v6084_v9 = vunpack.c.l.bf16 %v6248_v54 }
 0x741   : > { %3962 = vmatpush.msrb.mxu2 %v5912_v37  ;;  %3985 = vmatpush.msra.mxu3 %v5944_v38  ;;  %v2967_v51 = vpop.f32.mrf.mxu2  ;;  %v2804_v37 = vperm.slane %v8057_v55, 2  ;;  %v6209_v38 = vld [vmem:[%s7696_s14 + $0x280] sm:$0xff]  }
 0x742   : > { %4011 = vmatpush.msra.mxu0 %v5969_v43  ;;  %3879 = vmatmul.f32.vlgmr.msra.gmra.mxu2 %v3205_v41  ;;  %v2990_v58 = vpop.f32.mrf.mxu3  ;;  %v2968_v2 = vadd.f32 %v2967_v51, %v2799_v11  ;;  %v2805_v11 = vperm.slane %v8057_v55, 3  ;;  %v6255_v43 = vld [vmem:[%s7696_s14 + $0x3f0] sm:$0xff]   ;;  %v5928_v60 = vunpack.c.l.bf16 %v6209_v38 }
 0x743   : > { %3902 = vmatmul.f32.vlgmr.msrb.gmra.mxu3 %v3206_v44  ;;  %3943 = vmatpush.msrb.mxu1 %v5872_v46  ;;  %v2991_v5 = vadd.f32 %v2990_v58, %v2800_v16  ;;  %v3033_v8 = vpop.f32.mrf.mxu1  ;;  %v6210_v16 = vld [vmem:[%s7696_s14 + $0x288] sm:$0xff]   ;;  %v6116_v44 = vunpack.c.l.bf16 %v6256_v24  ;;  %v5897_v46 = vunpack.c.h.bf16 %v6201_v33  ;;  %v5896_v58 = vunpack.c.l.bf16 %v6201_v33  ;;  %v6228_v33 = vld [vmem:[%s7696_s14 + $0x318] sm:$0xff]  }
 0x744   : > { %3963 = vmatpush.msrb.mxu2 %v5909_v45  ;;  %3986 = vmatpush.msra.mxu3 %v5941_v50  ;;  %v3102_v15 = vpop.f32.mrf.mxu0  ;;  %v3221_v19 = vmax.f32 %v2968_v2, 0.0  ;;  %v3034_v6 = vadd.f32 %v3033_v8, %v2802_v4  ;;  %v5933_v27 = vunpack.c.h.bf16 %v6210_v16  ;;  %v5932_v35 = vunpack.c.l.bf16 %v6210_v16 }
 0x745   : > { %4012 = vmatpush.msra.mxu0 %v5968_v53  ;;  %3859 = vmatmul.f32.gmra.mxu1 %v3220_v52  ;;  %v3222_v22 = vmax.f32 %v2991_v5, 0.0  ;;  %v3103_v25 = vadd.f32 %v3102_v15, %v2805_v11  ;;  %v5929_v45 = vunpack.c.h.bf16 %v6209_v38  ;;  %v6017_v52 = vunpack.c.h.bf16 %v6231_v39  ;;  %v6240_v53 = vld [vmem:[%s7696_s14 + $0x378] sm:$0xff]  }
 0x746   : > { %3928 = vmatmul.f32.gmra.mxu0 %v3223_v56  ;;  %3944 = vmatpush.msrb.mxu1 %v5869_v57  ;;  %v3208_v30 = vmax.f32 %v3034_v6, 0.0  ;;  %v6113_v57 = vunpack.c.h.bf16 %v6255_v43  ;;  %v6053_v0 = vunpack.c.h.bf16 %v6240_v53  ;;  %v6112_v5 = vunpack.c.l.bf16 %v6255_v43 }
 0x747   : > { %3964 = vmatpush.msrb.mxu2 %v5908_v62  ;;  %3987 = vmatpush.msra.mxu3 %v5940_v63  ;;  %v3211_v40 = vmax.f32 %v3103_v25, 0.0  ;;  %v6230_v62 = vld [vmem:[%s7696_s14 + $0x328] sm:$0xff]   ;;  %v6005_v39 = vunpack.c.h.bf16 %v6228_v33 }
 0x748   : > { %4013 = vmatpush.msra.mxu0 %v5965_v1  ;;  %3945 = vmatpush.msrb.mxu1 %v5868_v3  ;;  %v6085_v1 = vunpack.c.h.bf16 %v6248_v54  ;;  %v6013_v8 = vunpack.c.h.bf16 %v6230_v62  ;;  %v6238_v25 = vld [vmem:[%s7696_s14 + $0x368] sm:$0xff]  }
 0x749   : > { %3965 = vmatpush.msrb.mxu2 %v5905_v49  ;;  %3988 = vmatpush.msra.mxu3 %v5937_v7  ;;  %v3056_v36 = vpop.f32.mrf.mxu2  ;;  %v6254_v49 = vld [vmem:[%s7696_s14 + $0x3e8] sm:$0xff]  }
 0x74a   : > { %4014 = vmatpush.msra.mxu0 %v5964_v13  ;;  %3946 = vmatpush.msrb.mxu1 %v5865_v14  ;;  %v3079_v41 = vpop.f32.mrf.mxu3  ;;  %v3057_v48 = vadd.f32 %v3056_v36, %v2803_v32  ;;  %v6239_v13 = vld [vmem:[%s7696_s14 + $0x370] sm:$0xff]   ;;  %v6104_v36 = vunpack.c.l.bf16 %v6253_v21 }
 0x74b   : > { %3966 = vmatpush.msrb.mxu2 %v5904_v17  ;;  %3989 = vmatpush.msra.mxu3 %v5936_v59  ;;  %v3036_v50 = vpop.f32.mrf.mxu1  ;;  %v3080_v51 = vadd.f32 %v3079_v41, %v2804_v37  ;;  %v6247_v14 = vld [vmem:[%s7696_s14 + $0x3b0] sm:$0xff]   ;;  %v6109_v17 = vunpack.c.h.bf16 %v6254_v49  ;;  %v6229_v59 = vld [vmem:[%s7696_s14 + $0x320] sm:$0xff]   ;;  %v6049_v6 = vunpack.c.h.bf16 %v6239_v13 }
 0x74c   : > { %4015 = vmatpush.msra.mxu0 %v5961_v20  ;;  %3882 = vmatmul.f32.gmra.mxu2 %v3221_v19  ;;  %v3105_v56 = vpop.f32.mrf.mxu0  ;;  %v3037_v63 = vadd.f32 %v3036_v50, %v2802_v4  ;;  %v3209_v2 = vmax.f32 %v3057_v48, 0.0  ;;  %v6052_v4 = vunpack.c.l.bf16 %v6240_v53  ;;  %v6012_v19 = vunpack.c.l.bf16 %v6230_v62  ;;  %v6245_v41 = vld [vmem:[%s7696_s14 + $0x3a0] sm:$0xff]  }
 0x74d   : > { %3905 = vmatmul.f32.gmra.mxu3 %v3222_v22  ;;  %3947 = vmatpush.msrb.mxu1 %v5864_v23  ;;  %v3106_v3 = vadd.f32 %v3105_v56, %v2805_v11  ;;  %v3210_v7 = vmax.f32 %v3080_v51, 0.0  ;;  %v6081_v20 = vunpack.c.h.bf16 %v6247_v14  ;;  %v6108_v23 = vunpack.c.l.bf16 %v6254_v49  ;;  %v6236_v51 = vld [vmem:[%s7696_s14 + $0x358] sm:$0xff]   ;;  %v6243_v49 = vld [vmem:[%s7696_s14 + $0x390] sm:$0xff]  }
 0x74e   : > { %3967 = vmatpush.msrb.mxu2 %v5901_v26  ;;  %3990 = vmatpush.msra.mxu3 %v5933_v27  ;;  %v3224_v15 = vmax.f32 %v3037_v63, 0.0  ;;  %v6009_v24 = vunpack.c.h.bf16 %v6229_v59  ;;  %v6246_v26 = vld [vmem:[%s7696_s14 + $0x3a8] sm:$0xff]   ;;  %v6004_v48 = vunpack.c.l.bf16 %v6228_v33  ;;  %v6073_v50 = vunpack.c.h.bf16 %v6245_v41  ;;  %v6244_v56 = vld [vmem:[%s7696_s14 + $0x398] sm:$0xff]  }
 0x74f   : > { %4016 = vmatpush.msra.mxu0 %v5960_v28  ;;  %4024 = vmatpush.msra.mxu1 %v6021_v29  ;;  %v3227_v18 = vmax.f32 %v3106_v3, 0.0  ;;  %v6048_v28 = vunpack.c.l.bf16 %v6239_v13  ;;  %v6080_v29 = vunpack.c.l.bf16 %v6247_v14  ;;  %v6076_v43 = vunpack.c.l.bf16 %v6246_v26 }
 0x750   : > { %3948 = vmatmul.f32.vlgmr.msrb.gmra.mxu1 %v3208_v30  ;;  %3968 = vmatpush.msrb.mxu2 %v5900_v34  ;;  %v6105_v30 = vunpack.c.h.bf16 %v6253_v21  ;;  %v6077_v34 = vunpack.c.h.bf16 %v6246_v26  ;;  %v6037_v63 = vunpack.c.h.bf16 %v6236_v51  ;;  %v2806_v13 = vperm.slane %v8057_v55, 4  ;;  %v6242_v21 = vld [vmem:[%s7696_s14 + $0x388] sm:$0xff]  }
 0x751   : > { %4093 = vmatpush.msrb.mxu0 %v6117_v31  ;;  %3991 = vmatpush.msra.mxu3 %v5932_v35  ;;  %v3059_v11 = vpop.f32.mrf.mxu2  ;;  %v6008_v31 = vunpack.c.l.bf16 %v6229_v59 }
 0x752   : > { %4017 = vmatmul.f32.vlgmr.msra.gmra.mxu0 %v3211_v40  ;;  %4025 = vmatpush.msra.mxu1 %v6020_v42  ;;  %v3082_v16 = vpop.f32.mrf.mxu3  ;;  %v3060_v22 = vadd.f32 %v3059_v11, %v2803_v32  ;;  %v6045_v32 = vunpack.c.h.bf16 %v6238_v25  ;;  %v6237_v40 = vld [vmem:[%s7696_s14 + $0x360] sm:$0xff]   ;;  %v6044_v42 = vunpack.c.l.bf16 %v6238_v25  ;;  %v2809_v11 = vperm.slane %v8057_v55, 7 }
 0x753   : > { %4094 = vmatpush.msrb.mxu0 %v6116_v44  ;;  %3969 = vmatpush.msrb.mxu2 %v5897_v46  ;;  %v3083_v27 = vadd.f32 %v3082_v16, %v2804_v37  ;;  %v6252_v37 = vld [vmem:[%s7696_s14 + $0x3d8] sm:$0xff]   ;;  %v6227_v44 = vld [vmem:[%s7696_s14 + $0x310] sm:$0xff]   ;;  %v6249_v16 = vld [vmem:[%s7696_s14 + $0x3c0] sm:$0xff]  }
 0x754   : > { %3992 = vmatpush.msra.mxu3 %v5929_v45  ;;  %4026 = vmatpush.msra.mxu1 %v6017_v52  ;;  %v3225_v35 = vmax.f32 %v3060_v22, 0.0  ;;  %v6101_v46 = vunpack.c.h.bf16 %v6252_v37  ;;  %v6041_v45 = vunpack.c.h.bf16 %v6237_v40  ;;  %v6251_v52 = vld [vmem:[%s7696_s14 + $0x3d0] sm:$0xff]   ;;  %v6100_v53 = vunpack.c.l.bf16 %v6252_v37  ;;  %v3194_v14 = vpop.f32.mrf.mxu0  ;;  %v6241_v37 = vld [vmem:[%s7696_s14 + $0x380] sm:$0xff]  }
 0x755   : > { %4095 = vmatpush.msrb.mxu0 %v6113_v57  ;;  %3970 = vmatpush.msrb.mxu2 %v5896_v58  ;;  %v3226_v38 = vmax.f32 %v3083_v27, 0.0  ;;  %v6001_v54 = vunpack.c.h.bf16 %v6227_v44  ;;  %v6040_v57 = vunpack.c.l.bf16 %v6237_v40  ;;  %v6072_v58 = vunpack.c.l.bf16 %v6245_v41 }
 0x756   : > { %3993 = vmatpush.msra.mxu3 %v5928_v60  ;;  %4027 = vmatpush.msra.mxu1 %v6016_v61  ;;  %v6226_v60 = vld [vmem:[%s7696_s14 + $0x308] sm:$0xff]   ;;  %v6097_v61 = vunpack.c.h.bf16 %v6251_v52  ;;  %v6000_v62 = vunpack.c.l.bf16 %v6227_v44  ;;  %v6089_v25 = vunpack.c.h.bf16 %v6249_v16  ;;  %v3195_v27 = vadd.f32 %v3194_v14, %v2809_v11 }
 0x757   : > { %4047 = vmatpush.msra.mxu2 %v6053_v0  ;;  %4096 = vmatpush.msrb.mxu0 %v6112_v5  ;;  %v6069_v0 = vunpack.c.h.bf16 %v6244_v56  ;;  %v5997_v3 = vunpack.c.h.bf16 %v6226_v60  ;;  %v6235_v5 = vld [vmem:[%s7696_s14 + $0x350] sm:$0xff]  }
 0x758   : > { %4070 = vmatpush.msrb.mxu3 %v6085_v1  ;;  %3971 = vmatmul.f32.vlgmr.msrb.gmra.mxu2 %v3209_v2  ;;  %v6250_v1 = vld [vmem:[%s7696_s14 + $0x3c8] sm:$0xff]   ;;  %v6096_v2 = vunpack.c.l.bf16 %v6251_v52  ;;  %v6033_v59 = vunpack.c.h.bf16 %v6235_v5  ;;  %v6032_v22 = vunpack.c.l.bf16 %v6235_v5  ;;  %v3215_v40 = vmax.f32 %v3195_v27, 0.0 }
 0x759   : > { %3994 = vmatmul.f32.vlgmr.msra.gmra.mxu3 %v3210_v7  ;;  %4028 = vmatpush.msra.mxu1 %v6013_v8  ;;  %v3125_v7 = vpop.f32.mrf.mxu1  ;;  %v6036_v8 = vunpack.c.l.bf16 %v6236_v51 }
 0x75a   : > { %4048 = vmatpush.msra.mxu2 %v6052_v4  ;;  %4071 = vmatpush.msrb.mxu3 %v6084_v9  ;;  %v6068_v4 = vunpack.c.l.bf16 %v6244_v56  ;;  %v6225_v9 = vld [vmem:[%s7696_s14 + $0x300] sm:$0xff]   ;;  %v3171_v33 = vpop.f32.mrf.mxu3 }
 0x75b   : > { %4097 = vmatpush.msrb.mxu0 %v6109_v17  ;;  %3951 = vmatmul.f32.gmra.mxu1 %v3224_v15  ;;  %v6093_v15 = vunpack.c.h.bf16 %v6250_v1  ;;  %v5996_v17 = vunpack.c.l.bf16 %v6226_v60  ;;  %v5992_v26 = vunpack.c.l.bf16 %v6225_v9 }
 0x75c   : > { %4020 = vmatmul.f32.gmra.mxu0 %v3227_v18  ;;  %4029 = vmatpush.msra.mxu1 %v6012_v19  ;;  %v6065_v18 = vunpack.c.h.bf16 %v6243_v49  ;;  %v6092_v19 = vunpack.c.l.bf16 %v6250_v1  ;;  %v3197_v44 = vpop.f32.mrf.mxu0 }
 0x75d   : > { %4049 = vmatpush.msra.mxu2 %v6049_v6  ;;  %4072 = vmatpush.msrb.mxu3 %v6081_v20  ;;  %v5993_v6 = vunpack.c.h.bf16 %v6225_v9  ;;  %v6234_v20 = vld [vmem:[%s7696_s14 + $0x348] sm:$0xff]   ;;  %v3198_v52 = vadd.f32 %v3197_v44, %v2809_v11 }
 0x75e   : > { %4098 = vmatpush.msrb.mxu0 %v6108_v23  ;;  %4030 = vmatpush.msra.mxu1 %v6009_v24  ;;  %v6064_v23 = vunpack.c.l.bf16 %v6243_v49  ;;  %v3126_v24 = vadd.f32 %v3125_v7, %v2806_v13 }
 0x75f   : > { %4050 = vmatpush.msra.mxu2 %v6048_v28  ;;  %4073 = vmatpush.msrb.mxu3 %v6080_v29  ;;  %v3148_v28 = vpop.f32.mrf.mxu2  ;;  %v6029_v29 = vunpack.c.h.bf16 %v6234_v20 }
 0x760   : > { %4099 = vmatpush.msrb.mxu0 %v6105_v30  ;;  %4031 = vmatpush.msra.mxu1 %v6008_v31  ;;  %v6061_v30 = vunpack.c.h.bf16 %v6242_v21  ;;  %v2807_v31 = vperm.slane %v8057_v55, 5 }
 0x761   : > { %4051 = vmatpush.msra.mxu2 %v6045_v32  ;;  %4074 = vmatpush.msrb.mxu3 %v6077_v34  ;;  %v6088_v32 = vunpack.c.l.bf16 %v6249_v16  ;;  %v6233_v34 = vld [vmem:[%s7696_s14 + $0x340] sm:$0xff]   ;;  %v3128_v41 = vpop.f32.mrf.mxu1 }
 0x762   : > { %4100 = vmatpush.msrb.mxu0 %v6104_v36  ;;  %3974 = vmatmul.f32.gmra.mxu2 %v3225_v35  ;;  %v2808_v35 = vperm.slane %v8057_v55, 6  ;;  %v6028_v36 = vunpack.c.l.bf16 %v6234_v20  ;;  %v6024_v55 = vunpack.c.l.bf16 %v6233_v34 }
 0x763   : > { %3997 = vmatmul.f32.gmra.mxu3 %v3226_v38  ;;  %4032 = vmatpush.msra.mxu1 %v6005_v39  ;;  %v3212_v38 = vmax.f32 %v3126_v24, 0.0  ;;  %v6060_v39 = vunpack.c.l.bf16 %v6242_v21 }
 0x764   : > { %4052 = vmatpush.msra.mxu2 %v6044_v42  ;;  %4075 = vmatpush.msrb.mxu3 %v6076_v43  ;;  %v6025_v42 = vunpack.c.h.bf16 %v6233_v34  ;;  %v3149_v43 = vadd.f32 %v3148_v28, %v2807_v31 }
 0x765   : > { %4101 = vmatpush.msrb.mxu0 %v6101_v46  ;;  %4033 = vmatpush.msra.mxu1 %v6004_v48  ;;  %v6057_v46 = vunpack.c.h.bf16 %v6241_v37  ;;  %v3172_v48 = vadd.f32 %v3171_v33, %v2808_v35 }
 0x766   : > { %4053 = vmatpush.msra.mxu2 %v6041_v45  ;;  %4076 = vmatpush.msrb.mxu3 %v6073_v50  ;;  %v3129_v45 = vadd.f32 %v3128_v41, %v2806_v13  ;;  %v6056_v50 = vunpack.c.l.bf16 %v6241_v37 }
 0x767   : > { %4102 = vmatpush.msrb.mxu0 %v6100_v53  ;;  %4034 = vmatpush.msra.mxu1 %v6001_v54  ;;  %v3213_v53 = vmax.f32 %v3149_v43, 0.0  ;;  %v3214_v54 = vmax.f32 %v3172_v48, 0.0  ;;  %v3151_v51 = vpop.f32.mrf.mxu2 }
 0x768   : > { %4054 = vmatpush.msra.mxu2 %v6040_v57  ;;  %4077 = vmatpush.msrb.mxu3 %v6072_v58  ;;  %v3228_v56 = vmax.f32 %v3129_v45, 0.0  ;;  %v3174_v57 = vpop.f32.mrf.mxu3  ;;  %v3231_v58 = vmax.f32 %v3198_v52, 0.0  ;;  %v3152_v60 = vadd.f32 %v3151_v51, %v2807_v31 }
 0x769   : > { %4103 = vmatpush.msrb.mxu0 %v6097_v61  ;;  %4035 = vmatpush.msra.mxu1 %v6000_v62  ;;  %v3175_v61 = vadd.f32 %v3174_v57, %v2808_v35 }
 0x76a   : > { %4055 = vmatpush.msra.mxu2 %v6037_v63  ;;  %4078 = vmatpush.msrb.mxu3 %v6069_v0  ;;  %v3229_v62 = vmax.f32 %v3152_v60, 0.0 }
 0x76b   : > { %4104 = vmatpush.msrb.mxu0 %v6096_v2  ;;  %4036 = vmatpush.msra.mxu1 %v5997_v3  ;;  %v3230_v63 = vmax.f32 %v3175_v61, 0.0 }
 0x76c   : > { %4056 = vmatpush.msra.mxu2 %v6036_v8  ;;  %4079 = vmatpush.msrb.mxu3 %v6068_v4  ;;  %v6492_v4 = vld [vmem:[%s2178_s7] ss:$0 sm:$0xff]  ;;  %s8465_s7 = sld [smem:[#allocation66_spill]] (!%p5505_p2) }
 0x76d   : > { %4105 = vmatpush.msrb.mxu0 %v6093_v15  ;;  %4037 = vmatpush.msra.mxu1 %v5996_v17 }
 0x76e   : > { %4057 = vmatpush.msra.mxu2 %v6033_v59  ;;  %4080 = vmatpush.msrb.mxu3 %v6065_v18 }
 0x76f   : > { %4106 = vmatpush.msrb.mxu0 %v6092_v19  ;;  %4038 = vmatpush.msra.mxu1 %v5993_v6 }
 0x770   : > { %4058 = vmatpush.msra.mxu2 %v6032_v22  ;;  %4081 = vmatpush.msrb.mxu3 %v6064_v23 }
 0x771   : > { %4107 = vmatpush.msrb.mxu0 %v6089_v25  ;;  %4039 = vmatpush.msra.mxu1 %v5992_v26 }
 0x772   : > { %4059 = vmatpush.msra.mxu2 %v6029_v29  ;;  %4082 = vmatpush.msrb.mxu3 %v6061_v30 }
 0x773   : > { %4108 = vmatpush.msrb.mxu0 %v6088_v32  ;;  %4040 = vmatmul.f32.vlgmr.msra.gmra.mxu1 %v3212_v38 }
 0x774   : > { %4109 = vmatmul.f32.vlgmr.msrb.gmra.mxu0 %v3215_v40  ;;  %4060 = vmatpush.msra.mxu2 %v6028_v36 }
 0x775   : > { %4083 = vmatpush.msrb.mxu3 %v6060_v39 }
 0x776   : > { %4061 = vmatpush.msra.mxu2 %v6025_v42 }
 0x777   : > { %4084 = vmatpush.msrb.mxu3 %v6057_v46 }
 0x778   : > { %4062 = vmatpush.msra.mxu2 %v6024_v55 }
 0x779   : > { %4085 = vmatpush.msrb.mxu3 %v6056_v50  ;;  %4063 = vmatmul.f32.vlgmr.msra.gmra.mxu2 %v3213_v53 }
 0x77a   : > { %4086 = vmatmul.f32.vlgmr.msrb.gmra.mxu3 %v3214_v54 }
 0x77b   : > { %4043 = vmatmul.f32.gmra.mxu1 %v3228_v56 }
 0x77c   : > { %4112 = vmatmul.f32.gmra.mxu0 %v3231_v58 }
 0x781   : > { %4066 = vmatmul.f32.gmra.mxu2 %v3229_v62 }
 0x782   : > { %4089 = vmatmul.f32.gmra.mxu3 %v3230_v63 }
 0x7a5   : > { %v3765_v0 = vpop.f32.mrf.mxu1 }
 0x7a6   : > { %v3834_v3 = vpop.f32.mrf.mxu0  ;;  %v3766_v13 = vadd.f32 %v6492_v4, %v3765_v0 }
 0x7ae   : > { %v3768_v5 = vpop.f32.mrf.mxu1 }
 0x7af   : > { %v3837_v8 = vpop.f32.mrf.mxu0  ;;  %v3769_v16 = vadd.f32 %v6492_v4, %v3768_v5 }
 0x7b1   : > { %v3788_v1 = vpop.f32.mrf.mxu2 }
 0x7b2   : > { %v3811_v2 = vpop.f32.mrf.mxu3  ;;  %v3789_v14 = vadd.f32 %v3788_v1, %v3766_v13 }
 0x7b4   : > { %v3812_v59 = vadd.f32 %v3811_v2, %v3789_v14 }
 0x7b6   : > { %v3835_v19 = vadd.f32 %v3834_v3, %v3812_v59 }
 0x7b8   : > { %v3857_v9 = vpop.f32.mrf.mxu1 }
 0x7b9   : > { %v3926_v11 = vpop.f32.mrf.mxu0  ;;  %v3858_v21 = vadd.f32 %v3857_v9, %v3835_v19 }
 0x7bb   : > { %v3791_v49 = vpop.f32.mrf.mxu2 }
 0x7bc   : > { %v3814_v7 = vpop.f32.mrf.mxu3  ;;  %v3792_v6 = vadd.f32 %v3791_v49, %v3769_v16 }
 0x7be   : > { %v3815_v22 = vadd.f32 %v3814_v7, %v3792_v6 }
 0x7c0   : > { %v3838_v27 = vadd.f32 %v3837_v8, %v3815_v22 }
 0x7c2   : > { %v3860_v18 = vpop.f32.mrf.mxu1 }
 0x7c3   : > { %v3929_v24 = vpop.f32.mrf.mxu0  ;;  %v3861_v29 = vadd.f32 %v3860_v18, %v3838_v27 }
 0x7c5   : > { %v3880_v15 = vpop.f32.mrf.mxu2 }
 0x7c6   : > { %v3903_v17 = vpop.f32.mrf.mxu3  ;;  %v3881_v25 = vadd.f32 %v3880_v15, %v3858_v21 }
 0x7c8   : > { %v3904_v28 = vadd.f32 %v3903_v17, %v3881_v25 }
 0x7ca   : > { %v3927_v31 = vadd.f32 %v3926_v11, %v3904_v28 }
 0x7cd   : > { %v3949_v26 = vpop.f32.mrf.mxu1 }
 0x7ce   : > { %v3950_v36 = vadd.f32 %v3949_v26, %v3927_v31 }
 0x7cf   : > { %v3883_v20 = vpop.f32.mrf.mxu2  ;;  %v4018_v34 = vpop.f32.mrf.mxu0 }
 0x7d0   : > { %v3906_v23 = vpop.f32.mrf.mxu3  ;;  %v3884_v33 = vadd.f32 %v3883_v20, %v3861_v29 }
 0x7d2   : > { %v3907_v37 = vadd.f32 %v3906_v23, %v3884_v33 }
 0x7d4   : > { %v3930_v39 = vadd.f32 %v3929_v24, %v3907_v37 }
 0x7d8   : > { %v3952_v35 = vpop.f32.mrf.mxu1 }
 0x7d9   : > { %v4021_v43 = vpop.f32.mrf.mxu0  ;;  %v3953_v46 = vadd.f32 %v3952_v35, %v3930_v39 }
 0x7db   : > { %v3972_v30 = vpop.f32.mrf.mxu2 }
 0x7dc   : > { %v3995_v32 = vpop.f32.mrf.mxu3  ;;  %v3973_v38 = vadd.f32 %v3972_v30, %v3950_v36  ;;  %v6493_v30 = vld [vmem:[%s2187_s9] ss:$0 sm:$0xff]  ;;  %s8457_s9 = sld [smem:[#allocation63_spill]] (!%p5505_p2) }
 0x7de   : > { %v3996_v41 = vadd.f32 %v3995_v32, %v3973_v38 }
 0x7e0   : > { %v4019_v55 = vadd.f32 %v4018_v34, %v3996_v41 }
 0x7e5   : > { %v3975_v40 = vpop.f32.mrf.mxu2 }
 0x7e6   : > { %v3998_v42 = vpop.f32.mrf.mxu3  ;;  %v3976_v48 = vadd.f32 %v3975_v40, %v3953_v46 }
 0x7e8   : > { %v3999_v52 = vadd.f32 %v3998_v42, %v3976_v48 }
 0x7ea   : > { %v4022_v58 = vadd.f32 %v4021_v43, %v3999_v52 }
 0x7f0   : > { %v4041_v44 = vpop.f32.mrf.mxu1 }
 0x7f1   : > { %v4042_v45 = vadd.f32 %v4041_v44, %v4019_v55  ;;  %v4110_v51 = vpop.f32.mrf.mxu0 }
 0x7f8   : > { %v4044_v57 = vpop.f32.mrf.mxu1 }
 0x7f9   : > { %v4045_v61 = vadd.f32 %v4044_v57, %v4022_v58  ;;  %v4113_v5 = vpop.f32.mrf.mxu0 }
 0x7fc   : > { %v4064_v50 = vpop.f32.mrf.mxu2 }
 0x7fd   : > { %v4065_v53 = vadd.f32 %v4064_v50, %v4042_v45  ;;  %v4087_v54 = vpop.f32.mrf.mxu3 }
 0x7ff   : > { %v4088_v56 = vadd.f32 %v4087_v54, %v4065_v53 }
 0x801   : > { %v4111_v60 = vadd.f32 %v4110_v51, %v4088_v56 }
 0x803   : > { %v4116_v62 = vadd.f32 %v4111_v60, %v7843_v12 }
 0x804   : > { %v4067_v63 = vpop.f32.mrf.mxu2 }
 0x805   : > { %v4068_v0 = vadd.f32 %v4067_v63, %v4045_v61  ;;  %v4120_v1 = vsel %vm2279_vm2, %v4116_v62, 0.0  ;;  %v4090_v2 = vpop.f32.mrf.mxu3 }
 0x806   : > { %4121 = vadd.xlane.f32.xlu2 %v4120_v1 }
 0x807   : > { %v4091_v3 = vadd.f32 %v4090_v2, %v4068_v0 }
 0x809   : > { %v4114_v49 = vadd.f32 %v4113_v5, %v4091_v3 }
 0x80b   : > { %v4117_v7 = vadd.f32 %v4114_v49, %v7860_v10 }
 0x80d   : > { %v4123_v8 = vsel %vm2279_vm2, %v4117_v7, 0.0 }
 0x80e   : > { %4124 = vadd.xlane.f32.xlu0 %v4123_v8 }
 0x879   : > { %v4122_v4 = vpop.xlane.xlu2 %4121 }
 0x87a   : > { %v4126_v9 = vmul.f32 %v4122_v4, %v7780_v47 }
 0x87c   : > { %v4128_v13 = vsub.f32 %v4116_v62, %v4126_v9 }
 0x87e   : > { %v4130_v14 = vmul.f32 %v4128_v13, %v4128_v13 }
 0x880   : > { %v4132_v12 = vsel %vm2279_vm2, %v4130_v14, 0.0 }
 0x881   : > { %v4125_v15 = vpop.xlane.xlu0 %4124  ;;  %4133 = vadd.xlane.f32.xlu1 %v4132_v12 }
 0x882   : > { %v4127_v17 = vmul.f32 %v4125_v15, %v7780_v47 }
 0x884   : > { %v4129_v11 = vsub.f32 %v4117_v7, %v4127_v17 }
 0x886   : > { %v4131_v59 = vmul.f32 %v4129_v11, %v4129_v11 }
 0x888   : > { %v4135_v18 = vsel %vm2279_vm2, %v4131_v59, 0.0 }
 0x889   : > { %4136 = vadd.xlane.f32.xlu2 %v4135_v18 }
 0x8f4   : > { %v4134_v10 = vpop.xlane.xlu1 %4133 }
 0x8f5   : > { %v4138_v16 = vmul.f32 %v4134_v10, %v7780_v47 }
 0x8f7   : > { %v4140_v19 = vadd.f32 1e-05, %v4138_v16 }
 0x8f9   : > { %6509 = vrsqrt.f32 %v4140_v19  ;;  %vm4148_vm12 = vweird.f32 %v4140_v19 }
 0x8fc   : > { %v4137_v6 = vpop.xlane.xlu2 %4136 }
 0x8fd   : > { %v4139_v20 = vmul.f32 %v4137_v6, %v7780_v47  ;;  %v6494_v47 = vld [vmem:[%s2190_s18] ss:$0 sm:$0xff]  ;;  %s8466_s18 = sld [smem:[#allocation69_spill]] (!%p5505_p2) }
 0x8ff   : > { %v6510_v21 = vpop.eup %6509  ;;  %v4141_v22 = vadd.f32 1e-05, %v4139_v20 }
 0x900   : > { %v4143_v23 = vmul.f32 %v6510_v21, %v4140_v19  ;;  %vm4149_vm11 = vweird.f32 %v6510_v21 }
 0x901   : > { %6511 = vrsqrt.f32 %v4141_v22  ;;  %vm4150_vm13 = vmor %vm4148_vm12, %vm4149_vm11  ;;  %vm4158_vm15 = vweird.f32 %v4141_v22 }
 0x902   : > { %v4144_v24 = vmul.f32 %v6510_v21, %v4143_v23 }
 0x904   : > { %v4145_v25 = vmul.f32 0.5, %v4144_v24 }
 0x906   : > { %v4146_v26 = vsub.f32 1.5, %v4145_v25 }
 0x907   : > { %v6512_v27 = vpop.eup %6511 }
 0x908   : > { %v4147_v28 = vmul.f32 %v6510_v21, %v4146_v26  ;;  %v4153_v29 = vmul.f32 %v6512_v27, %v4141_v22  ;;  %vm4159_vm14 = vweird.f32 %v6512_v27 }
 0x909   : > { %vm4160_vm0 = vmor %vm4158_vm15, %vm4159_vm14 }
 0x90a   : > { %v4151_v31 = vsel %vm4150_vm13, %v6510_v21, %v4147_v28  ;;  %v4154_v33 = vmul.f32 %v6512_v27, %v4153_v29 }
 0x90b   : > { %v4162_v32 = vmul.f32 %v4151_v31, %v4128_v13 }
 0x90c   : > { %v4155_v34 = vmul.f32 0.5, %v4154_v33 }
 0x90d   : > { %v4167_v35 = vmul.f32 %v6493_v30, %v4162_v32 }
 0x90e   : > { %v4156_v36 = vsub.f32 1.5, %v4155_v34 }
 0x90f   : > { %v8146_v37 = vadd.f32 %v6494_v47, %v4167_v35 }
 0x910   : > { %v4157_v38 = vmul.f32 %v6512_v27, %v4156_v36 }
 0x911   : > { %4174 = vst.msk [vmem:[#allocation2] sm:$0xff] %vm2279_vm2, %v8146_v37 }
 0x912   : > { %v4161_v39 = vsel %vm4160_vm0, %v6512_v27, %v4157_v38 }
 0x913   : > { %v4163_v40 = vmul.f32 %v4161_v39, %v4129_v11 }
 0x915   : > { %v4168_v41 = vmul.f32 %v6493_v30, %v4163_v40  ;;  %4179 = sbr.rel (%p5505_p2) target bundleno = 5044 (0x13b4), region = 324 }
 0x917   : > { %v8150_v42 = vadd.f32 %v6494_v47, %v4168_v41 }
 0x919   : > { %4175 = vst.msk [vmem:[#allocation2 + $0x8] sm:$0xff] %vm2279_vm2, %v8150_v42 }
 0x91a   : > { %v4220_v43 = vld [vmem:[%s8457_s9 + $0x38] sm:$0xff]  ;;  %v4219_v44 = vld [vmem:[%s8457_s9 + $0x30] sm:$0xff]  ;;  %v4218_v46 = vld [vmem:[%s8457_s9 + $0x28] sm:$0xff]  ;;  %vm4321_vm1 = vcmask 123904   ;;  %v7124_v6 = vmov 0   ;;  %vm4423_vm4 = vcmask 261120  }
 0x91b   : > { %4239 = vmatpush.msra.mxu1 %v4220_v43  ;;  %v4188_v48 = vld [vmem:[%s8458_s30 + $0x38] sm:$0xff]  ;;  %v4187_v55 = vld [vmem:[%s8458_s30 + $0x30] sm:$0xff]  ;;  %v4217_v45 = vld [vmem:[%s8457_s9 + $0x20] sm:$0xff]  ;;  %6513 = vset.pattern.permute.xlu1 %v7124_v6 }
 0x91c   : > { %4201 = vmatpush.msra.mxu0 %v4188_v48  ;;  %v4186_v50 = vld [vmem:[%s8458_s30 + $0x28] sm:$0xff]  ;;  %v4216_v52 = vld [vmem:[%s8457_s9 + $0x18] sm:$0xff]  ;;  %v4185_v53 = vld [vmem:[%s8458_s30 + $0x20] sm:$0xff]  ;;  %6514 = vset.pattern.permute.xlu0 %v7124_v6 }
 0x91d   : > { %4240 = vmatpush.msra.mxu1 %v4219_v44  ;;  %v4215_v54 = vld [vmem:[%s8457_s9 + $0x10] sm:$0xff]  ;;  %v4184_v51 = vld [vmem:[%s8458_s30 + $0x18] sm:$0xff]  ;;  %v4214_v56 = vld [vmem:[%s8457_s9 + $0x8] sm:$0xff] }
 0x91e   : > { %4202 = vmatpush.msra.mxu0 %v4187_v55  ;;  %v4183_v57 = vld [vmem:[%s8458_s30 + $0x10] sm:$0xff]  ;;  %v4213_v58 = vld [vmem:[%s8457_s9] sm:$0xff]  ;;  %v4182_v60 = vld [vmem:[%s8458_s30 + $0x8] sm:$0xff] }
 0x91f   : > { %4241 = vmatpush.msra.mxu1 %v4218_v46  ;;  %v4181_v61 = vld [vmem:[%s8458_s30] sm:$0xff]  ;;  %v4261_v8 = vld [vmem:[%s8462_s1 + $0x38] sm:$0xff]  ;;  %v4260_v4 = vld [vmem:[%s8462_s1 + $0x30] sm:$0xff] }
 0x920   : > { %4203 = vmatpush.msra.mxu0 %v4186_v50  ;;  %v4180_v62 = vld [vmem:[%s8459_s6] sm:$0x1]  ;;  %4274 = vmatpush.msra.mxu2 %v4261_v8  ;;  %v4259_v9 = vld [vmem:[%s8462_s1 + $0x28] sm:$0xff]  ;;  %v4257_v14 = vld [vmem:[%s8462_s1 + $0x18] sm:$0xff] }
 0x921   : > { %4242 = vmatpush.msra.mxu1 %v4217_v45  ;;  %v6515_v0 = vld [vmem:[%s8460_s24] ss:$0 sm:$0xff]  ;;  %v4256_v12 = vld [vmem:[%s8462_s1 + $0x10] sm:$0xff]  ;;  %v4255_v15 = vld [vmem:[%s8462_s1 + $0x8] sm:$0xff] }
 0x922   : > { %4204 = vmatpush.msra.mxu0 %v4185_v53  ;;  %v4189_v3 = vld [vmem:[%s8461_s0] sm:$0x1]  ;;  %4275 = vmatpush.msra.mxu2 %v4260_v4  ;;  %v4392_v20 = vld [vmem:[%s8464_s23 + $0x8] sm:$0xff]  ;;  %v4418_v31 = vld [vmem:[%s8466_s18 + $0x18] sm:$0xff] }
 0x923   : > { %4243 = vmatpush.msra.mxu1 %v4216_v52  ;;  %v4258_v13 = vld [vmem:[%s8462_s1 + $0x20] sm:$0xff]  ;;  %v4417_v33 = vld [vmem:[%s8466_s18 + $0x10] sm:$0xff]  ;;  %v4416_v47 = vld [vmem:[%s8466_s18 + $0x8] sm:$0xff] }
 0x924   : > { %4205 = vmatpush.msra.mxu0 %v4184_v51  ;;  %4276 = vmatpush.msra.mxu2 %v4259_v9  ;;  %v4254_v17 = vld [vmem:[%s8462_s1] sm:$0xff]  ;;  %v4363_v34 = vld [vmem:[%s8467_s22 + $0x38] sm:$0xff]  ;;  %v4362_v35 = vld [vmem:[%s8468_s27 + $0x30] sm:$0xff] }
 0x925   : > { %4244 = vmatpush.msra.mxu1 %v4215_v54  ;;  %v4318_v59 = vld [vmem:[%s8463_s26] sm:$0x3]  ;;  %v4361_v36 = vld [vmem:[%s8468_s27 + $0x28] sm:$0xff]  ;;  %v4359_v39 = vld [vmem:[%s8468_s27 + $0x18] sm:$0xff] }
 0x926   : > { %4206 = vmatpush.msra.mxu0 %v4183_v57  ;;  %4277 = vmatpush.msra.mxu2 %v4258_v13  ;;  %v4391_v19 = vld [vmem:[%s8464_s23] sm:$0xff]  ;;  %v4358_v40 = vld [vmem:[%s8468_s27 + $0x10] sm:$0xff]  ;;  %v4357_v41 = vld [vmem:[%s8468_s27 + $0x8] sm:$0xff] }
 0x927   : > { %4245 = vmatpush.msra.mxu1 %v4214_v56  ;;  %4396 = vperm.xlu1 %6513, %v4391_v19   ;;  %v6516_v25 = vld [vmem:[%s8465_s7] ss:$0 sm:$0xff]  ;;  %v4714_v51 = vld [vmem:[%s8471_s4 + $0x38] sm:$0xff]  ;;  %v4713_v56 = vld [vmem:[%s8471_s4 + $0x30] sm:$0xff] }
 0x928   : > { %4207 = vmatpush.msra.mxu0 %v4182_v60  ;;  %4278 = vmatpush.msra.mxu2 %v4257_v14  ;;  %v4415_v32 = vld [vmem:[%s8466_s18] sm:$0xff]  ;;  %v4712_v57 = vld [vmem:[%s8471_s4 + $0x28] sm:$0xff]  ;;  %v4710_v60 = vld [vmem:[%s8471_s4 + $0x18] sm:$0xff] }
 0x929   : > { %4246 = vmatpush.msra.mxu1 %v4213_v58  ;;  %v6518_v48 = vld [vmem:[%s8470_s10] ss:$0 sm:$0xff]  ;;  %v4708_v13 = vld [vmem:[%s8471_s4 + $0x8] sm:$0xff] }
 0x92a   : > { %5507 = vmatmul.msk.f32.vlgmr.msra.gmra.mxu1 %vm2279_vm2, %v8146_v37  ;;  %4208 = vmatpush.msra.mxu0 %v4181_v61  ;;  %v4356_v54 = vld [vmem:[%s8468_s27] sm:$0xff]  ;;  %v4709_v61 = vld [vmem:[%s8471_s4 + $0x10] sm:$0xff] }
 0x92b   : > { %5506 = vmatmul.msk.f32.vlgmr.msra.gmra.mxu0 %vm2279_vm2, %v4180_v62  ;;  %4279 = vmatpush.msra.mxu2 %v4256_v12  ;;  %v4711_v58 = vld [vmem:[%s8471_s4 + $0x20] sm:$0xff]  ;;  %v7125_v12 = vmov 32.0  }
 0x92c   : > { %4379 = vmatpush.msrb.mxu0 %v4363_v34  ;;  %v4707_v14 = vld [vmem:[%s8471_s4] sm:$0xff] }
 0x92d   : > { %4280 = vmatpush.msra.mxu2 %v4255_v15 }
 0x92e   : > { %4380 = vmatpush.msrb.mxu0 %v4362_v35 }
 0x92f   : > { %4281 = vmatpush.msra.mxu2 %v4254_v17  ;;  %4401 = vperm.xlu1 %6513, %v4392_v20  }
 0x930   : > { %5509 = vmatmul.msk.f32.vlgmr.msra.gmra.mxu2 %vm2279_vm2, %v8146_v37  ;;  %v4360_v37 = vld [vmem:[%s8468_s27 + $0x20] sm:$0xff]  ;;  %4381 = vmatpush.msrb.mxu0 %v4361_v36  ;;  %v4568_v36 = vld [vmem:[%s8475_s12 + $0x18] sm:$0xff] }
 0x931   : > { %4591 = vmatpush.msrb.mxu2 %v4568_v36 }
 0x932   : > { %5508 = vmatmul.msk.f32.gmra.mxu1 %vm2279_vm2, %v8150_v42  ;;  %4382 = vmatpush.msrb.mxu0 %v4360_v37 }
 0x934   : > { %4383 = vmatpush.msrb.mxu0 %v4359_v39 }
 0x936   : > { %4384 = vmatpush.msrb.mxu0 %v4358_v40 }
 0x938   : > { %5510 = vmatmul.msk.f32.gmra.mxu2 %vm2279_vm2, %v8150_v42  ;;  %v6517_v42 = vld [vmem:[%s8469_s2] ss:$0 sm:$0xff]  ;;  %4385 = vmatpush.msrb.mxu0 %v4357_v41 }
 0x93a   : > { %4386 = vmatpush.msrb.mxu0 %v4356_v54  ;;  %v6523_v54 = vld [vmem:[#allocation6] ss:$0 sm:$0xff] }
 0x999   : > { %v4397_v44 = vpop.permute.xlu1 %4396 }
 0x99a   : > { %v4407_v55 = vmul.f32 %v6517_v42, %v4397_v44 }
 0x99c   : > { %v4413_v45 = vadd.f32 %v6518_v48, %v4407_v55 }
 0x9a1   : > { %v4402_v50 = vpop.permute.xlu1 %4401 }
 0x9a2   : > { %v4408_v52 = vmul.f32 %v6517_v42, %v4402_v50 }
 0x9a4   : > { %v4414_v53 = vadd.f32 %v6518_v48, %v4408_v52 }
 0x9a7   : > { %v4248_v63 = vpop.f32.mrf.mxu1 }
 0x9a8   : > { %v4210_v5 = vpop.f32.mrf.mxu0  ;;  %v4249_v49 = vadd.f32 %v6515_v0, %v4248_v63  ;;  %v6519_v63 = vld [vmem:[%s8472_s5] ss:$0 sm:$0xff] }
 0x9a9   : > { %v4211_v7 = vadd.f32 %v4210_v5, %v4189_v3 }
 0x9af   : > { %v4251_v1 = vpop.f32.mrf.mxu1 }
 0x9b0   : > { %v4252_v2 = vadd.f32 %v6515_v0, %v4251_v1 }
 0x9b2   : > { %5511 = vmatpush.xpose.msk.msra.mxu3 %vm2279_vm2, %v4252_v2 }
 0x9b3   : > { %v4283_v22 = vpop.f32.mrf.mxu2 }
 0x9b4   : > { %v4284_v27 = vadd.f32 %v6516_v25, %v4283_v22 }
 0x9b6   : > { %5512 = vmatpush.xpose.msk.msra.mxu3 %vm2279_vm2, %v4249_v49 }
 0x9b9   : > { %5513 = vmatmul.msk.f32.vlgmr.msra.gmra.mxu3 %vm2279_vm2, %v4211_v7 }
 0x9bb   : > { %v4286_v26 = vpop.f32.mrf.mxu2 }
 0x9bc   : > { %v4287_v28 = vadd.f32 %v6516_v25, %v4286_v26 }
 0x9be   : > { %4350 = vmatpush.msrb.mxu3 %v4287_v28 }
 0x9c0   : > { %4351 = vmatpush.msrb.mxu3 %v4284_v27 }
 0x9c2   : > { %4442 = vmatpush.msra.mxu3 %v4418_v31  ;;  %v4524_v31 = vld [vmem:[%s8474_s8 + $0x10] sm:$0xff] }
 0x9c4   : > { %4443 = vmatpush.msra.mxu3 %v4417_v33  ;;  %v4523_v33 = vld [vmem:[%s8474_s8 + $0x8] sm:$0xff] }
 0x9c6   : > { %4444 = vmatpush.msra.mxu3 %v4416_v47  ;;  %v4522_v47 = vld [vmem:[%s8474_s8] sm:$0xff] }
 0x9c8   : > { %4445 = vmatpush.msra.mxu3 %v4415_v32 }
 0xa3c   : > { %v4315_v11 = vpop.f32.mrf.mxu3 }
 0xa3d   : > { %v4319_v18 = vperm.slane %v4315_v11, 0 }
 0xa3f   : > { %v4320_v10 = vadd.f32 %v4319_v18, %v4318_v59  ;;  %v6520_v18 = vld [vmem:[%s8473_s3] ss:$0 sm:$0xff] }
 0xa41   : > { %v4322_v16 = vsel %vm4321_vm1, %v4320_v10, -inf }
 0xa42   : > { %4323 = vmax.xlane.f32.xlu0 %v4322_v16 }
 0xab5   : > { %v4324_v21 = vpop.xlane.xlu0 %4323 }
 0xab6   : > { %v4325_v23 = vsub.f32 %v4320_v10, %v4324_v21 }
 0xab8   : > { %v4326_v24 = vmul.f32 1.442695, %v4325_v23 }
 0xaba   : > { %6535 = vpow2.f32 %v4326_v24 }
 0xac0   : > { %v6536_v29 = vpop.eup %6535 }
 0xac1   : > { %v4328_v30 = vsel %vm4321_vm1, %v6536_v29, 0.0 }
 0xac2   : > { %4329 = vadd.xlane.f32.xlu0 %v4328_v30  ;;  %v4525_v30 = vld [vmem:[%s8474_s8 + $0x18] sm:$0xff] }
 0xac3   : > { %4548 = vmatpush.msrb.mxu1 %v4525_v30 }
 0xac5   : > { %4549 = vmatpush.msrb.mxu1 %v4524_v31 }
 0xac7   : > { %4550 = vmatpush.msrb.mxu1 %v4523_v33 }
 0xac9   : > { %4551 = vmatpush.msrb.mxu1 %v4522_v47  ;;  %v4667_v47 = vld [vmem:[%s8476_s11 + $0x18] sm:$0xff] }
 0xaca   : > { %4690 = vmatpush.msra.mxu0 %v4667_v47 }
 0xb35   : > { %v4330_v38 = vpop.xlane.xlu0 %4329 }
 0xb36   : > { %6537 = vrcp.f32 %v4330_v38 }
 0xb37   : > { %6539 = vrcp.f32 %v7125_v12 }
 0xb3c   : > { %v6538_v43 = vpop.eup %6537 }
 0xb3d   : > { %v4332_v46 = vmul.f32 %v6538_v43, %v6536_v29  ;;  %v6540_v15 = vpop.eup %6539 }
 0xb3e   : > { %v4468_v17 = vmul.f32 32.0, %v6540_v15  ;;  %vm4472_vm6 = vweird.f32 %v6540_v15 }
 0xb3f   : > { %5514 = vmatmul.msk.f32.vlgmr.msrb.gmra.mxu3 %vm2432_vm3, %v4332_v46 }
 0xb40   : > { %4730 = vmatpush.msrb.mxu3 %v4714_v51  ;;  %v4469_v11 = vsub.f32 1.0, %v4468_v17 }
 0xb42   : > { %4731 = vmatpush.msrb.mxu3 %v4713_v56  ;;  %v4470_v59 = vmul.f32 %v6540_v15, %v4469_v11 }
 0xb44   : > { %4732 = vmatpush.msrb.mxu3 %v4712_v57  ;;  %v4471_v10 = vadd.f32 %v6540_v15, %v4470_v59 }
 0xb46   : > { %4733 = vmatpush.msrb.mxu3 %v4711_v58  ;;  %v8230_v6 = vsel %vm4472_vm6, %v6540_v15, %v4471_v10  ;;  %v6525_v15 = vld [vmem:[#allocation9] ss:$0 sm:$0xff] }
 0xb47   : > { %5516 = vmatmul.msk.f32.vlgmr.msra.gmra.mxu3 %vm4423_vm4, %v4413_v45  ;;  %v6522_v45 = vld [vmem:[#allocation4] ss:$0 sm:$0xff] }
 0xb48   : > { %4734 = vmatpush.msrb.mxu3 %v4710_v60 }
 0xb4a   : > { %4735 = vmatpush.msrb.mxu3 %v4709_v61 }
 0xb4c   : > { %4736 = vmatpush.msrb.mxu3 %v4708_v13 }
 0xb4e   : > { %4737 = vmatpush.msrb.mxu3 %v4707_v14 }
 0xb4f   : > { %5517 = vmatmul.msk.f32.gmra.mxu3 %vm4423_vm4, %v4414_v53 }
 0xbc2   : > { %v4353_v62 = vpop.f32.mrf.mxu3 }
 0xbc3   : > { %5515 = vmatmul.msk.f32.vlgmr.msrb.gmra.mxu0 %vm2279_vm2, %v4353_v62 }
 0xbca   : > { %v4447_v0 = vpop.f32.mrf.mxu3 }
 0xbcb   : > { %v4448_v1 = vadd.f32 %v6519_v63, %v4447_v0 }
 0xbcd   : > { %v4455_v2 = vmul.f32 0.01, %v4448_v1  ;;  %vm4453_vm3 = vcmp.ge.f32.partialorder %v4448_v1, 0.0 }
 0xbcf   : > { %v4457_v3 = vsel %vm4453_vm3, %v4448_v1, %v4455_v2  ;;  %v4567_v1 = vld [vmem:[%s8475_s12 + $0x10] sm:$0xff]  ;;  %v4566_v2 = vld [vmem:[%s8475_s12 + $0x8] sm:$0xff] }
 0xbd0   : > { %v4461_v5 = vsel %vm4423_vm4, %v4457_v3, 0.0  ;;  %4592 = vmatpush.msrb.mxu2 %v4567_v1 }
 0xbd1   : > { %4462 = vadd.xlane.f32.xlu2 %v4461_v5  ;;  %v6524_v5 = vld [vmem:[#allocation8] ss:$0 sm:$0xff] }
 0xbd2   : > { %v4450_v49 = vpop.f32.mrf.mxu3  ;;  %4593 = vmatpush.msrb.mxu2 %v4566_v2 }
 0xbd3   : > { %v4451_v7 = vadd.f32 %v6519_v63, %v4450_v49 }
 0xbd5   : > { %v4456_v8 = vmul.f32 0.01, %v4451_v7  ;;  %vm4454_vm5 = vcmp.ge.f32.partialorder %v4451_v7, 0.0 }
 0xbd7   : > { %v4458_v4 = vsel %vm4454_vm5, %v4451_v7, %v4456_v8 }
 0xbd8   : > { %v4464_v9 = vsel %vm4423_vm4, %v4458_v4, 0.0 }
 0xbd9   : > { %4465 = vadd.xlane.f32.xlu2 %v4464_v9 }
 0xc40   : > { %v4388_v16 = vpop.f32.mrf.mxu0 }
 0xc41   : > { %v4389_v19 = vadd.f32 %v6520_v18, %v4388_v16 }
 0xc43   : > { %5524 = vmatmul.msk.f32.vlgmr.msrb.gmra.mxu3 %vm2279_vm2, %v4389_v19 }
 0xc44   : > { %v4463_v20 = vpop.xlane.xlu2 %4462 }
 0xc45   : > { %v4474_v21 = vmul.f32 %v8230_v6, %v4463_v20 }
 0xc47   : > { %v4476_v22 = vsub.f32 %v4457_v3, %v4474_v21  ;;  %v4565_v3 = vld [vmem:[%s8475_s12] sm:$0xff] }
 0xc48   : > { %4594 = vmatpush.msrb.mxu2 %v4565_v3 }
 0xc49   : > { %v4478_v23 = vmul.f32 %v4476_v22, %v4476_v22 }
 0xc4b   : > { %v4480_v24 = vsel %vm4423_vm4, %v4478_v23, 0.0 }
 0xc4c   : > { %4481 = vadd.xlane.f32.xlu0 %v4480_v24  ;;  %v4466_v25 = vpop.xlane.xlu2 %4465 }
 0xc4d   : > { %v4475_v26 = vmul.f32 %v8230_v6, %v4466_v25 }
 0xc4f   : > { %v4477_v27 = vsub.f32 %v4458_v4, %v4475_v26 }
 0xc51   : > { %v4479_v28 = vmul.f32 %v4477_v27, %v4477_v27 }
 0xc53   : > { %v4483_v29 = vsel %vm4423_vm4, %v4479_v28, 0.0 }
 0xc54   : > { %4484 = vadd.xlane.f32.xlu1 %v4483_v29 }
 0xcbf   : > { %v4482_v32 = vpop.xlane.xlu0 %4481 }
 0xcc0   : > { %v4486_v34 = vmul.f32 %v4482_v32, %v8230_v6  ;;  %v4666_v32 = vld [vmem:[%s8476_s11 + $0x10] sm:$0xff] }
 0xcc1   : > { %4691 = vmatpush.msra.mxu0 %v4666_v32 }
 0xcc2   : > { %v4488_v35 = vadd.f32 1e-05, %v4486_v34  ;;  %v4665_v34 = vld [vmem:[%s8476_s11 + $0x8] sm:$0xff] }
 0xcc3   : > { %4692 = vmatpush.msra.mxu0 %v4665_v34 }
 0xcc4   : > { %6541 = vrsqrt.f32 %v4488_v35  ;;  %vm4496_vm7 = vweird.f32 %v4488_v35 }
 0xcc7   : > { %v4485_v37 = vpop.xlane.xlu1 %4484 }
 0xcc8   : > { %v4487_v38 = vmul.f32 %v4485_v37, %v8230_v6 }
 0xcca   : > { %v6542_v39 = vpop.eup %6541  ;;  %v4489_v40 = vadd.f32 1e-05, %v4487_v38 }
 0xccb   : > { %v4491_v41 = vmul.f32 %v6542_v39, %v4488_v35  ;;  %vm4497_vm2 = vweird.f32 %v6542_v39  ;;  %v4664_v35 = vld [vmem:[%s8476_s11] sm:$0xff] }
 0xccc   : > { %6543 = vrsqrt.f32 %v4489_v40  ;;  %vm4498_vm8 = vmor %vm4496_vm7, %vm4497_vm2  ;;  %vm4506_vm10 = vweird.f32 %v4489_v40  ;;  %4693 = vmatpush.msra.mxu0 %v4664_v35 }
 0xccd   : > { %v4492_v42 = vmul.f32 %v6542_v39, %v4491_v41 }
 0xccf   : > { %v4493_v43 = vmul.f32 0.5, %v4492_v42 }
 0xcd1   : > { %v4494_v44 = vsub.f32 1.5, %v4493_v43 }
 0xcd2   : > { %v6544_v46 = vpop.eup %6543 }
 0xcd3   : > { %v4495_v48 = vmul.f32 %v6542_v39, %v4494_v44  ;;  %v4501_v55 = vmul.f32 %v6544_v46, %v4489_v40  ;;  %vm4507_vm9 = vweird.f32 %v6544_v46 }
 0xcd4   : > { %vm4508_vm11 = vmor %vm4506_vm10, %vm4507_vm9 }
 0xcd5   : > { %v4499_v50 = vsel %vm4498_vm8, %v6542_v39, %v4495_v48  ;;  %v4502_v52 = vmul.f32 %v6544_v46, %v4501_v55  ;;  %v4751_v39 = vld [vmem:[%s8477_s28 + $0x18] sm:$0xff] }
 0xcd6   : > { %v4510_v53 = vmul.f32 %v4499_v50, %v4476_v22  ;;  %4770 = vmatpush.msra.mxu1 %v4751_v39 }
 0xcd7   : > { %v4503_v51 = vmul.f32 0.5, %v4502_v52 }
 0xcd8   : > { %v4515_v56 = vmul.f32 %v6522_v45, %v4510_v53  ;;  %v6526_v53 = vld [vmem:[#allocation11] ss:$0 sm:$0xff] }
 0xcd9   : > { %v4504_v57 = vsub.f32 1.5, %v4503_v51 }
 0xcda   : > { %v4520_v58 = vadd.f32 %v6523_v54, %v4515_v56 }
 0xcdb   : > { %v4505_v60 = vmul.f32 %v6544_v46, %v4504_v57  ;;  %v6527_v57 = vld [vmem:[#allocation12] ss:$0 sm:$0xff] }
 0xcdc   : > { %5518 = vmatmul.msk.f32.vlgmr.msrb.gmra.mxu1 %vm4423_vm4, %v4520_v58 }
 0xcdd   : > { %v4509_v61 = vsel %vm4508_vm11, %v6544_v46, %v4505_v60 }
 0xcde   : > { %v4511_v62 = vmul.f32 %v4509_v61, %v4477_v27 }
 0xce0   : > { %v4516_v63 = vmul.f32 %v6522_v45, %v4511_v62 }
 0xce2   : > { %v4521_v0 = vadd.f32 %v6523_v54, %v4516_v63 }
 0xce4   : > { %5519 = vmatmul.msk.f32.gmra.mxu1 %vm4423_vm4, %v4521_v0 }
 0xd59   : > { %v4553_v49 = vpop.f32.mrf.mxu1 }
 0xd5a   : > { %v4554_v7 = vadd.f32 %v6524_v5, %v4553_v49  ;;  %v4749_v49 = vld [vmem:[%s8477_s28 + $0x8] sm:$0xff] }
 0xd5c   : > { %vm4559_vm12 = vcmp.ge.f32.partialorder %v4554_v7, 0.0  ;;  %v4561_v8 = vmul.f32 0.01, %v4554_v7 }
 0xd5e   : > { %v4563_v4 = vsel %vm4559_vm12, %v4554_v7, %v4561_v8  ;;  %v4748_v7 = vld [vmem:[%s8477_s28] sm:$0xff]  ;;  %v6528_v8 = vld [vmem:[#allocation14] ss:$0 sm:$0xff] }
 0xd5f   : > { %5520 = vmatmul.msk.f32.vlgmr.msrb.gmra.mxu2 %vm4423_vm4, %v4563_v4 }
 0xd61   : > { %v4556_v9 = vpop.f32.mrf.mxu1 }
 0xd62   : > { %v4557_v13 = vadd.f32 %v6524_v5, %v4556_v9  ;;  %v4750_v5 = vld [vmem:[%s8477_s28 + $0x10] sm:$0xff] }
 0xd63   : > { %4771 = vmatpush.msra.mxu1 %v4750_v5 }
 0xd64   : > { %v4562_v14 = vmul.f32 0.01, %v4557_v13  ;;  %vm4560_vm13 = vcmp.ge.f32.partialorder %v4557_v13, 0.0 }
 0xd65   : > { %4772 = vmatpush.msra.mxu1 %v4749_v49 }
 0xd66   : > { %v4564_v12 = vsel %vm4560_vm13, %v4557_v13, %v4562_v14 }
 0xd67   : > { %5521 = vmatmul.msk.f32.gmra.mxu2 %vm4423_vm4, %v4564_v12  ;;  %4773 = vmatpush.msra.mxu1 %v4748_v7 }
 0xde2   : > { %v4596_v17 = vpop.f32.mrf.mxu2 }
 0xde3   : > { %v4597_v11 = vadd.f32 %v6525_v15, %v4596_v17 }
 0xde5   : > { %v4604_v59 = vmul.f32 0.01, %v4597_v11  ;;  %vm4602_vm14 = vcmp.ge.f32.partialorder %v4597_v11, 0.0 }
 0xde7   : > { %v4606_v18 = vsel %vm4602_vm14, %v4597_v11, %v4604_v59  ;;  %v6521_v59 = vld [vmem:[#allocation15] ss:$0 sm:$0xff] }
 0xde8   : > { %v4610_v10 = vsel %vm4423_vm4, %v4606_v18, 0.0 }
 0xde9   : > { %4611 = vadd.xlane.f32.xlu2 %v4610_v10 }
 0xdea   : > { %v4599_v16 = vpop.f32.mrf.mxu2 }
 0xdeb   : > { %v4600_v19 = vadd.f32 %v6525_v15, %v4599_v16 }
 0xded   : > { %v4605_v20 = vmul.f32 0.01, %v4600_v19  ;;  %vm4603_vm15 = vcmp.ge.f32.partialorder %v4600_v19, 0.0 }
 0xdef   : > { %v4607_v21 = vsel %vm4603_vm15, %v4600_v19, %v4605_v20 }
 0xdf0   : > { %v4613_v22 = vsel %vm4423_vm4, %v4607_v21, 0.0 }
 0xdf1   : > { %4614 = vadd.xlane.f32.xlu0 %v4613_v22 }
 0xe5c   : > { %v4612_v23 = vpop.xlane.xlu2 %4611 }
 0xe5d   : > { %v4616_v24 = vmul.f32 %v4612_v23, %v8230_v6 }
 0xe5f   : > { %v4618_v25 = vsub.f32 %v4606_v18, %v4616_v24  ;;  %v4739_v18 = vpop.f32.mrf.mxu3 }
 0xe60   : > { %v4740_v10 = vadd.f32 %v6521_v59, %v4739_v18 }
 0xe61   : > { %v4620_v26 = vmul.f32 %v4618_v25, %v4618_v25 }
 0xe62   : > { %v4744_v16 = vperm.slane %v4740_v10, 0 }
 0xe63   : > { %v4622_v27 = vsel %vm4423_vm4, %v4620_v26, 0.0 }
 0xe64   : > { %v4615_v28 = vpop.xlane.xlu0 %4614  ;;  %4623 = vadd.xlane.f32.xlu2 %v4622_v27 }
 0xe65   : > { %v4617_v29 = vmul.f32 %v4615_v28, %v8230_v6 }
 0xe67   : > { %v4619_v30 = vsub.f32 %v4607_v21, %v4617_v29  ;;  %v4743_v21 = vrot.slane %v4740_v10, 1 }
 0xe69   : > { %v4621_v31 = vmul.f32 %v4619_v30, %v4619_v30 }
 0xe6b   : > { %v4625_v33 = vsel %vm4423_vm4, %v4621_v31, 0.0 }
 0xe6c   : > { %4626 = vadd.xlane.f32.xlu0 %v4625_v33 }
 0xed7   : > { %v4624_v36 = vpop.xlane.xlu2 %4623 }
 0xed8   : > { %v4628_v37 = vmul.f32 %v4624_v36, %v8230_v6 }
 0xeda   : > { %v4630_v38 = vadd.f32 1e-05, %v4628_v37 }
 0xedc   : > { %6545 = vrsqrt.f32 %v4630_v38  ;;  %vm4638_vm1 = vweird.f32 %v4630_v38 }
 0xedf   : > { %v4627_v40 = vpop.xlane.xlu0 %4626 }
 0xee0   : > { %v4629_v41 = vmul.f32 %v4627_v40, %v8230_v6  ;;  %v4848_v40 = vld [vmem:[%s8478_s17 + $0x18] sm:$0xff] }
 0xee1   : > { %4871 = vmatpush.msra.mxu2 %v4848_v40 }
 0xee2   : > { %v6546_v42 = vpop.eup %6545  ;;  %v4631_v43 = vadd.f32 1e-05, %v4629_v41  ;;  %v4847_v41 = vld [vmem:[%s8478_s17 + $0x10] sm:$0xff] }
 0xee3   : > { %v4633_v44 = vmul.f32 %v6546_v42, %v4630_v38  ;;  %vm4639_vm0 = vweird.f32 %v6546_v42  ;;  %4872 = vmatpush.msra.mxu2 %v4847_v41 }
 0xee4   : > { %6547 = vrsqrt.f32 %v4631_v43  ;;  %vm4640_vm3 = vmor %vm4638_vm1, %vm4639_vm0  ;;  %vm4648_vm6 = vweird.f32 %v4631_v43 }
 0xee5   : > { %v4634_v46 = vmul.f32 %v6546_v42, %v4633_v44 }
 0xee7   : > { %v4635_v48 = vmul.f32 0.5, %v4634_v46 }
 0xee9   : > { %v4636_v55 = vsub.f32 1.5, %v4635_v48 }
 0xeea   : > { %v6548_v45 = vpop.eup %6547 }
 0xeeb   : > { %v4637_v50 = vmul.f32 %v6546_v42, %v4636_v55  ;;  %v4643_v52 = vmul.f32 %v6548_v45, %v4631_v43  ;;  %vm4649_vm5 = vweird.f32 %v6548_v45  ;;  %v4845_v43 = vld [vmem:[%s8478_s17] sm:$0xff]  ;;  %v4891_v55 = vld [vmem:[%s8479_s20 + $0x18] sm:$0xff] }
 0xeec   : > { %vm4650_vm2 = vmor %vm4648_vm6, %vm4649_vm5  ;;  %4914 = vmatpush.msra.mxu3 %v4891_v55 }
 0xeed   : > { %v4641_v54 = vsel %vm4640_vm3, %v6546_v42, %v4637_v50  ;;  %v4644_v51 = vmul.f32 %v6548_v45, %v4643_v52  ;;  %v4846_v42 = vld [vmem:[%s8478_s17 + $0x8] sm:$0xff] }
 0xeee   : > { %v4652_v56 = vmul.f32 %v4641_v54, %v4618_v25  ;;  %v4745_v25 = vperm.slane %v4743_v21, 0  ;;  %4873 = vmatpush.msra.mxu2 %v4846_v42 }
 0xeef   : > { %v4645_v58 = vmul.f32 0.5, %v4644_v51 }
 0xef0   : > { %v4657_v60 = vmul.f32 %v6526_v53, %v4652_v56  ;;  %4874 = vmatpush.msra.mxu2 %v4845_v43 }
 0xef1   : > { %v4646_v61 = vsub.f32 1.5, %v4645_v58 }
 0xef2   : > { %v4662_v62 = vadd.f32 %v6527_v57, %v4657_v60 }
 0xef3   : > { %v4647_v63 = vmul.f32 %v6548_v45, %v4646_v61 }
 0xef4   : > { %5522 = vmatmul.msk.f32.vlgmr.msra.gmra.mxu0 %vm4423_vm4, %v4662_v62  ;;  %v6529_v62 = vld [vmem:[#allocation17] ss:$0 sm:$0xff] }
 0xef5   : > { %v4651_v0 = vsel %vm4650_vm2, %v6548_v45, %v4647_v63 }
 0xef6   : > { %v4653_v1 = vmul.f32 %v4651_v0, %v4619_v30 }
 0xef8   : > { %v4658_v2 = vmul.f32 %v6526_v53, %v4653_v1 }
 0xefa   : > { %v4663_v3 = vadd.f32 %v6527_v57, %v4658_v2  ;;  %v6530_v2 = vld [vmem:[#allocation18] ss:$0 sm:$0xff] }
 0xefc   : > { %5523 = vmatmul.msk.f32.gmra.mxu0 %vm4423_vm4, %v4663_v3 }
 0xf71   : > { %v4695_v4 = vpop.f32.mrf.mxu0 }
 0xf72   : > { %v4696_v9 = vadd.f32 %v6528_v8, %v4695_v4 }
 0xf74   : > { %vm4701_vm7 = vcmp.ge.f32.partialorder %v4696_v9, 0.0  ;;  %v4703_v13 = vmul.f32 0.01, %v4696_v9 }
 0xf76   : > { %v4705_v14 = vsel %vm4701_vm7, %v4696_v9, %v4703_v13 }
 0xf77   : > { %5525 = vmatmul.msk.f32.vlgmr.msra.gmra.mxu1 %vm4423_vm4, %v4705_v14 }
 0xf79   : > { %v4698_v12 = vpop.f32.mrf.mxu0 }
 0xf7a   : > { %v4699_v15 = vadd.f32 %v6528_v8, %v4698_v12  ;;  %v4890_v12 = vld [vmem:[%s8479_s20 + $0x10] sm:$0xff] }
 0xf7b   : > { %4915 = vmatpush.msra.mxu3 %v4890_v12 }
 0xf7c   : > { %v4704_v17 = vmul.f32 0.01, %v4699_v15  ;;  %vm4702_vm8 = vcmp.ge.f32.partialorder %v4699_v15, 0.0 }
 0xf7e   : > { %v4706_v11 = vsel %vm4702_vm8, %v4699_v15, %v4704_v17  ;;  %v4889_v15 = vld [vmem:[%s8479_s20 + $0x8] sm:$0xff]  ;;  %v4888_v17 = vld [vmem:[%s8479_s20] sm:$0xff] }
 0xf7f   : > { %5526 = vmatmul.msk.f32.gmra.mxu1 %vm4423_vm4, %v4706_v11  ;;  %4916 = vmatpush.msra.mxu3 %v4889_v15  ;;  %v6531_v11 = vld [vmem:[#allocation20] ss:$0 sm:$0xff] }
 0xf81   : > { %4917 = vmatpush.msra.mxu3 %v4888_v17 }
 0xff4   : > { %v4775_v19 = vpop.f32.mrf.mxu1 }
 0xff5   : > { %v4781_v20 = vadd.f32 %v4775_v19, %v4744_v16 }
 0xff7   : > { %v4785_v22 = vmul.f32 0.01, %v4781_v20  ;;  %vm4783_vm9 = vcmp.ge.f32.partialorder %v4781_v20, 0.0 }
 0xff9   : > { %v4787_v23 = vsel %vm4783_vm9, %v4781_v20, %v4785_v22 }
 0xffa   : > { %v4791_v24 = vsel %vm4423_vm4, %v4787_v23, 0.0 }
 0xffb   : > { %4792 = vadd.xlane.f32.xlu2 %v4791_v24 }
 0xffc   : > { %v4778_v26 = vpop.f32.mrf.mxu1 }
 0xffd   : > { %v4782_v27 = vadd.f32 %v4778_v26, %v4745_v25 }
 0xfff   : > { %v4786_v28 = vmul.f32 0.01, %v4782_v27  ;;  %vm4784_vm10 = vcmp.ge.f32.partialorder %v4782_v27, 0.0 }
0x1001   : > { %v4788_v29 = vsel %vm4784_vm10, %v4782_v27, %v4786_v28 }
0x1002   : > { %v4794_v30 = vsel %vm4423_vm4, %v4788_v29, 0.0 }
0x1003   : > { %4795 = vadd.xlane.f32.xlu0 %v4794_v30 }
0x106e   : > { %v4793_v31 = vpop.xlane.xlu2 %4792 }
0x106f   : > { %v4797_v33 = vmul.f32 %v4793_v31, %v8230_v6 }
0x1071   : > { %v4799_v47 = vsub.f32 %v4787_v23, %v4797_v33  ;;  %v6532_v23 = vld [vmem:[#allocation21] ss:$0 sm:$0xff] }
0x1073   : > { %v4801_v32 = vmul.f32 %v4799_v47, %v4799_v47 }
0x1075   : > { %v4803_v34 = vsel %vm4423_vm4, %v4801_v32, 0.0 }
0x1076   : > { %4804 = vadd.xlane.f32.xlu2 %v4803_v34  ;;  %v4796_v35 = vpop.xlane.xlu0 %4795 }
0x1077   : > { %v4798_v36 = vmul.f32 %v4796_v35, %v8230_v6 }
0x1079   : > { %v4800_v37 = vsub.f32 %v4788_v29, %v4798_v36 }
0x107b   : > { %v4802_v38 = vmul.f32 %v4800_v37, %v4800_v37 }
0x107d   : > { %v4806_v39 = vsel %vm4423_vm4, %v4802_v38, 0.0 }
0x107e   : > { %4807 = vadd.xlane.f32.xlu0 %v4806_v39 }
0x10e9   : > { %v4805_v44 = vpop.xlane.xlu2 %4804 }
0x10ea   : > { %v4809_v46 = vmul.f32 %v4805_v44, %v8230_v6 }
0x10ec   : > { %v4811_v48 = vadd.f32 1e-05, %v4809_v46 }
0x10ee   : > { %6549 = vrsqrt.f32 %v4811_v48  ;;  %vm4819_vm12 = vweird.f32 %v4811_v48 }
0x10f1   : > { %v4808_v45 = vpop.xlane.xlu0 %4807 }
0x10f2   : > { %v4810_v50 = vmul.f32 %v4808_v45, %v8230_v6 }
0x10f4   : > { %v6550_v52 = vpop.eup %6549  ;;  %v4812_v53 = vadd.f32 1e-05, %v4810_v50 }
0x10f5   : > { %v4814_v54 = vmul.f32 %v6550_v52, %v4811_v48  ;;  %vm4820_vm11 = vweird.f32 %v6550_v52 }
0x10f6   : > { %6551 = vrsqrt.f32 %v4812_v53  ;;  %vm4821_vm13 = vmor %vm4819_vm12, %vm4820_vm11  ;;  %vm4829_vm15 = vweird.f32 %v4812_v53  ;;  %vm5024_vm12 = vcmask 122880  }
0x10f7   : > { %v4815_v51 = vmul.f32 %v6550_v52, %v4814_v54 }
0x10f9   : > { %v4816_v56 = vmul.f32 0.5, %v4815_v51 }
0x10fb   : > { %v4817_v57 = vsub.f32 1.5, %v4816_v56 }
0x10fc   : > { %v6552_v58 = vpop.eup %6551 }
0x10fd   : > { %v4818_v60 = vmul.f32 %v6550_v52, %v4817_v57  ;;  %v4824_v61 = vmul.f32 %v6552_v58, %v4812_v53  ;;  %vm4830_vm14 = vweird.f32 %v6552_v58  ;;  %v4988_v53 = vld [vmem:[#allocation3] sm:$0x1] }
0x10fe   : > { %vm4831_vm0 = vmor %vm4829_vm15, %vm4830_vm14 }
0x10ff   : > { %v4822_v63 = vsel %vm4821_vm13, %v6550_v52, %v4818_v60  ;;  %v4825_v0 = vmul.f32 %v6552_v58, %v4824_v61 }
0x1100   : > { %v4833_v1 = vmul.f32 %v4822_v63, %v4799_v47 }
0x1101   : > { %v4826_v3 = vmul.f32 0.5, %v4825_v0 }
0x1102   : > { %v4838_v5 = vmul.f32 %v6529_v62, %v4833_v1 }
0x1103   : > { %v4827_v49 = vsub.f32 1.5, %v4826_v3  ;;  %v6533_v3 = vld [vmem:[#allocation23] ss:$0 sm:$0xff] }
0x1104   : > { %v4843_v7 = vadd.f32 %v6530_v2, %v4838_v5 }
0x1105   : > { %v4828_v8 = vmul.f32 %v6552_v58, %v4827_v49 }
0x1106   : > { %5527 = vmatmul.msk.f32.vlgmr.msra.gmra.mxu2 %vm4423_vm4, %v4843_v7  ;;  %v6534_v7 = vld [vmem:[#allocation24] ss:$0 sm:$0xff] }
0x1107   : > { %v4832_v4 = vsel %vm4831_vm0, %v6552_v58, %v4828_v8 }
0x1108   : > { %v4834_v9 = vmul.f32 %v4832_v4, %v4800_v37 }
0x110a   : > { %v4839_v13 = vmul.f32 %v6529_v62, %v4834_v9 }
0x110c   : > { %v4844_v14 = vadd.f32 %v6530_v2, %v4839_v13  ;;  %v4987_v13 = vld [vmem:[#allocation26] sm:$0x1] }
0x110e   : > { %5528 = vmatmul.msk.f32.gmra.mxu2 %vm4423_vm4, %v4844_v14 }
0x1189   : > { %v4876_v59 = vpop.f32.mrf.mxu2 }
0x118a   : > { %v4877_v18 = vadd.f32 %v6531_v11, %v4876_v59 }
0x118c   : > { %vm4882_vm1 = vcmp.ge.f32.partialorder %v4877_v18, 0.0  ;;  %v4884_v10 = vmul.f32 0.01, %v4877_v18 }
0x118e   : > { %v4886_v16 = vsel %vm4882_vm1, %v4877_v18, %v4884_v10 }
0x118f   : > { %5529 = vmatmul.msk.f32.vlgmr.msra.gmra.mxu3 %vm4423_vm4, %v4886_v16 }
0x1191   : > { %v4879_v19 = vpop.f32.mrf.mxu2 }
0x1192   : > { %v4880_v20 = vadd.f32 %v6531_v11, %v4879_v19 }
0x1194   : > { %v4885_v21 = vmul.f32 0.01, %v4880_v20  ;;  %vm4883_vm3 = vcmp.ge.f32.partialorder %v4880_v20, 0.0 }
0x1196   : > { %v4887_v22 = vsel %vm4883_vm3, %v4880_v20, %v4885_v21 }
0x1197   : > { %5530 = vmatmul.msk.f32.gmra.mxu3 %vm4423_vm4, %v4887_v22 }
0x1212   : > { %v4919_v24 = vpop.f32.mrf.mxu3 }
0x1213   : > { %v4920_v25 = vadd.f32 %v6532_v23, %v4919_v24 }
0x1215   : > { %v4927_v26 = vmul.f32 0.01, %v4920_v25  ;;  %vm4925_vm5 = vcmp.ge.f32.partialorder %v4920_v25, 0.0 }
0x1217   : > { %v4929_v27 = vsel %vm4925_vm5, %v4920_v25, %v4927_v26 }
0x1218   : > { %v4933_v28 = vsel %vm4423_vm4, %v4929_v27, 0.0 }
0x1219   : > { %4934 = vadd.xlane.f32.xlu0 %v4933_v28 }
0x121a   : > { %v4922_v29 = vpop.f32.mrf.mxu3 }
0x121b   : > { %v4923_v30 = vadd.f32 %v6532_v23, %v4922_v29 }
0x121d   : > { %v4928_v31 = vmul.f32 0.01, %v4923_v30  ;;  %vm4926_vm6 = vcmp.ge.f32.partialorder %v4923_v30, 0.0 }
0x121f   : > { %v4930_v33 = vsel %vm4926_vm6, %v4923_v30, %v4928_v31 }
0x1220   : > { %v4936_v47 = vsel %vm4423_vm4, %v4930_v33, 0.0 }
0x1221   : > { %4937 = vadd.xlane.f32.xlu2 %v4936_v47 }
0x122d   : > { %4991 = vperm.xlu0 %6514, %v4988_v53  }
0x128c   : > { %v4935_v32 = vpop.xlane.xlu0 %4934 }
0x128d   : > { %v4939_v34 = vmul.f32 %v4935_v32, %v8230_v6 }
0x128f   : > { %v4941_v35 = vsub.f32 %v4929_v27, %v4939_v34 }
0x1291   : > { %v4943_v36 = vmul.f32 %v4941_v35, %v4941_v35 }
0x1293   : > { %v4945_v37 = vsel %vm4423_vm4, %v4943_v36, 0.0 }
0x1294   : > { %v4938_v38 = vpop.xlane.xlu2 %4937  ;;  %4946 = vadd.xlane.f32.xlu1 %v4945_v37 }
0x1295   : > { %v4940_v39 = vmul.f32 %v4938_v38, %v8230_v6 }
0x1297   : > { %v4942_v40 = vsub.f32 %v4930_v33, %v4940_v39 }
0x1299   : > { %v4944_v41 = vmul.f32 %v4942_v40, %v4942_v40 }
0x129b   : > { %v4948_v42 = vsel %vm4423_vm4, %v4944_v41, 0.0 }
0x129c   : > { %4949 = vadd.xlane.f32.xlu2 %v4948_v42 }
0x129f   : > { %v4992_v14 = vpop.permute.xlu0 %4991 }
0x12a0   : > { %v4994_v12 = vperm.slane %v4992_v14, 0 }
0x1307   : > { %v4947_v43 = vpop.xlane.xlu1 %4946 }
0x1308   : > { %v4951_v44 = vmul.f32 %v4947_v43, %v8230_v6 }
0x130a   : > { %v4953_v46 = vadd.f32 1e-05, %v4951_v44 }
0x130c   : > { %6553 = vrsqrt.f32 %v4953_v46  ;;  %vm4961_vm7 = vweird.f32 %v4953_v46 }
0x130f   : > { %v4950_v48 = vpop.xlane.xlu2 %4949 }
0x1310   : > { %v4952_v55 = vmul.f32 %v4950_v48, %v8230_v6 }
0x1312   : > { %v6554_v45 = vpop.eup %6553  ;;  %v4954_v50 = vadd.f32 1e-05, %v4952_v55 }
0x1313   : > { %v4956_v52 = vmul.f32 %v6554_v45, %v4953_v46  ;;  %vm4962_vm2 = vweird.f32 %v6554_v45 }
0x1314   : > { %6555 = vrsqrt.f32 %v4954_v50  ;;  %vm4963_vm9 = vmor %vm4961_vm7, %vm4962_vm2  ;;  %vm4971_vm10 = vweird.f32 %v4954_v50 }
0x1315   : > { %v4957_v54 = vmul.f32 %v6554_v45, %v4956_v52 }
0x1317   : > { %v4958_v51 = vmul.f32 0.5, %v4957_v54 }
0x1319   : > { %v4959_v57 = vsub.f32 1.5, %v4958_v51 }
0x131a   : > { %v6556_v56 = vpop.eup %6555 }
0x131b   : > { %v4966_v58 = vmul.f32 %v6556_v56, %v4954_v50  ;;  %v4960_v61 = vmul.f32 %v6554_v45, %v4959_v57  ;;  %vm4972_vm8 = vweird.f32 %v6556_v56 }
0x131c   : > { %vm4973_vm11 = vmor %vm4971_vm10, %vm4972_vm8 }
0x131d   : > { %v4967_v60 = vmul.f32 %v6556_v56, %v4966_v58  ;;  %v4964_v6 = vsel %vm4963_vm9, %v6554_v45, %v4960_v61 }
0x131e   : > { %v4975_v2 = vmul.f32 %v4964_v6, %v4941_v35 }
0x131f   : > { %v4968_v62 = vmul.f32 0.5, %v4967_v60 }
0x1320   : > { %v4980_v4 = vmul.f32 %v6533_v3, %v4975_v2 }
0x1321   : > { %v4969_v63 = vsub.f32 1.5, %v4968_v62 }
0x1322   : > { %v4985_v9 = vadd.f32 %v6534_v7, %v4980_v4 }
0x1323   : > { %v4970_v0 = vmul.f32 %v6556_v56, %v4969_v63 }
0x1325   : > { %v4974_v1 = vsel %vm4973_vm11, %v6556_v56, %v4970_v0 }
0x1326   : > { %v4976_v5 = vmul.f32 %v4974_v1, %v4942_v40 }
0x1328   : > { %v4981_v49 = vmul.f32 %v6533_v3, %v4976_v5 }
0x132a   : > { %v4986_v8 = vadd.f32 %v6534_v7, %v4981_v49 }
0x132c   : > { %5531 = vmatpush.xpose.msk.msrb.mxu0 %vm4423_vm4, %v4986_v8 }
0x1330   : > { %5532 = vmatpush.xpose.msk.msrb.mxu0 %vm4423_vm4, %v4985_v9 }
0x1333   : > { %5533 = vmatmul.msk.f32.vlgmr.msrb.gmra.mxu0 %vm4423_vm4, %v4987_v13 }
0x13b0   : > { %v5021_v15 = vpop.f32.mrf.mxu0 }
0x13b1   : > { %v5022_v17 = vadd.f32 %v5021_v15, %v4994_v12 }
0x13b3   : > { %5025 = vst.msk [vmem:[%s8480_s21] sm:$0x1] %vm5024_vm12, %v5022_v17 }
0x13b4 PF: > { %s8481_s25 = sld [smem:[#allocation94_spill]] }
0x13ba   : > { %s139_s22 = sadd.s32 1, %s8481_s25  }
0x13bb   : > { %p136_p3 = scmp.ge.s32.totalorder %s139_s22, 8  }
0x13bd   :  { %138 = sbr.rel (!%p136_p3) target bundleno = 135 (0x87), region = 455 }
0x13c2   :  { %5037 = vsyncpa [#allocation5], 1 }
0x13c3   :  { %5039 = vsyncpa [#allocation5 + $0x1], 1 }
0x13c4   :  { %5040 = vsyncpa [#allocation7], 1 }
0x13c5   :  { %5041 = vsyncpa [#allocation10], 1 }
0x13c6   :  { %5042 = vsyncpa [#allocation13], 1 }
0x13c7   :  { %5043 = vsyncpa [#allocation16], 1 }
0x13c8   :  { %5044 = vsyncpa [#allocation19], 1 }
0x13c9   :  { %5045 = vsyncpa [#allocation22], 1 }
0x13ca   :  { %5046 = vsyncpa [#allocation25], 1 }

</bundles_post_ra>
